<compile_context>
chip_gen: v7x
topology: tpu7x:2x2x1
jax: 0.10.0
libtpu: 0.0.40
codegen_flags: <defaults>
</compile_context>

<pallas_src>
import math

import jax
import jax.numpy as jnp
from jax.experimental import pallas as pl
from jax.experimental.pallas import tpu as pltpu

EMBED_DIM = 32
NUM_CLASSES_3D = 27      # 3x3x3 sub-volume grid -> index used by extract_subvolume
PRED_DIM = 1000          # fusion_dim / first-stage prediction width
HEAD_PAD = 1152          # 27 + 1000 = 1027 -> padded to 9*128 lanes (lane-dense store)
PATCH_2D = 4
PATCH_3D = 5
FEAT_3D_PAD = 128        # 1*5^3 = 125 -> padded to 128
N_TOK_3D = 64            # (20/5)^3
N_CAND = 27
CAND_TOKENS = N_CAND * 8  # 216 = 27 candidates x 2x2x2 patches each


# ------------------------- Pallas kernel -------------------------

def _atom_fused_kernel(tok2d_ref, tok3d_ref, tokall_ref, pool27_ref,
                       we2d_ref, be2d_ref, wkv_ref, bkv_ref,
                       we1_ref, be1_ref, wq1_ref, bq1_ref, wh1_ref, bh1_ref,
                       we2_ref, be2_ref, wq2_ref, bq2_ref, wh2_ref, bh2_ref,
                       heads1_ref, heads2_ref, xset_ref):
    f32 = jnp.float32
    scale = 1.0 / math.sqrt(EMBED_DIM)

    # ---- 2D branch: patch embed + fused K/V projection (self-attn is dead) ----
    tok2 = tok2d_ref[0]                                            # (16, 16)
    x2 = jnp.dot(tok2, we2d_ref[...], preferred_element_type=f32) + be2d_ref[...]
    kv = jnp.dot(x2, wkv_ref[...], preferred_element_type=f32) + bkv_ref[...]
    k = kv[:, :EMBED_DIM]                                          # (16, 32)
    v = kv[:, EMBED_DIM:]                                          # (16, 32)

    def cross_attn(q):
        # q: (N, 32) -> guided attention against the shared 2D k/v.
        s = jax.lax.dot_general(q, k, (((1,), (1,)), ((), ())),
                                preferred_element_type=f32) * scale
        s = s - jnp.max(s, axis=-1, keepdims=True)
        p = jnp.exp(s)
        p = p * pl.reciprocal(jnp.sum(p, axis=-1, keepdims=True), approx=True)
        return jnp.dot(p, v, preferred_element_type=f32)

    # ---- GA1: guided attention over the full-volume tokens ----
    t1 = tok3d_ref[0]                                              # (64, 128)
    x1 = jnp.dot(t1, we1_ref[...], preferred_element_type=f32) + be1_ref[...]
    q1 = jnp.dot(x1, wq1_ref[...], preferred_element_type=f32) + bq1_ref[...]
    xset = cross_attn(q1)                                          # (64, 32)
    xset_ref[0] = xset
    n1 = xset.shape[0]
    pool1 = jnp.full((1, n1), 1.0 / n1, dtype=f32)                 # mean-pool as matmul
    pooled1 = jnp.dot(pool1, xset, preferred_element_type=f32)     # (1, 32)
    heads1 = jnp.dot(pooled1.astype(jnp.bfloat16), wh1_ref[...],
                     preferred_element_type=f32) + bh1_ref[...]    # (1, 1152)
    heads1_ref[0] = heads1

    # ---- top-1 over the 27 class logits -> one-hot candidate selector ----
    cls = heads1[:, :NUM_CLASSES_3D]                               # (1, 27)
    ids = jax.lax.broadcasted_iota(jnp.int32, cls.shape, 1)
    mx = jnp.max(cls, axis=-1, keepdims=True)
    first = jnp.min(jnp.where(cls >= mx, ids, NUM_CLASSES_3D),
                    axis=-1, keepdims=True)                        # first argmax (1,1)
    onehot = (ids == first).astype(f32)                            # (1, 27)

    # ---- GA2 on all 27 candidate sub-volumes; select winner via matmul ----
    ta = tokall_ref[0]                                             # (216, 128)
    xa = jnp.dot(ta, we2_ref[...], preferred_element_type=f32) + be2_ref[...]
    qa = jnp.dot(xa, wq2_ref[...], preferred_element_type=f32) + bq2_ref[...]
    xseta = cross_attn(qa)                                         # (216, 32)
    pooled_all = jnp.dot(pool27_ref[...], xseta,
                         preferred_element_type=f32)               # (27, 32) per-cand mean
    pooled2 = jnp.dot(onehot, pooled_all, preferred_element_type=f32)   # (1, 32)
    heads2 = jnp.dot(pooled2.astype(jnp.bfloat16), wh2_ref[...],
                     preferred_element_type=f32) + bh2_ref[...]    # (1, 1152)
    heads2_ref[0] = heads2


def atom_fused(tok2d, tok3d, tokall, pool27, p):
    B, N2, P2 = tok2d.shape
    _, N3, PF = tok3d.shape
    _, NA, _ = tokall.shape
    D = EMBED_DIM
    H = HEAD_PAD
    const2 = lambda b: (0, 0)
    weights = [p["p2d_we"], p["p2d_be"], p["p2d_wkv"], p["p2d_bkv"],
               p["ga1_we"], p["ga1_be"], p["ga1_wq"], p["ga1_bq"],
               p["ga1_wh"], p["ga1_bh"],
               p["ga2_we"], p["ga2_be"], p["ga2_wq"], p["ga2_bq"],
               p["ga2_wh"], p["ga2_bh"]]
    w_specs = [pl.BlockSpec(w.shape, const2) for w in weights]
    out_shapes = (
        jax.ShapeDtypeStruct((B, 1, H), jnp.float32),   # GA1 heads slab
        jax.ShapeDtypeStruct((B, 1, H), jnp.float32),   # GA2 heads slab
        jax.ShapeDtypeStruct((B, N3, D), jnp.float32),  # GA1 x_set
    )
    return pl.pallas_call(
        _atom_fused_kernel,
        out_shape=out_shapes,
        grid=(B,),
        in_specs=[
            pl.BlockSpec((1, N2, P2), lambda b: (b, 0, 0)),
            pl.BlockSpec((1, N3, PF), lambda b: (b, 0, 0)),
            pl.BlockSpec((1, NA, PF), lambda b: (b, 0, 0)),
            pl.BlockSpec(pool27.shape, const2),
        ] + w_specs,
        out_specs=(
            pl.BlockSpec((1, 1, H), lambda b: (b, 0, 0)),
            pl.BlockSpec((1, 1, H), lambda b: (b, 0, 0)),
            pl.BlockSpec((1, N3, D), lambda b: (b, 0, 0)),
        ),
        compiler_params=pltpu.CompilerParams(dimension_semantics=("parallel",)),
    )(tok2d, tok3d, tokall, pool27, *weights)


# ------------------------- plain-JAX glue -------------------------

def patchify_2d(x, patch):
    # x: [B, C, H, W] -> [B, num_patches, C*patch*patch]
    B, C, H, W = x.shape
    gh, gw = H // patch, W // patch
    x = x.reshape(B, C, gh, patch, gw, patch)
    x = x.transpose(0, 2, 4, 1, 3, 5)
    return x.reshape(B, gh * gw, C * patch * patch)


def patchify_3d(x, patch):
    # x: [B, C, D, H, W] -> [B, num_patches, C*patch^3]
    B, C, D, H, W = x.shape
    gd, gh, gw = D // patch, H // patch, W // patch
    x = x.reshape(B, C, gd, patch, gh, patch, gw, patch)
    x = x.transpose(0, 2, 4, 6, 1, 3, 5, 7)
    return x.reshape(B, gd * gh * gw, C * patch * patch * patch)


def _candidate_token_indices():
    # Candidate c = i*9 + j*3 + k (matches extract_subvolume's idx decode).
    # Its 2x2x2 patches are the full-volume tokens (i+di, j+dj, k+dk) on the
    # 4x4x4 token grid -> static gather of the 64 GA1 tokens.
    idx = []
    for i in range(3):
        for j in range(3):
            for kk in range(3):
                for di in range(2):
                    for dj in range(2):
                        for dk in range(2):
                            idx.append((i + di) * 16 + (j + dj) * 4 + (kk + dk))
    return jnp.asarray(idx, dtype=jnp.int32)                       # (216,)


def _pool27():
    # (27, 216) block mean-pool matrix: row c averages candidate c's 8 tokens.
    rows = jnp.arange(N_CAND)[:, None]
    cols = jnp.arange(CAND_TOKENS)[None, :]
    return jnp.where(cols // 8 == rows, 1.0 / 8.0, 0.0).astype(jnp.float32)


def _init(key, shape):
    return jax.random.normal(key, shape, jnp.float32) * 0.02


def init_params(key):
    ks = jax.random.split(key, 16)
    p = {}
    # 2D ViT: patch embed + fused K/V weight [32, 64] (dead Q/self-attn removed)
    p["p2d_we"] = _init(ks[0], (PATCH_2D * PATCH_2D, EMBED_DIM))
    p["p2d_be"] = _init(ks[1], (1, EMBED_DIM))
    p["p2d_wkv"] = _init(ks[2], (EMBED_DIM, 2 * EMBED_DIM))
    p["p2d_bkv"] = _init(ks[3], (1, 2 * EMBED_DIM))
    # Guided-attention stages: embed (padded 125->128 rows) + Q + fused heads.
    # Head layout: [ pred_class (27) | pred (1000) | zero pad -> 1152 lanes ].
    nh = NUM_CLASSES_3D + PRED_DIM
    for i, prefix in enumerate(("ga1", "ga2")):
        b = 4 + 6 * i
        we = jnp.zeros((FEAT_3D_PAD, EMBED_DIM), jnp.float32)
        we = we.at[:PATCH_3D ** 3].set(_init(ks[b + 0], (PATCH_3D ** 3, EMBED_DIM)))
        p[prefix + "_we"] = we
        p[prefix + "_be"] = _init(ks[b + 1], (1, EMBED_DIM))
        p[prefix + "_wq"] = _init(ks[b + 2], (EMBED_DIM, EMBED_DIM))
        p[prefix + "_bq"] = _init(ks[b + 3], (1, EMBED_DIM))
        wh = jnp.zeros((EMBED_DIM, HEAD_PAD), jnp.float32)
        wh = wh.at[:, :nh].set(_init(ks[b + 4], (EMBED_DIM, nh)))
        bh = jnp.zeros((1, HEAD_PAD), jnp.float32)
        bh = bh.at[:, :nh].set(_init(ks[b + 5], (1, nh)))
        p[prefix + "_wh"] = wh.astype(jnp.bfloat16)   # dominant weight stored bf16
        p[prefix + "_bh"] = bh
    return p


def enhanced_atom_forward(params, images_3d, images_2d):
    # brainmvp_extractor is None -> brainmvp_features = None -> adapters/fusion skipped.
    tok2d = patchify_2d(images_2d, PATCH_2D)                       # [B, 16, 16]
    tok3d = patchify_3d(images_3d, PATCH_3D)                       # [B, 64, 125]
    tok3d = jnp.pad(tok3d, ((0, 0), (0, 0), (0, FEAT_3D_PAD - tok3d.shape[-1])))
    # All 27 stride-5 10^3 sub-volumes re-use the 64 full-volume tokens -> static gather.
    tokall = jnp.take(tok3d, _candidate_token_indices(), axis=1)   # [B, 216, 128]
    pool27 = _pool27()

    heads1, heads2, x_set = atom_fused(tok2d, tok3d, tokall, pool27, params)
    heads1 = heads1[:, 0]                                          # [B, 1152]
    heads2 = heads2[:, 0]

    pred_class = heads1[:, :NUM_CLASSES_3D]                        # [B, 27]
    pred1 = heads1[:, NUM_CLASSES_3D:NUM_CLASSES_3D + PRED_DIM]    # [B, 1000]
    # TODO(synk): torch.topk(k=1) index selection kept in plain JAX (control glue).
    pred_class_k1 = jnp.argmax(pred_class, axis=-1).astype(jnp.int32)[:, None]

    pred_class_new = heads2[:, :NUM_CLASSES_3D]
    pred_new1 = heads2[:, NUM_CLASSES_3D:NUM_CLASSES_3D + PRED_DIM]
    pred_class_k1_new = jnp.argmax(pred_class_new, axis=-1).astype(jnp.int32)[:, None]

    return ((pred1, pred_class, pred_class_k1, x_set),
            (pred_new1, pred_class_new, pred_class_k1_new))


if __name__ == "__main__":
    key = jax.random.PRNGKey(0)
    kp, k3, k2 = jax.random.split(key, 3)
    params = init_params(kp)

    # Shapes consistent with the forward: 20^3 volume (3x3x3 grid of stride-5
    # 10^3 sub-volumes), single channel; 16x16 2D slice; batch 2.
    images_3d = jax.random.normal(k3, (2, 1, 20, 20, 20), jnp.float32)
    images_2d = jax.random.normal(k2, (2, 1, 16, 16), jnp.float32)

    fwd = jax.jit(enhanced_atom_forward)
    out = fwd(params, images_3d, images_2d)
    jax.block_until_ready(out)

    (pred1, pred_class, pred_class_k1, x_set), \
        (pred_new1, pred_class_new, pred_class_k1_new) = out
    assert pred1.shape == (2, PRED_DIM)
    assert pred_class.shape == (2, NUM_CLASSES_3D)
    assert pred_class_k1.shape == (2, 1)
    assert x_set.shape == (2, N_TOK_3D, EMBED_DIM)
    assert pred_new1.shape == (2, PRED_DIM)
    assert pred_class_new.shape == (2, NUM_CLASSES_3D)
    assert pred_class_k1_new.shape == (2, 1)
    print("KERNEL_OK")
</pallas_src>

<mosaic_0001>
module attributes {stable_mosaic.version = 11 : i64} {
  func.func @_atom_fused_kernel(%arg0: i32, %arg1: memref<1x16x16xf32, #tpu.memory_space<vmem>>, %arg2: memref<1x64x128xf32, #tpu.memory_space<vmem>>, %arg3: memref<1x216x128xf32, #tpu.memory_space<vmem>>, %arg4: memref<27x216xf32, #tpu.memory_space<vmem>>, %arg5: memref<16x32xf32, #tpu.memory_space<vmem>>, %arg6: memref<1x32xf32, #tpu.memory_space<vmem>>, %arg7: memref<32x64xf32, #tpu.memory_space<vmem>>, %arg8: memref<1x64xf32, #tpu.memory_space<vmem>>, %arg9: memref<128x32xf32, #tpu.memory_space<vmem>>, %arg10: memref<1x32xf32, #tpu.memory_space<vmem>>, %arg11: memref<32x32xf32, #tpu.memory_space<vmem>>, %arg12: memref<1x32xf32, #tpu.memory_space<vmem>>, %arg13: memref<32x1152xbf16, #tpu.memory_space<vmem>>, %arg14: memref<1x1152xf32, #tpu.memory_space<vmem>>, %arg15: memref<128x32xf32, #tpu.memory_space<vmem>>, %arg16: memref<1x32xf32, #tpu.memory_space<vmem>>, %arg17: memref<32x32xf32, #tpu.memory_space<vmem>>, %arg18: memref<1x32xf32, #tpu.memory_space<vmem>>, %arg19: memref<32x1152xbf16, #tpu.memory_space<vmem>>, %arg20: memref<1x1152xf32, #tpu.memory_space<vmem>>, %arg21: memref<1x1x1152xf32, #tpu.memory_space<vmem>>, %arg22: memref<1x1x1152xf32, #tpu.memory_space<vmem>>, %arg23: memref<1x64x32xf32, #tpu.memory_space<vmem>>) attributes {dimension_semantics = [#tpu.dimension_semantics<parallel>], iteration_bounds = array<i64: 2>, scalar_prefetch = 0 : i64, scratch_operands = 0 : i64, tpu.core_type = #tpu.core_type<tc>, window_params = [{transform_indices = @transform_0, window_bounds = array<i64: 1, 16, 16>}, {transform_indices = @transform_1, window_bounds = array<i64: 1, 64, 128>}, {transform_indices = @transform_2, window_bounds = array<i64: 1, 216, 128>}, {pipeline_mode = #tpu.pipeline_mode<synchronous>, transform_indices = @transform_3, window_bounds = array<i64: 27, 216>}, {pipeline_mode = #tpu.pipeline_mode<synchronous>, transform_indices = @transform_4, window_bounds = array<i64: 16, 32>}, {pipeline_mode = #tpu.pipeline_mode<synchronous>, transform_indices = @transform_5, window_bounds = array<i64: 1, 32>}, {pipeline_mode = #tpu.pipeline_mode<synchronous>, transform_indices = @transform_6, window_bounds = array<i64: 32, 64>}, {pipeline_mode = #tpu.pipeline_mode<synchronous>, transform_indices = @transform_7, window_bounds = array<i64: 1, 64>}, {pipeline_mode = #tpu.pipeline_mode<synchronous>, transform_indices = @transform_8, window_bounds = array<i64: 128, 32>}, {pipeline_mode = #tpu.pipeline_mode<synchronous>, transform_indices = @transform_9, window_bounds = array<i64: 1, 32>}, {pipeline_mode = #tpu.pipeline_mode<synchronous>, transform_indices = @transform_10, window_bounds = array<i64: 32, 32>}, {pipeline_mode = #tpu.pipeline_mode<synchronous>, transform_indices = @transform_11, window_bounds = array<i64: 1, 32>}, {pipeline_mode = #tpu.pipeline_mode<synchronous>, transform_indices = @transform_12, window_bounds = array<i64: 32, 1152>}, {pipeline_mode = #tpu.pipeline_mode<synchronous>, transform_indices = @transform_13, window_bounds = array<i64: 1, 1152>}, {pipeline_mode = #tpu.pipeline_mode<synchronous>, transform_indices = @transform_14, window_bounds = array<i64: 128, 32>}, {pipeline_mode = #tpu.pipeline_mode<synchronous>, transform_indices = @transform_15, window_bounds = array<i64: 1, 32>}, {pipeline_mode = #tpu.pipeline_mode<synchronous>, transform_indices = @transform_16, window_bounds = array<i64: 32, 32>}, {pipeline_mode = #tpu.pipeline_mode<synchronous>, transform_indices = @transform_17, window_bounds = array<i64: 1, 32>}, {pipeline_mode = #tpu.pipeline_mode<synchronous>, transform_indices = @transform_18, window_bounds = array<i64: 32, 1152>}, {pipeline_mode = #tpu.pipeline_mode<synchronous>, transform_indices = @transform_19, window_bounds = array<i64: 1, 1152>}, {transform_indices = @transform_20, window_bounds = array<i64: 1, 1, 1152>}, {transform_indices = @transform_21, window_bounds = array<i64: 1, 1, 1152>}, {transform_indices = @transform_22, window_bounds = array<i64: 1, 64, 32>}]} {
    %c0 = arith.constant 0 : index
    %c0_0 = arith.constant 0 : index
    %c0_1 = arith.constant 0 : index
    %0 = vector.load %arg1[%c0, %c0_0, %c0_1] : memref<1x16x16xf32, #tpu.memory_space<vmem>>, vector<1x16x16xf32>
    %1 = vector.shape_cast %0 : vector<1x16x16xf32> to vector<16x16xf32>
    %c0_2 = arith.constant 0 : index
    %c0_3 = arith.constant 0 : index
    %2 = vector.load %arg5[%c0_2, %c0_3] : memref<16x32xf32, #tpu.memory_space<vmem>>, vector<16x32xf32>
    %cst = arith.constant dense<0.000000e+00> : vector<16x32xf32>
    %3 = tpu.matmul %1, %2, %cst {dimension_numbers = #tpu.dot_dimension_numbers<[1], [0], [0], [1], [0, 0, 1, 1], [], []>} : vector<16x16xf32>, vector<16x32xf32>, vector<16x32xf32> -> vector<16x32xf32>
    %c0_4 = arith.constant 0 : index
    %c0_5 = arith.constant 0 : index
    %4 = vector.load %arg6[%c0_4, %c0_5] : memref<1x32xf32, #tpu.memory_space<vmem>>, vector<1x32xf32>
    %5 = vector.broadcast %4 : vector<1x32xf32> to vector<16x32xf32>
    %6 = arith.addf %3, %5 : vector<16x32xf32>
    %c0_6 = arith.constant 0 : index
    %c0_7 = arith.constant 0 : index
    %7 = vector.load %arg7[%c0_6, %c0_7] : memref<32x64xf32, #tpu.memory_space<vmem>>, vector<32x64xf32>
    %cst_8 = arith.constant dense<0.000000e+00> : vector<16x64xf32>
    %8 = tpu.matmul %6, %7, %cst_8 {dimension_numbers = #tpu.dot_dimension_numbers<[1], [0], [0], [1], [0, 0, 1, 1], [], []>} : vector<16x32xf32>, vector<32x64xf32>, vector<16x64xf32> -> vector<16x64xf32>
    %c0_9 = arith.constant 0 : index
    %c0_10 = arith.constant 0 : index
    %9 = vector.load %arg8[%c0_9, %c0_10] : memref<1x64xf32, #tpu.memory_space<vmem>>, vector<1x64xf32>
    %10 = vector.broadcast %9 : vector<1x64xf32> to vector<16x64xf32>
    %11 = arith.addf %8, %10 : vector<16x64xf32>
    %12 = vector.extract_strided_slice %11 {offsets = [0, 0], sizes = [16, 32], strides = [1, 1]} : vector<16x64xf32> to vector<16x32xf32>
    %13 = vector.extract_strided_slice %11 {offsets = [0, 32], sizes = [16, 32], strides = [1, 1]} : vector<16x64xf32> to vector<16x32xf32>
    %c0_11 = arith.constant 0 : index
    %c0_12 = arith.constant 0 : index
    %c0_13 = arith.constant 0 : index
    %14 = vector.load %arg2[%c0_11, %c0_12, %c0_13] : memref<1x64x128xf32, #tpu.memory_space<vmem>>, vector<1x64x128xf32>
    %15 = vector.shape_cast %14 : vector<1x64x128xf32> to vector<64x128xf32>
    %c0_14 = arith.constant 0 : index
    %c0_15 = arith.constant 0 : index
    %16 = vector.load %arg9[%c0_14, %c0_15] : memref<128x32xf32, #tpu.memory_space<vmem>>, vector<128x32xf32>
    %cst_16 = arith.constant dense<0.000000e+00> : vector<64x32xf32>
    %17 = tpu.matmul %15, %16, %cst_16 {dimension_numbers = #tpu.dot_dimension_numbers<[1], [0], [0], [1], [0, 0, 1, 1], [], []>} : vector<64x128xf32>, vector<128x32xf32>, vector<64x32xf32> -> vector<64x32xf32>
    %c0_17 = arith.constant 0 : index
    %c0_18 = arith.constant 0 : index
    %18 = vector.load %arg10[%c0_17, %c0_18] : memref<1x32xf32, #tpu.memory_space<vmem>>, vector<1x32xf32>
    %19 = vector.broadcast %18 : vector<1x32xf32> to vector<64x32xf32>
    %20 = arith.addf %17, %19 : vector<64x32xf32>
    %c0_19 = arith.constant 0 : index
    %c0_20 = arith.constant 0 : index
    %21 = vector.load %arg11[%c0_19, %c0_20] : memref<32x32xf32, #tpu.memory_space<vmem>>, vector<32x32xf32>
    %cst_21 = arith.constant dense<0.000000e+00> : vector<64x32xf32>
    %22 = tpu.matmul %20, %21, %cst_21 {dimension_numbers = #tpu.dot_dimension_numbers<[1], [0], [0], [1], [0, 0, 1, 1], [], []>} : vector<64x32xf32>, vector<32x32xf32>, vector<64x32xf32> -> vector<64x32xf32>
    %c0_22 = arith.constant 0 : index
    %c0_23 = arith.constant 0 : index
    %23 = vector.load %arg12[%c0_22, %c0_23] : memref<1x32xf32, #tpu.memory_space<vmem>>, vector<1x32xf32>
    %24 = vector.broadcast %23 : vector<1x32xf32> to vector<64x32xf32>
    %25 = arith.addf %22, %24 : vector<64x32xf32>
    %cst_24 = arith.constant dense<0.000000e+00> : vector<64x16xf32>
    %26 = tpu.matmul %25, %12, %cst_24 {dimension_numbers = #tpu.dot_dimension_numbers<[1], [1], [0], [0], [0, 0, 1, 0], [], []>} : vector<64x32xf32>, vector<16x32xf32>, vector<64x16xf32> -> vector<64x16xf32>
    %cst_25 = arith.constant 0.176776692 : f32
    %27 = vector.broadcast %cst_25 : f32 to vector<64x16xf32>
    %28 = arith.mulf %26, %27 : vector<64x16xf32>
    %cst_26 = arith.constant dense<0xFF800000> : vector<64xf32>
    %29 = vector.multi_reduction <maximumf>, %28, %cst_26 [1] : vector<64x16xf32> to vector<64xf32>
    %30 = vector.shape_cast %29 : vector<64xf32> to vector<64x1xf32>
    %31 = vector.broadcast %30 : vector<64x1xf32> to vector<64x16xf32>
    %32 = arith.subf %28, %31 : vector<64x16xf32>
    %33 = math.exp %32 : vector<64x16xf32>
    %cst_27 = arith.constant dense<0.000000e+00> : vector<64xf32>
    %34 = vector.multi_reduction <add>, %33, %cst_27 [1] : vector<64x16xf32> to vector<64xf32>
    %35 = vector.shape_cast %34 : vector<64xf32> to vector<64x1xf32>
    %36 = tpu.reciprocal %35 {approx = true} : vector<64x1xf32> -> vector<64x1xf32>
    %37 = vector.broadcast %36 : vector<64x1xf32> to vector<64x16xf32>
    %38 = arith.mulf %33, %37 : vector<64x16xf32>
    %cst_28 = arith.constant dense<0.000000e+00> : vector<64x32xf32>
    %39 = tpu.matmul %38, %13, %cst_28 {dimension_numbers = #tpu.dot_dimension_numbers<[1], [0], [0], [1], [0, 0, 1, 1], [], []>} : vector<64x16xf32>, vector<16x32xf32>, vector<64x32xf32> -> vector<64x32xf32>
    %c0_29 = arith.constant 0 : index
    %c0_30 = arith.constant 0 : index
    %c0_31 = arith.constant 0 : index
    %40 = vector.load %arg23[%c0_29, %c0_30, %c0_31] : memref<1x64x32xf32, #tpu.memory_space<vmem>>, vector<1x64x32xf32>
    %41 = vector.shape_cast %40 : vector<1x64x32xf32> to vector<64x32xf32>
    %42 = vector.shape_cast %39 : vector<64x32xf32> to vector<1x64x32xf32>
    tpu.vector_store %arg23[%c0_29, %c0_30, %c0_31], %42 {strides = array<i32>} : memref<1x64x32xf32, #tpu.memory_space<vmem>>, vector<1x64x32xf32>,
    %cst_32 = arith.constant 1.562500e-02 : f32
    %43 = vector.broadcast %cst_32 : f32 to vector<1x64xf32>
    %cst_33 = arith.constant dense<0.000000e+00> : vector<1x32xf32>
    %44 = tpu.matmul %43, %39, %cst_33 {dimension_numbers = #tpu.dot_dimension_numbers<[1], [0], [0], [1], [0, 0, 1, 1], [], []>} : vector<1x64xf32>, vector<64x32xf32>, vector<1x32xf32> -> vector<1x32xf32>
    %45 = arith.truncf %44 : vector<1x32xf32> to vector<1x32xbf16>
    %c0_34 = arith.constant 0 : index
    %c0_35 = arith.constant 0 : index
    %46 = vector.load %arg13[%c0_34, %c0_35] : memref<32x1152xbf16, #tpu.memory_space<vmem>>, vector<32x1152xbf16>
    %cst_36 = arith.constant dense<0.000000e+00> : vector<1x1152xf32>
    %47 = tpu.matmul %45, %46, %cst_36 {dimension_numbers = #tpu.dot_dimension_numbers<[1], [0], [0], [1], [0, 0, 1, 1], [], []>} : vector<1x32xbf16>, vector<32x1152xbf16>, vector<1x1152xf32> -> vector<1x1152xf32>
    %c0_37 = arith.constant 0 : index
    %c0_38 = arith.constant 0 : index
    %48 = vector.load %arg14[%c0_37, %c0_38] : memref<1x1152xf32, #tpu.memory_space<vmem>>, vector<1x1152xf32>
    %49 = arith.addf %47, %48 : vector<1x1152xf32>
    %c0_39 = arith.constant 0 : index
    %c0_40 = arith.constant 0 : index
    %c0_41 = arith.constant 0 : index
    %50 = vector.load %arg21[%c0_39, %c0_40, %c0_41] : memref<1x1x1152xf32, #tpu.memory_space<vmem>>, vector<1x1x1152xf32>
    %51 = vector.shape_cast %50 : vector<1x1x1152xf32> to vector<1x1152xf32>
    %52 = vector.shape_cast %49 : vector<1x1152xf32> to vector<1x1x1152xf32>
    tpu.vector_store %arg21[%c0_39, %c0_40, %c0_41], %52 {strides = array<i32>} : memref<1x1x1152xf32, #tpu.memory_space<vmem>>, vector<1x1x1152xf32>,
    %53 = vector.extract_strided_slice %49 {offsets = [0, 0], sizes = [1, 27], strides = [1, 1]} : vector<1x1152xf32> to vector<1x27xf32>
    %54 = tpu.iota {dimensions = array<i32: 1>} : vector<1x27xi32>
    %cst_42 = arith.constant dense<0xFF800000> : vector<1xf32>
    %55 = vector.multi_reduction <maximumf>, %53, %cst_42 [1] : vector<1x27xf32> to vector<1xf32>
    %56 = vector.shape_cast %55 : vector<1xf32> to vector<1x1xf32>
    %57 = vector.broadcast %56 : vector<1x1xf32> to vector<1x27xf32>
    %58 = arith.cmpf oge, %53, %57 : vector<1x27xf32>
    %c27_i32 = arith.constant 27 : i32
    %59 = vector.broadcast %c27_i32 : i32 to vector<1x27xi32>
    %60 = arith.select %58, %54, %59 : vector<1x27xi1>, vector<1x27xi32>
    %cst_43 = arith.constant dense<2147483647> : vector<1xi32>
    %61 = vector.multi_reduction <minsi>, %60, %cst_43 [1] : vector<1x27xi32> to vector<1xi32>
    %62 = vector.shape_cast %61 : vector<1xi32> to vector<1x1xi32>
    %63 = vector.broadcast %62 : vector<1x1xi32> to vector<1x27xi32>
    %64 = arith.cmpi eq, %54, %63 : vector<1x27xi32>
    %65 = arith.extui %64 : vector<1x27xi1> to vector<1x27xi32>
    %66 = arith.sitofp %65 : vector<1x27xi32> to vector<1x27xf32>
    %c0_44 = arith.constant 0 : index
    %c0_45 = arith.constant 0 : index
    %c0_46 = arith.constant 0 : index
    %67 = vector.load %arg3[%c0_44, %c0_45, %c0_46] : memref<1x216x128xf32, #tpu.memory_space<vmem>>, vector<1x216x128xf32>
    %68 = vector.shape_cast %67 : vector<1x216x128xf32> to vector<216x128xf32>
    %c0_47 = arith.constant 0 : index
    %c0_48 = arith.constant 0 : index
    %69 = vector.load %arg15[%c0_47, %c0_48] : memref<128x32xf32, #tpu.memory_space<vmem>>, vector<128x32xf32>
    %cst_49 = arith.constant dense<0.000000e+00> : vector<216x32xf32>
    %70 = tpu.matmul %68, %69, %cst_49 {dimension_numbers = #tpu.dot_dimension_numbers<[1], [0], [0], [1], [0, 0, 1, 1], [], []>} : vector<216x128xf32>, vector<128x32xf32>, vector<216x32xf32> -> vector<216x32xf32>
    %c0_50 = arith.constant 0 : index
    %c0_51 = arith.constant 0 : index
    %71 = vector.load %arg16[%c0_50, %c0_51] : memref<1x32xf32, #tpu.memory_space<vmem>>, vector<1x32xf32>
    %72 = vector.broadcast %71 : vector<1x32xf32> to vector<216x32xf32>
    %73 = arith.addf %70, %72 : vector<216x32xf32>
    %c0_52 = arith.constant 0 : index
    %c0_53 = arith.constant 0 : index
    %74 = vector.load %arg17[%c0_52, %c0_53] : memref<32x32xf32, #tpu.memory_space<vmem>>, vector<32x32xf32>
    %cst_54 = arith.constant dense<0.000000e+00> : vector<216x32xf32>
    %75 = tpu.matmul %73, %74, %cst_54 {dimension_numbers = #tpu.dot_dimension_numbers<[1], [0], [0], [1], [0, 0, 1, 1], [], []>} : vector<216x32xf32>, vector<32x32xf32>, vector<216x32xf32> -> vector<216x32xf32>
    %c0_55 = arith.constant 0 : index
    %c0_56 = arith.constant 0 : index
    %76 = vector.load %arg18[%c0_55, %c0_56] : memref<1x32xf32, #tpu.memory_space<vmem>>, vector<1x32xf32>
    %77 = vector.broadcast %76 : vector<1x32xf32> to vector<216x32xf32>
    %78 = arith.addf %75, %77 : vector<216x32xf32>
    %cst_57 = arith.constant dense<0.000000e+00> : vector<216x16xf32>
    %79 = tpu.matmul %78, %12, %cst_57 {dimension_numbers = #tpu.dot_dimension_numbers<[1], [1], [0], [0], [0, 0, 1, 0], [], []>} : vector<216x32xf32>, vector<16x32xf32>, vector<216x16xf32> -> vector<216x16xf32>
    %cst_58 = arith.constant 0.176776692 : f32
    %80 = vector.broadcast %cst_58 : f32 to vector<216x16xf32>
    %81 = arith.mulf %79, %80 : vector<216x16xf32>
    %cst_59 = arith.constant dense<0xFF800000> : vector<216xf32>
    %82 = vector.multi_reduction <maximumf>, %81, %cst_59 [1] : vector<216x16xf32> to vector<216xf32>
    %83 = vector.shape_cast %82 : vector<216xf32> to vector<216x1xf32>
    %84 = vector.broadcast %83 : vector<216x1xf32> to vector<216x16xf32>
    %85 = arith.subf %81, %84 : vector<216x16xf32>
    %86 = math.exp %85 : vector<216x16xf32>
    %cst_60 = arith.constant dense<0.000000e+00> : vector<216xf32>
    %87 = vector.multi_reduction <add>, %86, %cst_60 [1] : vector<216x16xf32> to vector<216xf32>
    %88 = vector.shape_cast %87 : vector<216xf32> to vector<216x1xf32>
    %89 = tpu.reciprocal %88 {approx = true} : vector<216x1xf32> -> vector<216x1xf32>
    %90 = vector.broadcast %89 : vector<216x1xf32> to vector<216x16xf32>
    %91 = arith.mulf %86, %90 : vector<216x16xf32>
    %cst_61 = arith.constant dense<0.000000e+00> : vector<216x32xf32>
    %92 = tpu.matmul %91, %13, %cst_61 {dimension_numbers = #tpu.dot_dimension_numbers<[1], [0], [0], [1], [0, 0, 1, 1], [], []>} : vector<216x16xf32>, vector<16x32xf32>, vector<216x32xf32> -> vector<216x32xf32>
    %c0_62 = arith.constant 0 : index
    %c0_63 = arith.constant 0 : index
    %93 = vector.load %arg4[%c0_62, %c0_63] : memref<27x216xf32, #tpu.memory_space<vmem>>, vector<27x216xf32>
    %cst_64 = arith.constant dense<0.000000e+00> : vector<27x32xf32>
    %94 = tpu.matmul %93, %92, %cst_64 {dimension_numbers = #tpu.dot_dimension_numbers<[1], [0], [0], [1], [0, 0, 1, 1], [], []>} : vector<27x216xf32>, vector<216x32xf32>, vector<27x32xf32> -> vector<27x32xf32>
    %cst_65 = arith.constant dense<0.000000e+00> : vector<1x32xf32>
    %95 = tpu.matmul %66, %94, %cst_65 {dimension_numbers = #tpu.dot_dimension_numbers<[1], [0], [0], [1], [0, 0, 1, 1], [], []>} : vector<1x27xf32>, vector<27x32xf32>, vector<1x32xf32> -> vector<1x32xf32>
    %96 = arith.truncf %95 : vector<1x32xf32> to vector<1x32xbf16>
    %c0_66 = arith.constant 0 : index
    %c0_67 = arith.constant 0 : index
    %97 = vector.load %arg19[%c0_66, %c0_67] : memref<32x1152xbf16, #tpu.memory_space<vmem>>, vector<32x1152xbf16>
    %cst_68 = arith.constant dense<0.000000e+00> : vector<1x1152xf32>
    %98 = tpu.matmul %96, %97, %cst_68 {dimension_numbers = #tpu.dot_dimension_numbers<[1], [0], [0], [1], [0, 0, 1, 1], [], []>} : vector<1x32xbf16>, vector<32x1152xbf16>, vector<1x1152xf32> -> vector<1x1152xf32>
    %c0_69 = arith.constant 0 : index
    %c0_70 = arith.constant 0 : index
    %99 = vector.load %arg20[%c0_69, %c0_70] : memref<1x1152xf32, #tpu.memory_space<vmem>>, vector<1x1152xf32>
    %100 = arith.addf %98, %99 : vector<1x1152xf32>
    %c0_71 = arith.constant 0 : index
    %c0_72 = arith.constant 0 : index
    %c0_73 = arith.constant 0 : index
    %101 = vector.load %arg22[%c0_71, %c0_72, %c0_73] : memref<1x1x1152xf32, #tpu.memory_space<vmem>>, vector<1x1x1152xf32>
    %102 = vector.shape_cast %101 : vector<1x1x1152xf32> to vector<1x1152xf32>
    %103 = vector.shape_cast %100 : vector<1x1152xf32> to vector<1x1x1152xf32>
    tpu.vector_store %arg22[%c0_71, %c0_72, %c0_73], %103 {strides = array<i32>} : memref<1x1x1152xf32, #tpu.memory_space<vmem>>, vector<1x1x1152xf32>,
    return
  }
  func.func @transform_0(%arg0: i32) -> (i32, i32, i32) {
    %c0_i32 = arith.constant 0 : i32
    %c0_i32_0 = arith.constant 0 : i32
    %c0_i32_1 = arith.constant 0 : i32
    return %arg0, %c0_i32, %c0_i32_0 : i32, i32, i32
  }
  func.func @transform_1(%arg0: i32) -> (i32, i32, i32) {
    %c0_i32 = arith.constant 0 : i32
    %c0_i32_0 = arith.constant 0 : i32
    %c0_i32_1 = arith.constant 0 : i32
    return %arg0, %c0_i32, %c0_i32_0 : i32, i32, i32
  }
  func.func @transform_2(%arg0: i32) -> (i32, i32, i32) {
    %c0_i32 = arith.constant 0 : i32
    %c0_i32_0 = arith.constant 0 : i32
    %c0_i32_1 = arith.constant 0 : i32
    return %arg0, %c0_i32, %c0_i32_0 : i32, i32, i32
  }
  func.func @transform_3(%arg0: i32) -> (i32, i32) {
    %c0_i32 = arith.constant 0 : i32
    %c0_i32_0 = arith.constant 0 : i32
    %c0_i32_1 = arith.constant 0 : i32
    return %c0_i32, %c0_i32_0 : i32, i32
  }
  func.func @transform_4(%arg0: i32) -> (i32, i32) {
    %c0_i32 = arith.constant 0 : i32
    %c0_i32_0 = arith.constant 0 : i32
    %c0_i32_1 = arith.constant 0 : i32
    return %c0_i32, %c0_i32_0 : i32, i32
  }
  func.func @transform_5(%arg0: i32) -> (i32, i32) {
    %c0_i32 = arith.constant 0 : i32
    %c0_i32_0 = arith.constant 0 : i32
    %c0_i32_1 = arith.constant 0 : i32
    return %c0_i32, %c0_i32_0 : i32, i32
  }
  func.func @transform_6(%arg0: i32) -> (i32, i32) {
    %c0_i32 = arith.constant 0 : i32
    %c0_i32_0 = arith.constant 0 : i32
    %c0_i32_1 = arith.constant 0 : i32
    return %c0_i32, %c0_i32_0 : i32, i32
  }
  func.func @transform_7(%arg0: i32) -> (i32, i32) {
    %c0_i32 = arith.constant 0 : i32
    %c0_i32_0 = arith.constant 0 : i32
    %c0_i32_1 = arith.constant 0 : i32
    return %c0_i32, %c0_i32_0 : i32, i32
  }
  func.func @transform_8(%arg0: i32) -> (i32, i32) {
    %c0_i32 = arith.constant 0 : i32
    %c0_i32_0 = arith.constant 0 : i32
    %c0_i32_1 = arith.constant 0 : i32
    return %c0_i32, %c0_i32_0 : i32, i32
  }
  func.func @transform_9(%arg0: i32) -> (i32, i32) {
    %c0_i32 = arith.constant 0 : i32
    %c0_i32_0 = arith.constant 0 : i32
    %c0_i32_1 = arith.constant 0 : i32
    return %c0_i32, %c0_i32_0 : i32, i32
  }
  func.func @transform_10(%arg0: i32) -> (i32, i32) {
    %c0_i32 = arith.constant 0 : i32
    %c0_i32_0 = arith.constant 0 : i32
    %c0_i32_1 = arith.constant 0 : i32
    return %c0_i32, %c0_i32_0 : i32, i32
  }
  func.func @transform_11(%arg0: i32) -> (i32, i32) {
    %c0_i32 = arith.constant 0 : i32
    %c0_i32_0 = arith.constant 0 : i32
    %c0_i32_1 = arith.constant 0 : i32
    return %c0_i32, %c0_i32_0 : i32, i32
  }
  func.func @transform_12(%arg0: i32) -> (i32, i32) {
    %c0_i32 = arith.constant 0 : i32
    %c0_i32_0 = arith.constant 0 : i32
    %c0_i32_1 = arith.constant 0 : i32
    return %c0_i32, %c0_i32_0 : i32, i32
  }
  func.func @transform_13(%arg0: i32) -> (i32, i32) {
    %c0_i32 = arith.constant 0 : i32
    %c0_i32_0 = arith.constant 0 : i32
    %c0_i32_1 = arith.constant 0 : i32
    return %c0_i32, %c0_i32_0 : i32, i32
  }
  func.func @transform_14(%arg0: i32) -> (i32, i32) {
    %c0_i32 = arith.constant 0 : i32
    %c0_i32_0 = arith.constant 0 : i32
    %c0_i32_1 = arith.constant 0 : i32
    return %c0_i32, %c0_i32_0 : i32, i32
  }
  func.func @transform_15(%arg0: i32) -> (i32, i32) {
    %c0_i32 = arith.constant 0 : i32
    %c0_i32_0 = arith.constant 0 : i32
    %c0_i32_1 = arith.constant 0 : i32
    return %c0_i32, %c0_i32_0 : i32, i32
  }
  func.func @transform_16(%arg0: i32) -> (i32, i32) {
    %c0_i32 = arith.constant 0 : i32
    %c0_i32_0 = arith.constant 0 : i32
    %c0_i32_1 = arith.constant 0 : i32
    return %c0_i32, %c0_i32_0 : i32, i32
  }
  func.func @transform_17(%arg0: i32) -> (i32, i32) {
    %c0_i32 = arith.constant 0 : i32
    %c0_i32_0 = arith.constant 0 : i32
    %c0_i32_1 = arith.constant 0 : i32
    return %c0_i32, %c0_i32_0 : i32, i32
  }
  func.func @transform_18(%arg0: i32) -> (i32, i32) {
    %c0_i32 = arith.constant 0 : i32
    %c0_i32_0 = arith.constant 0 : i32
    %c0_i32_1 = arith.constant 0 : i32
    return %c0_i32, %c0_i32_0 : i32, i32
  }
  func.func @transform_19(%arg0: i32) -> (i32, i32) {
    %c0_i32 = arith.constant 0 : i32
    %c0_i32_0 = arith.constant 0 : i32
    %c0_i32_1 = arith.constant 0 : i32
    return %c0_i32, %c0_i32_0 : i32, i32
  }
  func.func @transform_20(%arg0: i32) -> (i32, i32, i32) {
    %c0_i32 = arith.constant 0 : i32
    %c0_i32_0 = arith.constant 0 : i32
    %c0_i32_1 = arith.constant 0 : i32
    return %arg0, %c0_i32, %c0_i32_0 : i32, i32, i32
  }
  func.func @transform_21(%arg0: i32) -> (i32, i32, i32) {
    %c0_i32 = arith.constant 0 : i32
    %c0_i32_0 = arith.constant 0 : i32
    %c0_i32_1 = arith.constant 0 : i32
    return %arg0, %c0_i32, %c0_i32_0 : i32, i32, i32
  }
  func.func @transform_22(%arg0: i32) -> (i32, i32, i32) {
    %c0_i32 = arith.constant 0 : i32
    %c0_i32_0 = arith.constant 0 : i32
    %c0_i32_1 = arith.constant 0 : i32
    return %arg0, %c0_i32, %c0_i32_0 : i32, i32, i32
  }
}

</mosaic_0001>

<bundles_post_ra>
// kernel: enhanced_atom_forward.1
= control target key start
LH: loop header
LB: loop body
LE: loop exit
PB: predicated region body
PF: predicated region fallthrough
CT: control target
= control target key end

     0   :  { %s7020_s0 = inlined_call_operand.vmem [shape: f32[2,16,16], index: 0, kind: input, shape index: {}]   ;;  %s7021_s1 = inlined_call_operand.vmem [shape: f32[2,64,128], index: 1, kind: input, shape index: {}]   ;;  %s7022_s2 = inlined_call_operand.vmem [shape: f32[2,216,128], index: 2, kind: input, shape index: {}]   ;;  %s7023_s3 = inlined_call_operand.vmem [shape: f32[27,216], index: 3, kind: input, shape index: {}]   ;;  %s7024_s4 = inlined_call_operand.vmem [shape: f32[16,32], index: 4, kind: input, shape index: {}]   ;;  %s7025_s5 = inlined_call_operand.vmem [shape: f32[1,32], index: 5, kind: input, shape index: {}]   ;;  %s7026_s6 = inlined_call_operand.vmem [shape: f32[32,64], index: 6, kind: input, shape index: {}]   ;;  %s7027_s7 = inlined_call_operand.vmem [shape: f32[1,64], index: 7, kind: input, shape index: {}]   ;;  %s7028_s8 = inlined_call_operand.vmem [shape: f32[128,32], index: 8, kind: input, shape index: {}]   ;;  %s7029_s9 = inlined_call_operand.vmem [shape: f32[1,32], index: 9, kind: input, shape index: {}]   ;;  %s7030_s10 = inlined_call_operand.vmem [shape: f32[32,32], index: 10, kind: input, shape index: {}]   ;;  %s7031_s11 = inlined_call_operand.vmem [shape: f32[1,32], index: 11, kind: input, shape index: {}]   ;;  %s7032_s12 = inlined_call_operand.vmem [shape: bf16[32,1152], index: 12, kind: input, shape index: {}]   ;;  %s7033_s13 = inlined_call_operand.vmem [shape: f32[1,1152], index: 13, kind: input, shape index: {}]   ;;  %s7034_s14 = inlined_call_operand.vmem [shape: f32[128,32], index: 14, kind: input, shape index: {}]   ;;  %s7035_s15 = inlined_call_operand.vmem [shape: f32[1,32], index: 15, kind: input, shape index: {}]   ;;  %s7036_s16 = inlined_call_operand.vmem [shape: f32[32,32], index: 16, kind: input, shape index: {}]   ;;  %s7037_s17 = inlined_call_operand.vmem [shape: f32[1,32], index: 17, kind: input, shape index: {}]   ;;  %s7038_s18 = inlined_call_operand.vmem [shape: bf16[32,1152], index: 18, kind: input, shape index: {}]   ;;  %s7039_s19 = inlined_call_operand.vmem [shape: f32[1,1152], index: 19, kind: input, shape index: {}]   ;;  %s7040_s20 = inlined_call_operand.vmem [shape: f32[2,1,1152], index: 20, kind: output, shape index: {0}]   ;;  %s7041_s21 = inlined_call_operand.vmem [shape: f32[2,1,1152], index: 21, kind: output, shape index: {1}]   ;;  %s7042_s22 = inlined_call_operand.vmem [shape: f32[2,64,32], index: 22, kind: output, shape index: {2}]  }
   0x1   :  { %7047 = sst [smem:[#allocation2_spill]] %s7020_s0 }
   0x2   :  { %7048 = sst [smem:[#allocation3_spill]] %s7021_s1 }
   0x3   :  { %7049 = sst [smem:[#allocation4_spill]] %s7022_s2 }
   0x4   :  { %7050 = sst [smem:[#allocation5_spill]] %s7023_s3  ;;  %s5774_s3 = smov 0  }
   0x5   :  { %7051 = sst [smem:[#allocation6_spill]] %s7024_s4 }
   0x6   :  { %7052 = sst [smem:[#allocation7_spill]] %s7025_s5 }
   0x7   :  { %7053 = sst [smem:[#allocation8_spill]] %s7026_s6 }
   0x8 LB: > { %s4329_s28 = sadd.s32 4294967295, %s5649_s3   ;;  %p4333_p0 = scmp.ge.s32.totalorder %s5649_s3, 1  ;;  %s5649_s3 = sphi %s5774_s3, %s33_s3  }
   0x9   : > { %p637_p1 = scmp.lt.s32.totalorder %s5649_s3, 3 }
   0xb   : > { %p638_p2 = pnand %p4333_p0, %p637_p1 }
   0xc   : > { %s7054_s4 = sld [smem:[#allocation6_spill]] (!%p638_p2)  ;;  %p717_p3 = scmp.lt.s32.totalorder (!%p638_p2), %s4329_s28, 1  ;;  %v940_v2 = vld [vmem:[%s7028_s8] sm:$0xff] (!%p638_p2)  ;;  %v941_v4 = vld [vmem:[%s7028_s8 + $0x8] sm:$0xff] (!%p638_p2)  ;;  %v942_v6 = vld [vmem:[%s7028_s8 + $0x10] sm:$0xff] (!%p638_p2)  ;;  %vm757_vm0 = vcmask (!%p638_p2), 130048  }
   0xd   : > { %641 = sbr.rel (%p638_p2) target bundleno = 3535 (0xdcf), region = 100  ;;  %v5283_v5 = vpack.c.bf16 (!%p638_p2), %v941_v4, %v940_v2  ;;  %v943_v7 = vld [vmem:[%s7028_s8 + $0x18] sm:$0xff] (!%p638_p2)  ;;  %s7055_s1 = sld [smem:[#allocation2_spill]] (!%p638_p2)  ;;  %v944_v11 = vld [vmem:[%s7028_s8 + $0x20] sm:$0xff] (!%p638_p2)  ;;  %v945_v12 = vld [vmem:[%s7028_s8 + $0x28] sm:$0xff] (!%p638_p2)  ;;  %vm850_vm1 = vcmask (!%p638_p2), 261120  }
   0xe   : > { %v5287_v10 = vpack.c.bf16 (!%p638_p2), %v943_v7, %v942_v6  ;;  %s7056_s2 = sld [smem:[#allocation3_spill]] (!%p638_p2)  ;;  %v946_v15 = vld [vmem:[%s7028_s8 + $0x30] sm:$0xff] (!%p638_p2)  ;;  %v947_v16 = vld [vmem:[%s7028_s8 + $0x38] sm:$0xff] (!%p638_p2)  ;;  %v5291_v18 = vpack.c.bf16 (!%p638_p2), %v945_v12, %v944_v11  ;;  %v948_v20 = vld [vmem:[%s7028_s8 + $0x40] sm:$0xff] (!%p638_p2)  ;;  %s7058_s24 = sld [smem:[#allocation7_spill]] (!%p638_p2)  ;;  %vm5653_vm3 = vmmov (!%p638_p2), 0  }
   0xf   : > { %v949_v21 = vld [vmem:[%s7028_s8 + $0x48] sm:$0xff] (!%p638_p2)  ;;  %v5295_v22 = vpack.c.bf16 (!%p638_p2), %v947_v16, %v946_v15  ;;  %v950_v23 = vld [vmem:[%s7028_s8 + $0x50] sm:$0xff] (!%p638_p2)  ;;  %v951_v24 = vld [vmem:[%s7028_s8 + $0x58] sm:$0xff] (!%p638_p2)  ;;  %vm1582_vm4 = vcmask (!%p638_p2), 523264   ;;  %s7061_s26 = sld [smem:[#allocation4_spill]] (!%p638_p2)  ;;  %vm2107_vm6 = vcmask (!%p638_p2), 212992  }
  0x10   : > { %v5299_v25 = vpack.c.bf16 (!%p638_p2), %v949_v21, %v948_v20  ;;  %v5303_v26 = vpack.c.bf16 (!%p638_p2), %v951_v24, %v950_v23  ;;  %v952_v27 = vld [vmem:[%s7028_s8 + $0x60] sm:$0xff] (!%p638_p2)  ;;  %v953_v28 = vld [vmem:[%s7028_s8 + $0x68] sm:$0xff] (!%p638_p2)  ;;  %v954_v30 = vld [vmem:[%s7028_s8 + $0x70] sm:$0xff] (!%p638_p2)  ;;  %vm3567_vm9 = vcmask (!%p638_p2), 719872   ;;  %vm3669_vm10 = vcmask (!%p638_p2), 1042432  }
  0x11   : > { %v5307_v29 = vpack.c.bf16 (!%p638_p2), %v953_v28, %v952_v27  ;;  %v955_v31 = vld [vmem:[%s7028_s8 + $0x78] sm:$0xff] (!%p638_p2)  ;;  %v1068_v43 = vld [vmem:[%s7030_s10] sm:$0xff] (!%p638_p2)  ;;  %v1069_v44 = vld [vmem:[%s7030_s10 + $0x8] sm:$0xff] (!%p638_p2)  ;;  %vm5658_vm11 = vmmov (!%p638_p2), 1   ;;  %vm3665_vm14 = vcmask (!%p638_p2), 220160  }
  0x12   : > { %v748_v0 = vld [vmem:[%s7054_s4] sm:$0xff] (!%p638_p2)  ;;  %v749_v1 = vld [vmem:[%s7054_s4 + $0x8] sm:$0xff] (!%p638_p2)  ;;  %v5311_v32 = vpack.c.bf16 (!%p638_p2), %v955_v31, %v954_v30  ;;  %v5315_v45 = vpack.c.bf16 (!%p638_p2), %v1069_v44, %v1068_v43  ;;  %v1070_v48 = vld [vmem:[%s7030_s10 + $0x10] sm:$0xff] (!%p638_p2) }
  0x13   : > { %v5271_v3 = vpack.c.bf16 (!%p638_p2), %v749_v1, %v748_v0  ;;  %v1071_v49 = vld [vmem:[%s7030_s10 + $0x18] sm:$0xff] (!%p638_p2)  ;;  %v4347_v54 = vld [vmem:[%s7029_s9] ss:$0 sm:$0xff] (!%p638_p2)  ;;  %vm5909_vm2 = vmpackc.low (!%p638_p2), %vm850_vm1, %vm850_vm1 }
  0x14   : > { %s7066_s28 = smov (!%p717_p3, %s4329_s28), 1  ;;  %v4341_v46 = vld [vmem:[%s7058_s24] ss:$0 sm:$0xff]  ;;  %v5319_v53 = vpack.c.bf16 %v1071_v49, %v1070_v48  ;;  %s5651_s24 = smov 96   ;;  %vm5426_vm12 = vmpackc.low %vm3669_vm10, %vm5658_vm11 }
  0x15   : > { %5272 = vmatprep.subr.bf16.mxu0 %v5271_v3  ;;  %s4518_s29 = sshll.u32 %s7066_s28, 4  ;;  %s4519_s30 = sshll.u32 %s7066_s28, 6  ;;  %v4344_v7 = vld [vmem:[%s7027_s7] ss:$0 sm:$0xff] }
  0x16   : > { %5274 = vmatpush3.bf16.msra.mxu0 %v5271_v3  ;;  %s721_s5 = scalar_lea.vmem %s7055_s1, %s4518_s29  ;;  %s5815_s27 = scalar_lea.vmem %s7056_s2, %s4519_s30  ;;  %v4348_v15 = vld [vmem:[%s7031_s11] ss:$0 sm:$0xff] }
  0x17   : > { %5284 = vmatprep.subr.bf16.mxu0 %v5283_v5  ;;  %v746_v8 = vld [vmem:[%s721_s5] sm:$0xff]  ;;  %v747_v9 = vld [vmem:[%s721_s5 + $0x8] sm:$0xff]  ;;  %s7057_s1 = sld [smem:[#allocation8_spill]]  ;;  %v934_v34 = vld [vmem:[%s5815_s27 + $0x10] sm:$0xff]  ;;  %s5428_s23 = smul.u32 216, %s7066_s28 }
  0x18   : > { %4743 = vmatprep.mubr.msk.f32.mxu0 %vm757_vm0, %v746_v8  ;;  %v932_v13 = vld [vmem:[%s5815_s27] sm:$0xff]  ;;  %v933_v33 = vld [vmem:[%s5815_s27 + $0x8] sm:$0xff]  ;;  %v935_v35 = vld [vmem:[%s5815_s27 + $0x18] sm:$0xff]  ;;  %s5429_s2 = smul.u32 9, %s7066_s28 }
  0x19   : > { %4744 = vmatmul.mubr.msk.f32.vlgmr.msra.gmra.mrb[0].mxu0 %vm757_vm0, %v747_v9  ;;  %v936_v36 = vld [vmem:[%s5815_s27 + $0x20] sm:$0xff]  ;;  %v937_v37 = vld [vmem:[%s5815_s27 + $0x28] sm:$0xff]  ;;  %v938_v38 = vld [vmem:[%s5815_s27 + $0x30] sm:$0xff]  ;;  %s6117_s4 = scalar_lea.vmem %s7061_s26, %s5428_s23  ;;  %s7064_s26 = sld [smem:[#allocation5_spill]] }
  0x1a   : > { %5286 = vmatpush3.bf16.msra.mxu0 %v5283_v5  ;;  %4789 = vmatprep.mubr.f32.mxu0 %v932_v13  ;;  %v939_v39 = vld [vmem:[%s5815_s27 + $0x38] sm:$0xff]  ;;  %s735_s23 = scalar_lea.vmem %s7040_s20, %s5429_s2 }
  0x1b   : > { %5288 = vmatprep.subr.bf16.mxu0 %v5287_v10 }
  0x1d   : > { %v839_v14 = vld [vmem:[%s7057_s1] sm:$0xff]  ;;  %v840_v17 = vld [vmem:[%s7057_s1 + $0x8] sm:$0xff]  ;;  %v841_v40 = vld [vmem:[%s7057_s1 + $0x10] sm:$0xff] }
  0x1e   : > { %v5275_v19 = vpack.c.bf16 %v840_v17, %v839_v14  ;;  %5290 = vmatpush3.bf16.msra.mxu0 %v5287_v10  ;;  %v842_v41 = vld [vmem:[%s7057_s1 + $0x18] sm:$0xff] }
  0x1f   : > { %5292 = vmatprep.subr.bf16.mxu0 %v5291_v18  ;;  %v5279_v42 = vpack.c.bf16 %v842_v41, %v841_v40 }
  0x20   : > { %5276 = vmatprep.subr.bf16.mxu1 %v5275_v19 }
  0x21   : > { %5278 = vmatpush3.bf16.msra.mxu1 %v5275_v19 }
  0x22   : > { %5294 = vmatpush3.bf16.msra.mxu0 %v5291_v18  ;;  %5280 = vmatprep.subr.bf16.mxu1 %v5279_v42 }
  0x23   : > { %5296 = vmatprep.subr.bf16.mxu0 %v5295_v22 }
  0x25   : > { %5282 = vmatpush3.bf16.msra.mxu1 %v5279_v42 }
  0x26   : > { %5298 = vmatpush3.bf16.msra.mxu0 %v5295_v22  ;;  %5316 = vmatprep.subr.bf16.mxu1 %v5315_v45 }
  0x27   : > { %5300 = vmatprep.subr.bf16.mxu0 %v5299_v25 }
  0x2a   : > { %5302 = vmatpush3.bf16.msra.mxu0 %v5299_v25 }
  0x2b   : > { %5304 = vmatprep.subr.bf16.mxu0 %v5303_v26 }
  0x2e   : > { %5306 = vmatpush3.bf16.msra.mxu0 %v5303_v26 }
  0x2f   : > { %5308 = vmatprep.subr.bf16.mxu0 %v5307_v29 }
  0x32   : > { %5310 = vmatpush3.bf16.msra.mxu0 %v5307_v29 }
  0x33   : > { %5312 = vmatprep.subr.bf16.mxu0 %v5311_v32 }
  0x36   : > { %5314 = vmatpush3.bf16.msra.mxu0 %v5311_v32 }
  0x39   : > { %4790 = vmatmul.mubr.f32.vlgmr.msra.gmra.mrb[2].mxu0 %v933_v33 }
  0x3a   : > { %4792 = vmatprep.mubr.f32.mxu0 %v934_v34 }
  0x3d   : > { %4793 = vmatmul.mubr.f32.gmra.mrb[4].mxu0 %v935_v35 }
  0x3e   : > { %4795 = vmatprep.mubr.f32.mxu0 %v936_v36 }
  0x41   : > { %4796 = vmatmul.mubr.f32.gmra.mrb[6].mxu0 %v937_v37 }
  0x42   : > { %4798 = vmatprep.mubr.f32.mxu0 %v938_v38 }
  0x45   : > { %4799 = vmatmul.mubr.f32.gmra.mrb[8].mxu0 %v939_v39 }
  0xec   : > { %v4745_v47 = vpop.f32.mrb[0].mxu0 }
  0xed   : > { %v830_v50 = vpop.f32.mrb[1].mxu0  ;;  %v836_v52 = vadd.f32 %v4745_v47, %v4341_v46 }
  0xee   : > { %v831_v51 = vadd.f32 %v4341_v46, %v830_v50 }
  0xf0   : > { %4754 = vmatprep.mubr.msk.f32.mxu1 %vm850_vm1, %v831_v51 }
  0xf1   : > { %4755 = vmatmul.mubr.msk.f32.vlgmr.msra.gmra.mrb[0].mxu1 %vm850_vm1, %v836_v52 }
  0xf2   : > { %5318 = vmatpush3.bf16.msra.mxu1 %v5315_v45 }
  0xf3   : > { %5320 = vmatprep.subr.bf16.mxu1 %v5319_v53 }
  0xf6   : > { %5322 = vmatpush3.bf16.msra.mxu1 %v5319_v53 }
 0x10c   : > { %v4791_v55 = vpop.f32.mrb[2].mxu0 }
 0x10d   : > { %v1029_v56 = vpop.f32.mrb[3].mxu0  ;;  %v1035_v58 = vadd.f32 %v4791_v55, %v4347_v54 }
 0x10e   : > { %v1030_v57 = vadd.f32 %v4347_v54, %v1029_v56 }
 0x110   : > { %v4794_v59 = vpop.f32.mrb[4].mxu0  ;;  %4809 = vmatprep.mubr.msk.f32.mxu1 %vm850_vm1, %v1030_v57 }
 0x111   : > { %v1039_v60 = vpop.f32.mrb[5].mxu0  ;;  %4810 = vmatmul.mubr.msk.f32.vlgmr.msra.gmra.mrb[2].mxu1 %vm850_vm1, %v1035_v58  ;;  %v1045_v62 = vadd.f32 %v4794_v59, %v4347_v54 }
 0x112   : > { %v1040_v61 = vadd.f32 %v4347_v54, %v1039_v60 }
 0x114   : > { %v4797_v63 = vpop.f32.mrb[6].mxu0  ;;  %4812 = vmatprep.mubr.msk.f32.mxu1 %vm850_vm1, %v1040_v61 }
 0x115   : > { %v1049_v0 = vpop.f32.mrb[7].mxu0  ;;  %4813 = vmatmul.mubr.msk.f32.gmra.mrb[4].mxu1 %vm850_vm1, %v1045_v62  ;;  %v1055_v2 = vadd.f32 %v4797_v63, %v4347_v54 }
 0x116   : > { %v1050_v1 = vadd.f32 %v4347_v54, %v1049_v0 }
 0x118   : > { %v4800_v3 = vpop.f32.mrb[8].mxu0  ;;  %4815 = vmatprep.mubr.msk.f32.mxu1 %vm850_vm1, %v1050_v1 }
 0x119   : > { %v1059_v4 = vpop.f32.mrb[9].mxu0  ;;  %4816 = vmatmul.mubr.msk.f32.gmra.mrb[6].mxu1 %vm850_vm1, %v1055_v2  ;;  %v1065_v6 = vadd.f32 %v4800_v3, %v4347_v54 }
 0x11a   : > { %v1060_v5 = vadd.f32 %v4347_v54, %v1059_v4 }
 0x11c   : > { %4818 = vmatprep.mubr.msk.f32.mxu1 %vm850_vm1, %v1060_v5 }
 0x11d   : > { %4819 = vmatmul.mubr.msk.f32.gmra.mrb[8].mxu1 %vm850_vm1, %v1065_v6 }
 0x1c4   : > { %v4756_v8 = vpop.f32.mrb[0].mxu1 }
 0x1c5   : > { %v5903_v9 = vadd.f32 %v4756_v8, %v4344_v7  ;;  %v923_v10 = vpop.f32.mrb[1].mxu1 }
 0x1c6   : > { %v5905_v11 = vadd.f32 %v4344_v7, %v923_v10 }
 0x1c8   : > { %v5446_v13 = vpack.i.bf16 %v5903_v9, %v5905_v11  ;;  %v5917_v14 = vpack.c.bf16 %v5903_v9, %v5905_v11 }
 0x1ca   : > { %5325 = vmatprep.subr.msk.bf16.mxu1 %vm5909_vm2, %v5917_v14 }
 0x1cb   : > { %5328 = vmatpush3.bf16.xpose.msk.msra.mxu1 %vm5909_vm2, %v5917_v14 }
 0x1e4   : > { %v4811_v16 = vpop.f32.mrb[2].mxu1 }
 0x1e5   : > { %v1169_v17 = vpop.f32.mrb[3].mxu1  ;;  %v1175_v19 = vadd.f32 %v4811_v16, %v4348_v15 }
 0x1e6   : > { %v1170_v18 = vadd.f32 %v4348_v15, %v1169_v17 }
 0x1e8   : > { %v4814_v20 = vpop.f32.mrb[4].mxu1  ;;  %4825 = vmatprep.mubr.msk.f32.mxu1 %vm850_vm1, %v1170_v18 }
 0x1e9   : > { %v1179_v21 = vpop.f32.mrb[5].mxu1  ;;  %4826 = vmatmul.mubr.msk.f32.vlgmr.msra.gmra.mrb[10].mxu1 %vm850_vm1, %v1175_v19  ;;  %v1185_v23 = vadd.f32 %v4814_v20, %v4348_v15 }
 0x1ea   : > { %v1180_v22 = vadd.f32 %v4348_v15, %v1179_v21 }
 0x1ec   : > { %v4817_v24 = vpop.f32.mrb[6].mxu1  ;;  %4828 = vmatprep.mubr.msk.f32.mxu1 %vm850_vm1, %v1180_v22 }
 0x1ed   : > { %v1189_v25 = vpop.f32.mrb[7].mxu1  ;;  %4829 = vmatmul.mubr.msk.f32.gmra.mrb[12].mxu1 %vm850_vm1, %v1185_v23  ;;  %v1195_v27 = vadd.f32 %v4817_v24, %v4348_v15 }
 0x1ee   : > { %v1190_v26 = vadd.f32 %v4348_v15, %v1189_v25 }
 0x1f0   : > { %v4820_v28 = vpop.f32.mrb[8].mxu1  ;;  %4831 = vmatprep.mubr.msk.f32.mxu1 %vm850_vm1, %v1190_v26 }
 0x1f1   : > { %v1199_v29 = vpop.f32.mrb[9].mxu1  ;;  %4832 = vmatmul.mubr.msk.f32.gmra.mrb[14].mxu1 %vm850_vm1, %v1195_v27  ;;  %v1205_v31 = vadd.f32 %v4820_v28, %v4348_v15 }
 0x1f2   : > { %v1200_v30 = vadd.f32 %v4348_v15, %v1199_v29 }
 0x1f4   : > { %4834 = vmatprep.mubr.msk.f32.mxu1 %vm850_vm1, %v1200_v30 }
 0x1f5   : > { %4835 = vmatmul.mubr.msk.f32.gmra.mrb[16].mxu1 %vm850_vm1, %v1205_v31 }
 0x2bc   : > { %v4827_v32 = vpop.f32.mrb[10].mxu1 }
 0x2bd   : > { %v1304_v33 = vpop.f32.mrb[11].mxu1  ;;  %v1344_v35 = vmul.f32 0.17677669, %v4827_v32 }
 0x2be   : > { %v1343_v34 = vmul.f32 0.17677669, %v1304_v33 }
 0x2bf   : > { %v1354_v42 = vsel %vm757_vm0, %v1344_v35, -inf }
 0x2c0   : > { %v4830_v36 = vpop.f32.mrb[12].mxu1  ;;  %v1351_v37 = vsel %vm757_vm0, %v1343_v34, -inf }
 0x2c1   : > { %1352 = vmax.xlane.f32.xlu0 %v1351_v37  ;;  %v1314_v38 = vpop.f32.mrb[13].mxu1  ;;  %v1346_v40 = vmul.f32 0.17677669, %v4830_v36 }
 0x2c2   : > { %v1345_v39 = vmul.f32 0.17677669, %v1314_v38 }
 0x2c3   : > { %v1360_v48 = vsel %vm757_vm0, %v1346_v40, -inf }
 0x2c4   : > { %v4833_v41 = vpop.f32.mrb[14].mxu1  ;;  %v1357_v43 = vsel %vm757_vm0, %v1345_v39, -inf }
 0x2c5   : > { %1355 = vmax.xlane.f32.xlu0 %v1354_v42  ;;  %1358 = vmax.xlane.f32.xlu1 %v1357_v43  ;;  %v1324_v44 = vpop.f32.mrb[15].mxu1  ;;  %v1348_v46 = vmul.f32 0.17677669, %v4833_v41 }
 0x2c6   : > { %v1347_v45 = vmul.f32 0.17677669, %v1324_v44 }
 0x2c7   : > { %v1366_v53 = vsel %vm757_vm0, %v1348_v46, -inf }
 0x2c8   : > { %v4836_v47 = vpop.f32.mrb[16].mxu1  ;;  %v1363_v49 = vsel %vm757_vm0, %v1347_v45, -inf }
 0x2c9   : > { %1361 = vmax.xlane.f32.xlu1 %v1360_v48  ;;  %1364 = vmax.xlane.f32.xlu0 %v1363_v49  ;;  %v1334_v50 = vpop.f32.mrb[17].mxu1  ;;  %v1350_v52 = vmul.f32 0.17677669, %v4836_v47 }
 0x2ca   : > { %v1349_v51 = vmul.f32 0.17677669, %v1334_v50 }
 0x2cb   : > { %v1372_v55 = vsel %vm757_vm0, %v1350_v52, -inf }
 0x2cc   : > { %v1369_v54 = vsel %vm757_vm0, %v1349_v51, -inf }
 0x2cd   : > { %1367 = vmax.xlane.f32.xlu1 %v1366_v53  ;;  %1370 = vmax.xlane.f32.xlu0 %v1369_v54 }
 0x2d1   : > { %1373 = vmax.xlane.f32.xlu1 %v1372_v55 }
 0x34e   : > { %v1353_v56 = vpop.xlane.xlu0 %1352 }
 0x34f   : > { %v1375_v57 = vsub.f32 %v1343_v34, %v1353_v56 }
 0x351   : > { %v1383_v58 = vmul.f32 1.442695, %v1375_v57 }
 0x352   : > { %v1356_v59 = vpop.xlane.xlu0 %1355  ;;  %v1359_v60 = vpop.xlane.xlu1 %1358 }
 0x353   : > { %5503 = vpow2.f32 %v1383_v58  ;;  %v1376_v61 = vsub.f32 %v1344_v35, %v1356_v59  ;;  %v1377_v62 = vsub.f32 %v1345_v39, %v1359_v60 }
 0x355   : > { %v1385_v63 = vmul.f32 1.442695, %v1376_v61  ;;  %v1387_v0 = vmul.f32 1.442695, %v1377_v62  ;;  %v5652_v62 = vmov 0.0|0.0  }
 0x356   : > { %v1362_v1 = vpop.xlane.xlu1 %1361  ;;  %v1365_v2 = vpop.xlane.xlu0 %1364  ;;  %5333 = vmatprep.subr.bf16.mxu0 %v5652_v62 }
 0x357   : > { %5505 = vpow2.f32 %v1385_v63  ;;  %v1378_v3 = vsub.f32 %v1346_v40, %v1362_v1  ;;  %v1379_v4 = vsub.f32 %v1347_v45, %v1365_v2  ;;  %v5654_v63 = vmov 0.0   ;;  %v5453_v1 = vld [vmem:[%s7032_s12 + $0xc] ss:$36 sps:$4 sm:$0xff]   ;;  %v5459_v2 = vld [vmem:[%s7032_s12 + $0x54] ss:$36 sps:$4 sm:$0xff]  }
 0x358   : > { %5507 = vpow2.f32 %v1387_v0  ;;  %4869 = vmatprep.mubr.msk.f32.mxu0 %vm5653_vm3, %v5654_v63  ;;  %v5451_v0 = vld [vmem:[%s7032_s12 + $0x8] ss:$36 sps:$4 sm:$0xff]  }
 0x359   : > { %v1389_v5 = vmul.f32 1.442695, %v1378_v3  ;;  %v1391_v6 = vmul.f32 1.442695, %v1379_v4  ;;  %v5457_v3 = vld [vmem:[%s7032_s12 + $0x50] ss:$36 sps:$4 sm:$0xff]  }
 0x35a   : > { %v1368_v7 = vpop.xlane.xlu1 %1367  ;;  %v1371_v8 = vpop.xlane.xlu0 %1370 }
 0x35b   : > { %5509 = vpow2.f32 %v1389_v5  ;;  %v1380_v10 = vsub.f32 %v1348_v46, %v1368_v7  ;;  %v1381_v15 = vsub.f32 %v1349_v51, %v1371_v8 }
 0x35c   : > { %5511 = vpow2.f32 %v1391_v6 }
 0x35d   : > { %v5504_v16 = vpop.eup %5503  ;;  %v1393_v17 = vmul.f32 1.442695, %v1380_v10  ;;  %v1395_v18 = vmul.f32 1.442695, %v1381_v15 }
 0x35e   : > { %v1374_v19 = vpop.xlane.xlu1 %1373  ;;  %v1399_v20 = vsel %vm757_vm0, %v5504_v16, 0.0 }
 0x35f   : > { %5513 = vpow2.f32 %v1393_v17  ;;  %v1382_v21 = vsub.f32 %v1350_v52, %v1374_v19  ;;  %1400 = vadd.xlane.f32.xlu0 %v1399_v20  ;;  %v5456_v20 = vld [vmem:[%s7032_s12 + $0x4] ss:$36 sps:$4 sm:$0xff]  }
 0x360   : > { %5515 = vpow2.f32 %v1395_v18 }
 0x361   : > { %v5506_v22 = vpop.eup %5505  ;;  %v1397_v23 = vmul.f32 1.442695, %v1382_v21 }
 0x362   : > { %v5508_v24 = vpop.eup %5507  ;;  %v1402_v25 = vsel %vm757_vm0, %v5506_v22, 0.0 }
 0x363   : > { %5517 = vpow2.f32 %v1397_v23  ;;  %1403 = vadd.xlane.f32.xlu1 %v1402_v25  ;;  %v1405_v26 = vsel %vm757_vm0, %v5508_v24, 0.0  ;;  %v5462_v23 = vld [vmem:[%s7032_s12 + $0x4c] ss:$36 sps:$4 sm:$0xff]  }
 0x364   : > { %1406 = vadd.xlane.f32.xlu0 %v1405_v26  ;;  %v5460_v25 = vld [vmem:[%s7032_s12 + $0x48] ss:$36 sps:$4 sm:$0xff]   ;;  %v5465_v26 = vld [vmem:[%s7032_s12 + $0x1c] ss:$36 sps:$4 sm:$0xff]  }
 0x365   : > { %v5510_v27 = vpop.eup %5509 }
 0x366   : > { %v5512_v28 = vpop.eup %5511  ;;  %v1408_v29 = vsel %vm757_vm0, %v5510_v27, 0.0 }
 0x367   : > { %1409 = vadd.xlane.f32.xlu1 %v1408_v29  ;;  %v1411_v30 = vsel %vm757_vm0, %v5512_v28, 0.0 }
 0x368   : > { %1412 = vadd.xlane.f32.xlu0 %v1411_v30  ;;  %v5463_v30 = vld [vmem:[%s7032_s12 + $0x18] ss:$36 sps:$4 sm:$0xff]  }
 0x369   : > { %v5514_v31 = vpop.eup %5513 }
 0x36a   : > { %v5516_v32 = vpop.eup %5515  ;;  %v1414_v33 = vsel %vm757_vm0, %v5514_v31, 0.0 }
 0x36b   : > { %1415 = vadd.xlane.f32.xlu1 %v1414_v33  ;;  %v1417_v34 = vsel %vm757_vm0, %v5516_v32, 0.0  ;;  %v5471_v33 = vld [vmem:[%s7032_s12 + $0x64] ss:$36 sps:$4 sm:$0xff]  }
 0x36c   : > { %1418 = vadd.xlane.f32.xlu0 %v1417_v34 }
 0x36d   : > { %v5518_v35 = vpop.eup %5517 }
 0x36e   : > { %v1420_v36 = vsel %vm757_vm0, %v5518_v35, 0.0 }
 0x36f   : > { %1421 = vadd.xlane.f32.xlu1 %v1420_v36  ;;  %v5469_v36 = vld [vmem:[%s7032_s12 + $0x60] ss:$36 sps:$4 sm:$0xff]  }
 0x382   : > { %5447 = vrot.lane.b32.xlu0 %v5446_v13, %s5651_s24  ;;  %s744_s24 = scalar_lea.vmem %s7042_s22, %s4519_s30 }
 0x3ec   : > { %v1401_v37 = vpop.xlane.xlu0 %1400 }
 0x3ed   : > { %5519 = vrcp.f32 %v1401_v37  ;;  %v5472_v37 = vld [vmem:[%s7032_s12 + $0x58] ss:$36 sps:$4 sm:$0xff]  }
 0x3f0   : > { %v1404_v38 = vpop.xlane.xlu1 %1403 }
 0x3f1   : > { %v1407_v39 = vpop.xlane.xlu0 %1406  ;;  %5521 = vrcp.f32 %v1404_v38  ;;  %v2158_v38 = vld [vmem:[%s7034_s14] sm:$0xff] }
 0x3f2   : > { %5523 = vrcp.f32 %v1407_v39  ;;  %v2159_v39 = vld [vmem:[%s7034_s14 + $0x8] sm:$0xff] }
 0x3f4   : > { %v1410_v40 = vpop.xlane.xlu1 %1409 }
 0x3f5   : > { %v1413_v41 = vpop.xlane.xlu0 %1412  ;;  %5525 = vrcp.f32 %v1410_v40  ;;  %v5346_v40 = vpack.c.bf16 %v2159_v39, %v2158_v38  ;;  %v1773_v38 = vlaneseq }
 0x3f6   : > { %5527 = vrcp.f32 %v1413_v41  ;;  %v5475_v41 = vld [vmem:[%s7032_s12 + $0x20] ss:$36 sps:$4 sm:$0xff]  }
 0x3f7   : > { %v5520_v42 = vpop.eup %5519  ;;  %v6218_v39 = vshrl.u32 %v1773_v38, 7  ;;  %vm6270_vm5 = vcmp.lt.s32.totalorder %v1773_v38, 128 }
 0x3f8   : > { %v1431_v43 = vmul.f32 %v5520_v42, %v5504_v16  ;;  %v1416_v45 = vpop.xlane.xlu1 %1415  ;;  %v2160_v42 = vld [vmem:[%s7034_s14 + $0x10] sm:$0xff] }
 0x3f9   : > { %v1419_v44 = vpop.xlane.xlu0 %1418  ;;  %5529 = vrcp.f32 %v1416_v45  ;;  %v5476_v45 = vld [vmem:[%s7032_s12 + $0x68] ss:$36 sps:$4 sm:$0xff]  }
 0x3fa   : > { %4841 = vmatprep.mubr.msk.f32.mxu1 %vm757_vm0, %v1431_v43  ;;  %5531 = vrcp.f32 %v1419_v44  ;;  %v2161_v43 = vld [vmem:[%s7034_s14 + $0x18] sm:$0xff] }
 0x3fb   : > { %v5522_v48 = vpop.eup %5521  ;;  %v5349_v44 = vpack.c.bf16 %v2161_v43, %v2160_v42  ;;  %v1775_v42 = vsub.s32 0, %v6218_v39  ;;  %v1783_v43 = vsub.s32 2, %v6218_v39 }
 0x3fc   : > { %v1422_v11 = vpop.xlane.xlu1 %1421  ;;  %v5524_v49 = vpop.eup %5523  ;;  %v1432_v50 = vmul.f32 %v5522_v48, %v5506_v22  ;;  %v5454_v22 = vld [vmem:[%s7032_s12] ss:$36 sps:$4 sm:$0xff]   ;;  %v2165_v48 = vld [vmem:[%s7034_s14 + $0x38] sm:$0xff] }
 0x3fd   : > { %v5448_v46 = vpop.permute.xlu0 %5447  ;;  %5533 = vrcp.f32 %v1422_v11  ;;  %v1433_v52 = vmul.f32 %v5524_v49, %v5508_v24  ;;  %v5655_v24 = vmov 0.015625   ;;  %v2164_v11 = vld [vmem:[%s7034_s14 + $0x30] sm:$0xff] }
 0x3fe   : > { %v5450_v47 = vunpack.i.h.bf16 %v5448_v46  ;;  %v5449_v9 = vunpack.i.l.bf16 %v5448_v46  ;;  %v2162_v46 = vld [vmem:[%s7034_s14 + $0x20] sm:$0xff]  ;;  %v5355_v49 = vpack.c.bf16 %v2165_v48, %v2164_v11 }
 0x3ff   : > { %v5526_v51 = vpop.eup %5525 }
 0x400   : > { %v5956_v13 = vpack.c.bf16 %v5450_v47, %v5449_v9  ;;  %v5528_v53 = vpop.eup %5527  ;;  %v1434_v54 = vmul.f32 %v5526_v51, %v5510_v27  ;;  %v5468_v27 = vld [vmem:[%s7032_s12 + $0x14] ss:$36 sps:$4 sm:$0xff]   ;;  %v2163_v47 = vld [vmem:[%s7034_s14 + $0x28] sm:$0xff] }
 0x401   : > { %v1435_v56 = vmul.f32 %v5528_v53, %v5512_v28  ;;  %v5656_v28 = vmov 0   ;;  %v5352_v9 = vpack.c.bf16 %v2163_v47, %v2162_v46  ;;  %v2167_v51 = vld [vmem:[%s7034_s14 + $0x48] sm:$0xff]  ;;  %v2168_v53 = vld [vmem:[%s7034_s14 + $0x50] sm:$0xff]  ;;  %v1787_v46 = vsub.s32 3, %v6218_v39 }
 0x402   : > { %5330 = vmatprep.subr.bf16.mxu1 %v5956_v13 }
 0x403   : > { %5332 = vmatpush3.bf16.msra.mxu1 %v5956_v13  ;;  %v5530_v55 = vpop.eup %5529 }
 0x404   : > { %v5532_v57 = vpop.eup %5531  ;;  %v1436_v58 = vmul.f32 %v5530_v55, %v5514_v31  ;;  %1862 = vmatprep.subr.bf16.mxu1 %v5453_v1  ;;  %v5466_v31 = vld [vmem:[%s7032_s12 + $0x10] ss:$36 sps:$4 sm:$0xff]   ;;  %v2132_v1 = vld [vmem:[%s6117_s4 + $0x8] sm:$0xff] }
 0x405   : > { %v1437_v60 = vmul.f32 %v5532_v57, %v5516_v32  ;;  %v2171_v57 = vld [vmem:[%s7034_s14 + $0x68] sm:$0xff] }
 0x406   : > { %4842 = vmatmul.mubr.msk.f32.vlgmr.msra.gmra.mrb[18].mxu1 %vm757_vm0, %v1432_v50  ;;  %v2166_v50 = vld [vmem:[%s7034_s14 + $0x40] sm:$0xff] }
 0x407   : > { %4844 = vmatprep.mubr.msk.f32.mxu1 %vm757_vm0, %v1433_v52  ;;  %v5534_v59 = vpop.eup %5533  ;;  %1863 = vmatpush1.bf16.msra.mxu1 %v5451_v0  ;;  %v5358_v52 = vpack.c.bf16 %v2167_v51, %v2166_v50  ;;  %v2131_v0 = vld [vmem:[%s6117_s4] sm:$0xff] }
 0x408   : > { %v1438_v61 = vmul.f32 %v5534_v59, %v5518_v35  ;;  %1864 = vmatprep.subr.bf16.mxu1 %v5459_v2  ;;  %v5474_v35 = vld [vmem:[%s7032_s12 + $0x5c] ss:$36 sps:$4 sm:$0xff]   ;;  %v2172_v59 = vld [vmem:[%s7034_s14 + $0x70] sm:$0xff] }
 0x409   : > { %v2133_v2 = vld [vmem:[%s6117_s4 + $0x10] sm:$0xff] }
 0x40a   : > { %4845 = vmatmul.mubr.msk.f32.gmra.mrb[20].mxu1 %vm757_vm0, %v1434_v54  ;;  %v2169_v54 = vld [vmem:[%s7034_s14 + $0x58] sm:$0xff] }
 0x40b   : > { %4847 = vmatprep.mubr.msk.f32.mxu1 %vm757_vm0, %v1435_v56  ;;  %1865 = vmatpush1.bf16.msra.mxu1 %v5457_v3  ;;  %v5361_v55 = vpack.c.bf16 %v2169_v54, %v2168_v53  ;;  %v2170_v56 = vld [vmem:[%s7034_s14 + $0x60] sm:$0xff]  ;;  %v2134_v3 = vld [vmem:[%s6117_s4 + $0x18] sm:$0xff] }
 0x40c   : > { %1944 = vmatprep.subr.bf16.mxu1 %v5465_v26  ;;  %v2384_v26 = vld [vmem:[%s7036_s16 + $0x18] sm:$0xff] }
 0x40e   : > { %4848 = vmatmul.mubr.msk.f32.gmra.mrb[22].mxu1 %vm757_vm0, %v1436_v58  ;;  %v5364_v58 = vpack.c.bf16 %v2171_v57, %v2170_v56  ;;  %v1791_v57 = vsub.s32 4, %v6218_v39 }
 0x40f   : > { %4850 = vmatprep.mubr.msk.f32.mxu1 %vm757_vm0, %v1437_v60  ;;  %v2173_v60 = vld [vmem:[%s7034_s14 + $0x78] sm:$0xff] }
 0x412   : > { %4851 = vmatmul.mubr.msk.f32.gmra.mrb[24].mxu1 %vm757_vm0, %v1438_v61  ;;  %v5367_v61 = vpack.c.bf16 %v2173_v60, %v2172_v59 }
 0x413   : > { %1894 = vmatprep.mubr.bf16.mxu1 %v5656_v28 }
 0x4d9   : > { %v4843_v4 = vpop.f32.mrb[18].mxu1 }
 0x4da   : > { %1575 = vst.msk [vmem:[%s744_s24 + $0x8] sm:$0xff] %vm850_vm1, %v4843_v4  ;;  %v1535_v5 = vpop.f32.mrb[19].mxu1 }
 0x4db   : > { %1574 = vst.msk [vmem:[%s744_s24] sm:$0xff] %vm850_vm1, %v1535_v5  ;;  %v5334_v6 = vpack.c.bf16 %v4843_v4, %v1535_v5  ;;  %v2136_v4 = vld [vmem:[%s6117_s4 + $0x28] sm:$0xff]  ;;  %v2137_v5 = vld [vmem:[%s6117_s4 + $0x30] sm:$0xff] }
 0x4dd   : > { %v4846_v7 = vpop.f32.mrb[20].mxu1  ;;  %5335 = vmatpush3.bf16.msra.mxu0 %v5334_v6  ;;  %v2138_v6 = vld [vmem:[%s6117_s4 + $0x38] sm:$0xff] }
 0x4de   : > { %1577 = vst.msk [vmem:[%s744_s24 + $0x18] sm:$0xff] %vm850_vm1, %v4846_v7  ;;  %v1545_v8 = vpop.f32.mrb[21].mxu1  ;;  %5336 = vmatprep.subr.bf16.mxu0 %v5652_v62 }
 0x4df   : > { %1576 = vst.msk [vmem:[%s744_s24 + $0x10] sm:$0xff] %vm850_vm1, %v1545_v8  ;;  %v5337_v10 = vpack.c.bf16 %v4846_v7, %v1545_v8  ;;  %v2139_v7 = vld [vmem:[%s6117_s4 + $0x40] sm:$0xff]  ;;  %v2140_v8 = vld [vmem:[%s6117_s4 + $0x48] sm:$0xff] }
 0x4e1   : > { %v4849_v15 = vpop.f32.mrb[22].mxu1  ;;  %5338 = vmatpush3.bf16.msra.mxu0 %v5337_v10  ;;  %v2141_v10 = vld [vmem:[%s6117_s4 + $0x50] sm:$0xff] }
 0x4e2   : > { %1579 = vst.msk [vmem:[%s744_s24 + $0x28] sm:$0xff] %vm850_vm1, %v4849_v15  ;;  %v1555_v16 = vpop.f32.mrb[23].mxu1  ;;  %5339 = vmatprep.subr.bf16.mxu0 %v5652_v62 }
 0x4e3   : > { %1578 = vst.msk [vmem:[%s744_s24 + $0x20] sm:$0xff] %vm850_vm1, %v1555_v16  ;;  %v5340_v17 = vpack.c.bf16 %v4849_v15, %v1555_v16  ;;  %v2142_v15 = vld [vmem:[%s6117_s4 + $0x58] sm:$0xff]  ;;  %v2143_v16 = vld [vmem:[%s6117_s4 + $0x60] sm:$0xff] }
 0x4e5   : > { %v4852_v18 = vpop.f32.mrb[24].mxu1  ;;  %5341 = vmatpush3.bf16.msra.mxu0 %v5340_v17  ;;  %v2144_v17 = vld [vmem:[%s6117_s4 + $0x68] sm:$0xff] }
 0x4e6   : > { %1581 = vst.msk [vmem:[%s744_s24 + $0x38] sm:$0xff] %vm850_vm1, %v4852_v18  ;;  %v1565_v19 = vpop.f32.mrb[25].mxu1  ;;  %5342 = vmatprep.subr.bf16.mxu0 %v5652_v62 }
 0x4e7   : > { %1580 = vst.msk [vmem:[%s744_s24 + $0x30] sm:$0xff] %vm850_vm1, %v1565_v19  ;;  %v5343_v21 = vpack.c.bf16 %v4852_v18, %v1565_v19  ;;  %v2145_v18 = vld [vmem:[%s6117_s4 + $0x70] sm:$0xff]  ;;  %v2146_v19 = vld [vmem:[%s6117_s4 + $0x78] sm:$0xff]  ;;  %s739_s24 = scalar_lea.vmem %s7041_s21, %s5429_s2 }
 0x4e9   : > { %5344 = vmatpush3.bf16.msra.mxu0 %v5343_v21  ;;  %v2148_v21 = vld [vmem:[%s6117_s4 + $0x88] sm:$0xff] }
 0x4ea   : > { %1821 = vmatprep.subr.bf16.mxu0 %v5456_v20  ;;  %v2147_v20 = vld [vmem:[%s6117_s4 + $0x80] sm:$0xff] }
 0x4ec   : > { %4870 = vmatmul.mubr.msk.f32.vlgmr.msra.gmra.mrb[10].mxu0 %vm1582_vm4, %v5655_v24  ;;  %v2383_v24 = vld [vmem:[%s7036_s16 + $0x10] sm:$0xff] }
 0x4ed   : > { %1822 = vmatpush1.bf16.msra.mxu0 %v5454_v22  ;;  %1853 = vmatprep.mubr.bf16.mxu0 %v5656_v28  ;;  %v2381_v22 = vld [vmem:[%s7036_s16] sm:$0xff] }
 0x4ee   : > { %1823 = vmatprep.subr.bf16.mxu0 %v5462_v23  ;;  %v2382_v23 = vld [vmem:[%s7036_s16 + $0x8] sm:$0xff] }
 0x4f1   : > { %1824 = vmatpush1.bf16.msra.mxu0 %v5460_v25  ;;  %v5370_v25 = vpack.c.bf16 %v2382_v23, %v2381_v22 }
 0x4f2   : > { %1903 = vmatprep.subr.bf16.mxu0 %v5468_v27  ;;  %v2149_v27 = vld [vmem:[%s6117_s4 + $0x90] sm:$0xff] }
 0x5bf   : > { %v1652_v29 = vpop.f32.mrb[10].mxu0 }
 0x5c0   : > { %v1656_v32 = vpack.c.bf16 %v1652_v29, %v1652_v29  ;;  %v4871_v34 = vpop.f32.mrb[11].mxu0  ;;  %v5373_v29 = vpack.c.bf16 %v2384_v26, %v2383_v24 }
 0x5c1   : > { %v2154_v34 = vld [vmem:[%s6117_s4 + $0xb8] sm:$0xff] }
 0x5c2   : > { %4395 = vmatmul.mubr.msk.bf16.vlgmr.msra.gmra.mrb[12].mxu0 %vm850_vm1, %v1656_v32  ;;  %4396 = vmatmul.mubr.msk.bf16.vlgmr.msra.gmra.mrb[28].mxu1 %vm850_vm1, %v1656_v32 }
 0x5c3   : > { %1945 = vmatpush1.bf16.msra.mxu1 %v5463_v30  ;;  %1904 = vmatpush1.bf16.msra.mxu0 %v5466_v31  ;;  %v2150_v30 = vld [vmem:[%s6117_s4 + $0x98] sm:$0xff]  ;;  %v2151_v31 = vld [vmem:[%s6117_s4 + $0xa0] sm:$0xff] }
 0x5c4   : > { %1946 = vmatprep.subr.bf16.mxu1 %v5471_v33  ;;  %1905 = vmatprep.subr.bf16.mxu0 %v5474_v35  ;;  %v2153_v33 = vld [vmem:[%s6117_s4 + $0xb0] sm:$0xff]  ;;  %v2155_v35 = vld [vmem:[%s6117_s4 + $0xc0] sm:$0xff] }
 0x5c5   : > { %1935 = vmatprep.mubr.bf16.mxu0 %v5656_v28  ;;  %1976 = vmatprep.mubr.bf16.mxu1 %v5656_v28 }
 0x5c7   : > { %1947 = vmatpush1.bf16.msra.mxu1 %v5469_v36  ;;  %1906 = vmatpush1.bf16.msra.mxu0 %v5472_v37  ;;  %v2156_v36 = vld [vmem:[%s6117_s4 + $0xc8] sm:$0xff]  ;;  %v2157_v37 = vld [vmem:[%s6117_s4 + $0xd0] sm:$0xff] }
 0x5c8   : > { %5345 = vmatprep.subr.bf16.mxu1 %v5652_v62  ;;  %4872 = vmatprep.subr.bf16.mxu0 %v5654_v63 }
 0x5ca   : > { %4397 = vmatmul.mubr.msk.bf16.vlgmr.msra.gmra.mrb[16].mxu0 %vm850_vm1, %v1656_v32  ;;  %4398 = vmatmul.mubr.msk.bf16.vlgmr.msra.gmra.mrb[32].mxu1 %vm850_vm1, %v1656_v32 }
 0x5cb   : > { %5347 = vmatpush3.bf16.msra.mxu1 %v5346_v40  ;;  %4873 = vmatpush3.bf16.msra.mxu0 %v5475_v41  ;;  %v5657_v40 = vmov 1966171168  }
 0x5cc   : > { %5348 = vmatprep.subr.bf16.mxu1 %v5652_v62  ;;  %4874 = vmatprep.subr.bf16.mxu0 %v5654_v63  ;;  %v2039_v41 = vunpack.c.l.s4 %v5657_v40 }
 0x5cd   : > { %4876 = vmatprep.mubr.msk.bf16.mxu0 %vm5653_vm3, %v5654_v63  ;;  %4912 = vmatprep.mubr.msk.f32.mxu1 %vm5653_vm3, %v5654_v63 }
 0x5ce   : > { %v2040_v47 = vunpack.c.0.s8 %v2039_v41 }
 0x5cf   : > { %5350 = vmatpush3.bf16.msra.mxu1 %v5349_v44  ;;  %4875 = vmatpush3.bf16.msra.mxu0 %v5476_v45  ;;  %v1677_v44 = vld [vmem:[%s7033_s13] sm:$0xff]  ;;  %v1779_v45 = vsub.s32 1, %v6218_v39 }
 0x5d0   : > { %5351 = vmatprep.subr.bf16.mxu1 %v5652_v62  ;;  %5369 = vmatprep.subr.bf16.mxu0 %v5652_v62  ;;  %v1784_v11 = vrot.slane %v1677_v44, %v1783_v43  ;;  %v6236_v51 = vsub.s32 %v2040_v47, %v6218_v39 }
 0x5d1   : > { %v1780_v48 = vrot.slane %v1677_v44, %v1779_v45 }
 0x5d2   : > { %4877 = vmatmul.mubr.msk.bf16.vlgmr.msra.gmra.mrb[20].mxu0 %vm850_vm1, %v1656_v32  ;;  %v2152_v32 = vld [vmem:[%s6117_s4 + $0xa8] sm:$0xff] }
 0x5d3   : > { %5353 = vmatpush3.bf16.msra.mxu1 %v5352_v9  ;;  %5001 = vmatprep.mubr.msk.f32.mxu0 %vm5653_vm3, %v5654_v63  ;;  %v1776_v9 = vrot.slane %v1677_v44, %v1775_v42 }
 0x5d4   : > { %5354 = vmatprep.subr.bf16.mxu1 %v5652_v62  ;;  %5371 = vmatpush3.bf16.msra.mxu0 %v5370_v25 }
 0x5d5   : > { %5372 = vmatprep.subr.bf16.mxu0 %v5652_v62 }
 0x5d7   : > { %5356 = vmatpush3.bf16.msra.mxu1 %v5355_v49  ;;  %v1788_v49 = vrot.slane %v1677_v44, %v1787_v46 }
 0x5d8   : > { %5357 = vmatprep.subr.bf16.mxu1 %v5652_v62  ;;  %5374 = vmatpush3.bf16.msra.mxu0 %v5373_v29 }
 0x5d9   : > { %5375 = vmatprep.subr.bf16.mxu0 %v5652_v62 }
 0x5db   : > { %5359 = vmatpush3.bf16.msra.mxu1 %v5358_v52 }
 0x5dc   : > { %5360 = vmatprep.subr.bf16.mxu1 %v5652_v62 }
 0x5df   : > { %5362 = vmatpush3.bf16.msra.mxu1 %v5361_v55 }
 0x5e0   : > { %5363 = vmatprep.subr.bf16.mxu1 %v5652_v62 }
 0x5e3   : > { %5365 = vmatpush3.bf16.msra.mxu1 %v5364_v58  ;;  %v1799_v58 = vsub.s32 6, %v6218_v39 }
 0x5e4   : > { %5366 = vmatprep.subr.bf16.mxu1 %v5652_v62 }
 0x5e7   : > { %5368 = vmatpush3.bf16.msra.mxu1 %v5367_v61 }
 0x5e8   : > { %5379 = vmatprep.subr.bf16.mxu1 %v5652_v62 }
 0x5ea   : > { %4913 = vmatmul.mubr.f32.vlgmr.msra.gmra.mrb[26].mxu1 %v2131_v0 }
 0x5eb   : > { %5381 = vmatpush3.bf16.msra.mxu1 %v5956_v13  ;;  %4915 = vmatprep.mubr.msk.f32.mxu1 %vm5653_vm3, %v5654_v63  ;;  %v2135_v13 = vld [vmem:[%s6117_s4 + $0x20] sm:$0xff] }
 0x5ee   : > { %4916 = vmatmul.mubr.f32.gmra.mrb[36].mxu1 %v2132_v1  ;;  %v1795_v1 = vsub.s32 5, %v6218_v39 }
 0x5ef   : > { %4918 = vmatprep.mubr.msk.f32.mxu1 %vm5653_vm3, %v5654_v63 }
 0x5f2   : > { %4919 = vmatmul.mubr.f32.gmra.mrb[38].mxu1 %v2133_v2  ;;  %v1803_v2 = vsub.s32 7, %v6218_v39 }
 0x5f3   : > { %4921 = vmatprep.mubr.msk.f32.mxu1 %vm5653_vm3, %v5654_v63 }
 0x5f6   : > { %4922 = vmatmul.mubr.f32.gmra.mrb[40].mxu1 %v2134_v3 }
 0x5f7   : > { %4924 = vmatprep.mubr.msk.f32.mxu1 %vm5653_vm3, %v5654_v63 }
 0x5fa   : > { %4925 = vmatmul.mubr.f32.gmra.mrb[42].mxu1 %v2135_v13 }
 0x5fb   : > { %4927 = vmatprep.mubr.msk.f32.mxu1 %vm5653_vm3, %v5654_v63 }
 0x5fe   : > { %4928 = vmatmul.mubr.f32.gmra.mrb[44].mxu1 %v2136_v4 }
 0x5ff   : > { %4930 = vmatprep.mubr.msk.f32.mxu1 %vm5653_vm3, %v5654_v63 }
 0x602   : > { %4931 = vmatmul.mubr.f32.gmra.mrb[46].mxu1 %v2137_v5 }
 0x603   : > { %4933 = vmatprep.mubr.msk.f32.mxu1 %vm5653_vm3, %v5654_v63 }
 0x606   : > { %4934 = vmatmul.mubr.f32.gmra.mrb[48].mxu1 %v2138_v6  ;;  %v1792_v6 = vrot.slane %v1677_v44, %v1791_v57 }
 0x607   : > { %4936 = vmatprep.mubr.msk.f32.mxu1 %vm5653_vm3, %v5654_v63 }
 0x60a   : > { %4937 = vmatmul.mubr.f32.gmra.mrb[50].mxu1 %v2139_v7  ;;  %v1800_v7 = vrot.slane %v1677_v44, %v1799_v58 }
 0x60b   : > { %4939 = vmatprep.mubr.msk.f32.mxu1 %vm5653_vm3, %v5654_v63 }
 0x60e   : > { %4940 = vmatmul.mubr.f32.gmra.mrb[52].mxu1 %v2140_v8 }
 0x60f   : > { %4942 = vmatprep.mubr.msk.f32.mxu1 %vm5653_vm3, %v5654_v63 }
 0x612   : > { %4943 = vmatmul.mubr.f32.gmra.mrb[54].mxu1 %v2141_v10 }
 0x613   : > { %4945 = vmatprep.mubr.msk.f32.mxu1 %vm5653_vm3, %v5654_v63 }
 0x616   : > { %4946 = vmatmul.mubr.f32.gmra.mrb[56].mxu1 %v2142_v15  ;;  %v1796_v15 = vrot.slane %v1677_v44, %v1795_v1 }
 0x617   : > { %4948 = vmatprep.mubr.msk.f32.mxu1 %vm5653_vm3, %v5654_v63 }
 0x61a   : > { %4949 = vmatmul.mubr.f32.gmra.mrb[58].mxu1 %v2143_v16  ;;  %v1804_v16 = vrot.slane %v1677_v44, %v1803_v2 }
 0x61b   : > { %4951 = vmatprep.mubr.msk.f32.mxu1 %vm5653_vm3, %v5654_v63 }
 0x61e   : > { %4952 = vmatmul.mubr.f32.gmra.mrb[60].mxu1 %v2144_v17 }
 0x61f   : > { %4954 = vmatprep.mubr.msk.f32.mxu1 %vm5653_vm3, %v5654_v63 }
 0x622   : > { %4955 = vmatmul.mubr.f32.gmra.mrb[62].mxu1 %v2145_v18 }
 0x623   : > { %4957 = vmatprep.mubr.msk.f32.mxu1 %vm5653_vm3, %v5654_v63 }
 0x626   : > { %4958 = vmatmul.mubr.f32.gmra.mrb[64].mxu1 %v2146_v19 }
 0x627   : > { %4960 = vmatprep.mubr.msk.f32.mxu1 %vm5653_vm3, %v5654_v63 }
 0x62a   : > { %4961 = vmatmul.mubr.f32.gmra.mrb[66].mxu1 %v2147_v20 }
 0x62b   : > { %4963 = vmatprep.mubr.msk.f32.mxu1 %vm5653_vm3, %v5654_v63 }
 0x62e   : > { %4964 = vmatmul.mubr.f32.gmra.mrb[68].mxu1 %v2148_v21 }
 0x62f   : > { %4966 = vmatprep.mubr.msk.f32.mxu1 %vm5653_vm3, %v5654_v63 }
 0x632   : > { %4967 = vmatmul.mubr.f32.gmra.mrb[70].mxu1 %v2149_v27 }
 0x633   : > { %4969 = vmatprep.mubr.msk.f32.mxu1 %vm5653_vm3, %v5654_v63 }
 0x636   : > { %4970 = vmatmul.mubr.f32.gmra.mrb[72].mxu1 %v2150_v30 }
 0x637   : > { %4972 = vmatprep.mubr.msk.f32.mxu1 %vm5653_vm3, %v5654_v63 }
 0x63a   : > { %4973 = vmatmul.mubr.f32.gmra.mrb[74].mxu1 %v2151_v31 }
 0x63b   : > { %4975 = vmatprep.mubr.msk.f32.mxu1 %vm5653_vm3, %v5654_v63 }
 0x63e   : > { %4976 = vmatmul.mubr.f32.gmra.mrb[76].mxu1 %v2152_v32 }
 0x63f   : > { %4978 = vmatprep.mubr.msk.f32.mxu1 %vm5653_vm3, %v5654_v63 }
 0x642   : > { %4979 = vmatmul.mubr.f32.gmra.mrb[78].mxu1 %v2153_v33 }
 0x643   : > { %4981 = vmatprep.mubr.msk.f32.mxu1 %vm5653_vm3, %v5654_v63 }
 0x646   : > { %4982 = vmatmul.mubr.f32.gmra.mrb[80].mxu1 %v2154_v34 }
 0x647   : > { %4984 = vmatprep.mubr.msk.f32.mxu1 %vm5653_vm3, %v5654_v63 }
 0x64a   : > { %4985 = vmatmul.mubr.f32.gmra.mrb[82].mxu1 %v2155_v35  ;;  %v4394_v35 = vld [vmem:[%s7033_s13 + $0x8] ss:$0 sm:$0xff] }
 0x64b   : > { %4987 = vmatprep.mubr.msk.f32.mxu1 %vm5653_vm3, %v5654_v63 }
 0x64e   : > { %4988 = vmatmul.mubr.f32.gmra.mrb[84].mxu1 %v2156_v36 }
 0x64f   : > { %4990 = vmatprep.mubr.msk.f32.mxu1 %vm5653_vm3, %v5654_v63 }
 0x652   : > { %4991 = vmatmul.mubr.f32.gmra.mrb[86].mxu1 %v2157_v37 }
 0x653   : > { %5171 = vmatprep.mubr.msk.f32.mxu1 %vm5653_vm3, %v5654_v63 }
 0x695   : > { %v1855_v50 = vpop.f32.mrb[12].mxu0  ;;  %v1896_v52 = vpop.f32.mrb[28].mxu1 }
 0x696   : > { %v6238_v53 = vadd.f32 %v1855_v50, %v1776_v9  ;;  %v1897_v54 = vadd.f32 %v1896_v52, %v1784_v11  ;;  %v1857_v55 = vpop.f32.mrb[13].mxu0  ;;  %v1898_v56 = vpop.f32.mrb[29].mxu1 }
 0x697   : > { %v1858_v59 = vadd.f32 %v1857_v55, %v1780_v48  ;;  %v1899_v60 = vadd.f32 %v1898_v56, %v1788_v49  ;;  %v1859_v61 = vpop.f32.mrb[14].mxu0  ;;  %v1900_v0 = vpop.f32.mrb[30].mxu1 }
 0x698   : > { %v1860_v3 = vpop.f32.mrb[15].mxu0  ;;  %v1901_v13 = vpop.f32.mrb[31].mxu1 }
 0x699   : > { %v2034_v4 = vcombine.low %v6238_v53, %v1858_v59  ;;  %v2035_v5 = vcombine.low %v1897_v54, %v1899_v60  ;;  %v6280_v54 = vld [vmem:[%s7035_s15] ss:$0 sm:$0xff] }
 0x69b   : > { %v2044_v8 = vrot.slane %v2034_v4, %v6236_v51  ;;  %v2051_v10 = vrot.slane %v2035_v5, %v6236_v51 }
 0x69d   : > { %v2066_v17 = vcombine.low %v2044_v8, %v2051_v10  ;;  %v1937_v18 = vpop.f32.mrb[16].mxu0  ;;  %v1978_v19 = vpop.f32.mrb[32].mxu1 }
 0x69e   : > { %v1938_v20 = vadd.f32 %v1937_v18, %v1792_v6  ;;  %v1979_v21 = vadd.f32 %v1978_v19, %v1800_v7  ;;  %v1939_v22 = vpop.f32.mrb[17].mxu0  ;;  %v1980_v23 = vpop.f32.mrb[33].mxu1 }
 0x69f   : > { %v1940_v24 = vadd.f32 %v1939_v22, %v1796_v15  ;;  %v1981_v25 = vadd.f32 %v1980_v23, %v1804_v16  ;;  %v1941_v26 = vpop.f32.mrb[18].mxu0  ;;  %v1982_v27 = vpop.f32.mrb[34].mxu1  ;;  %v2074_v44 = vrot.slane %v2066_v17, %v6236_v51 }
 0x6a0   : > { %v1942_v29 = vpop.f32.mrb[19].mxu0  ;;  %v1983_v30 = vpop.f32.mrb[35].mxu1 }
 0x6a1   : > { %v2036_v31 = vcombine.low %v1938_v20, %v1940_v24  ;;  %v2037_v32 = vcombine.low %v1979_v21, %v1981_v25 }
 0x6a3   : > { %v2058_v33 = vrot.slane %v2036_v31, %v6236_v51  ;;  %v2065_v34 = vrot.slane %v2037_v32, %v6236_v51 }
 0x6a5   : > { %v2067_v36 = vcombine.low %v2058_v33, %v2065_v34  ;;  %v2019_v37 = vpop.f32.mrb[20].mxu0 }
 0x6a6   : > { %v2020_v40 = vadd.f32 %v4394_v35, %v2019_v37  ;;  %v4878_v41 = vpop.f32.mrb[21].mxu0 }
 0x6a7   : > { %v2081_v47 = vrot.slane %v2067_v36, %v6236_v51  ;;  %v2022_v9 = vpop.f32.mrb[22].mxu0 }
 0x6a8   : > { %v2089_v11 = vrot.slane %v2020_v40, %v6236_v51  ;;  %v4879_v48 = vpop.f32.mrb[23].mxu0 }
 0x6a9   : > { %v2082_v49 = vcombine.low %v2074_v44, %v2081_v47 }
 0x6aa   : > { %v2096_v52 = vrot.slane %v2089_v11, %v6236_v51 }
 0x6ab   : > { %2099 = vst [vmem:[%s735_s23] sm:$0xff] %v2082_v49 }
 0x6ac   : > { %2104 = vst.msk [vmem:[%s735_s23 + $0x8] sm:$0x1] %vm6270_vm5, %v2096_v52 }
 0x6bd   : > { %v2247_v55 = vpop.f32.mrb[26].mxu1 }
 0x6be   : > { %v2248_v56 = vadd.f32 %v6280_v54, %v2247_v55  ;;  %v4914_v59 = vpop.f32.mrb[27].mxu1 }
 0x6c0   : > { %5002 = vmatmul.mubr.msk.f32.vlgmr.msra.gmra.mrb[24].mxu0 %vm850_vm1, %v2248_v56 }
 0x6c1   : > { %5378 = vmatpush3.bf16.xpose.msk.msra.mxu0 %vm5909_vm2, %v5917_v14  ;;  %v2252_v60 = vpop.f32.mrb[36].mxu1  ;;  %5004 = vmatprep.mubr.msk.f32.mxu0 %vm5653_vm3, %v5654_v63 }
 0x6c2   : > { %v2253_v61 = vadd.f32 %v6280_v54, %v2252_v60  ;;  %v4917_v0 = vpop.f32.mrb[37].mxu1  ;;  %5382 = vmatprep.subr.bf16.mxu0 %v5652_v62 }
 0x6c4   : > { %5005 = vmatmul.mubr.msk.f32.gmra.mrb[26].mxu0 %vm850_vm1, %v2253_v61 }
 0x6c5   : > { %v2257_v3 = vpop.f32.mrb[38].mxu1  ;;  %5007 = vmatprep.mubr.msk.f32.mxu0 %vm5653_vm3, %v5654_v63 }
 0x6c6   : > { %v2258_v13 = vadd.f32 %v6280_v54, %v2257_v3  ;;  %v4920_v4 = vpop.f32.mrb[39].mxu1 }
 0x6c8   : > { %5008 = vmatmul.mubr.msk.f32.gmra.mrb[28].mxu0 %vm850_vm1, %v2258_v13 }
 0x6c9   : > { %v2262_v12 = vpop.f32.mrb[40].mxu1  ;;  %5010 = vmatprep.mubr.msk.f32.mxu0 %vm5653_vm3, %v5654_v63 }
 0x6ca   : > { %v2263_v14 = vadd.f32 %v6280_v54, %v2262_v12  ;;  %v4923_v5 = vpop.f32.mrb[41].mxu1 }
 0x6cc   : > { %5011 = vmatmul.mubr.msk.f32.gmra.mrb[30].mxu0 %vm850_vm1, %v2263_v14 }
 0x6cd   : > { %v2267_v6 = vpop.f32.mrb[42].mxu1  ;;  %5013 = vmatprep.mubr.msk.f32.mxu0 %vm5653_vm3, %v5654_v63 }
 0x6ce   : > { %v2268_v7 = vadd.f32 %v6280_v54, %v2267_v6  ;;  %v4926_v8 = vpop.f32.mrb[43].mxu1 }
 0x6d0   : > { %5014 = vmatmul.mubr.msk.f32.gmra.mrb[32].mxu0 %vm850_vm1, %v2268_v7 }
 0x6d1   : > { %v2272_v10 = vpop.f32.mrb[44].mxu1  ;;  %5016 = vmatprep.mubr.msk.f32.mxu0 %vm5653_vm3, %v5654_v63 }
 0x6d2   : > { %v2273_v15 = vadd.f32 %v6280_v54, %v2272_v10  ;;  %v4929_v16 = vpop.f32.mrb[45].mxu1 }
 0x6d4   : > { %5017 = vmatmul.mubr.msk.f32.gmra.mrb[34].mxu0 %vm850_vm1, %v2273_v15 }
 0x6d5   : > { %v2277_v17 = vpop.f32.mrb[46].mxu1  ;;  %5019 = vmatprep.mubr.msk.f32.mxu0 %vm5653_vm3, %v5654_v63 }
 0x6d6   : > { %v2278_v18 = vadd.f32 %v6280_v54, %v2277_v17  ;;  %v4932_v19 = vpop.f32.mrb[47].mxu1 }
 0x6d8   : > { %5020 = vmatmul.mubr.msk.f32.gmra.mrb[36].mxu0 %vm850_vm1, %v2278_v18 }
 0x6d9   : > { %v2282_v20 = vpop.f32.mrb[48].mxu1  ;;  %5022 = vmatprep.mubr.msk.f32.mxu0 %vm5653_vm3, %v5654_v63 }
 0x6da   : > { %v2283_v21 = vadd.f32 %v6280_v54, %v2282_v20  ;;  %v4935_v22 = vpop.f32.mrb[49].mxu1 }
 0x6dc   : > { %5023 = vmatmul.mubr.msk.f32.gmra.mrb[38].mxu0 %vm850_vm1, %v2283_v21 }
 0x6dd   : > { %v2287_v23 = vpop.f32.mrb[50].mxu1  ;;  %5025 = vmatprep.mubr.msk.f32.mxu0 %vm5653_vm3, %v5654_v63 }
 0x6de   : > { %v2288_v24 = vadd.f32 %v6280_v54, %v2287_v23  ;;  %v4938_v25 = vpop.f32.mrb[51].mxu1 }
 0x6e0   : > { %5026 = vmatmul.mubr.msk.f32.gmra.mrb[40].mxu0 %vm850_vm1, %v2288_v24 }
 0x6e1   : > { %v2292_v26 = vpop.f32.mrb[52].mxu1  ;;  %5028 = vmatprep.mubr.msk.f32.mxu0 %vm5653_vm3, %v5654_v63 }
 0x6e2   : > { %v2293_v27 = vadd.f32 %v6280_v54, %v2292_v26  ;;  %v4941_v29 = vpop.f32.mrb[53].mxu1 }
 0x6e4   : > { %5029 = vmatmul.mubr.msk.f32.gmra.mrb[42].mxu0 %vm850_vm1, %v2293_v27 }
 0x6e5   : > { %v2297_v30 = vpop.f32.mrb[54].mxu1  ;;  %5031 = vmatprep.mubr.msk.f32.mxu0 %vm5653_vm3, %v5654_v63 }
 0x6e6   : > { %v2298_v31 = vadd.f32 %v6280_v54, %v2297_v30  ;;  %v4944_v32 = vpop.f32.mrb[55].mxu1 }
 0x6e8   : > { %5032 = vmatmul.mubr.msk.f32.gmra.mrb[44].mxu0 %vm850_vm1, %v2298_v31 }
 0x6e9   : > { %v2302_v33 = vpop.f32.mrb[56].mxu1  ;;  %5034 = vmatprep.mubr.msk.f32.mxu0 %vm5653_vm3, %v5654_v63 }
 0x6ea   : > { %v2303_v34 = vadd.f32 %v6280_v54, %v2302_v33  ;;  %v4947_v35 = vpop.f32.mrb[57].mxu1 }
 0x6ec   : > { %5035 = vmatmul.mubr.msk.f32.gmra.mrb[46].mxu0 %vm850_vm1, %v2303_v34  ;;  %v6397_v34 = vld [vmem:[%s7037_s17] ss:$0 sm:$0xff] }
 0x6ed   : > { %v2307_v36 = vpop.f32.mrb[58].mxu1  ;;  %5037 = vmatprep.mubr.msk.f32.mxu0 %vm5653_vm3, %v5654_v63 }
 0x6ee   : > { %v2308_v37 = vadd.f32 %v6280_v54, %v2307_v36  ;;  %v4950_v40 = vpop.f32.mrb[59].mxu1 }
 0x6f0   : > { %5038 = vmatmul.mubr.msk.f32.gmra.mrb[48].mxu0 %vm850_vm1, %v2308_v37 }
 0x6f1   : > { %v2312_v41 = vpop.f32.mrb[60].mxu1  ;;  %5040 = vmatprep.mubr.msk.f32.mxu0 %vm5653_vm3, %v5654_v63 }
 0x6f2   : > { %v2313_v44 = vadd.f32 %v6280_v54, %v2312_v41  ;;  %v4953_v47 = vpop.f32.mrb[61].mxu1 }
 0x6f4   : > { %5041 = vmatmul.mubr.msk.f32.gmra.mrb[50].mxu0 %vm850_vm1, %v2313_v44 }
 0x6f5   : > { %v2317_v9 = vpop.f32.mrb[62].mxu1  ;;  %5043 = vmatprep.mubr.msk.f32.mxu0 %vm5653_vm3, %v5654_v63 }
 0x6f6   : > { %v2318_v11 = vadd.f32 %v6280_v54, %v2317_v9  ;;  %v4956_v48 = vpop.f32.mrb[63].mxu1 }
 0x6f8   : > { %5044 = vmatmul.mubr.msk.f32.gmra.mrb[52].mxu0 %vm850_vm1, %v2318_v11 }
 0x6f9   : > { %v2322_v49 = vpop.f32.mrb[64].mxu1  ;;  %5046 = vmatprep.mubr.msk.f32.mxu0 %vm5653_vm3, %v5654_v63 }
 0x6fa   : > { %v2323_v52 = vadd.f32 %v6280_v54, %v2322_v49  ;;  %v4959_v55 = vpop.f32.mrb[65].mxu1 }
 0x6fc   : > { %5047 = vmatmul.mubr.msk.f32.gmra.mrb[54].mxu0 %vm850_vm1, %v2323_v52 }
 0x6fd   : > { %v2327_v56 = vpop.f32.mrb[66].mxu1  ;;  %5049 = vmatprep.mubr.msk.f32.mxu0 %vm5653_vm3, %v5654_v63 }
 0x6fe   : > { %v2328_v59 = vadd.f32 %v6280_v54, %v2327_v56  ;;  %v4962_v60 = vpop.f32.mrb[67].mxu1 }
 0x700   : > { %5050 = vmatmul.mubr.msk.f32.gmra.mrb[56].mxu0 %vm850_vm1, %v2328_v59 }
 0x701   : > { %v2332_v61 = vpop.f32.mrb[68].mxu1  ;;  %5052 = vmatprep.mubr.msk.f32.mxu0 %vm5653_vm3, %v5654_v63 }
 0x702   : > { %v2333_v0 = vadd.f32 %v6280_v54, %v2332_v61  ;;  %v4965_v3 = vpop.f32.mrb[69].mxu1 }
 0x704   : > { %5053 = vmatmul.mubr.msk.f32.gmra.mrb[58].mxu0 %vm850_vm1, %v2333_v0 }
 0x705   : > { %v2337_v13 = vpop.f32.mrb[70].mxu1  ;;  %5055 = vmatprep.mubr.msk.f32.mxu0 %vm5653_vm3, %v5654_v63 }
 0x706   : > { %v2338_v4 = vadd.f32 %v6280_v54, %v2337_v13  ;;  %v4968_v12 = vpop.f32.mrb[71].mxu1 }
 0x708   : > { %5056 = vmatmul.mubr.msk.f32.gmra.mrb[60].mxu0 %vm850_vm1, %v2338_v4 }
 0x709   : > { %v2342_v14 = vpop.f32.mrb[72].mxu1  ;;  %5058 = vmatprep.mubr.msk.f32.mxu0 %vm5653_vm3, %v5654_v63 }
 0x70a   : > { %v2343_v5 = vadd.f32 %v6280_v54, %v2342_v14  ;;  %v4971_v6 = vpop.f32.mrb[73].mxu1 }
 0x70c   : > { %5059 = vmatmul.mubr.msk.f32.gmra.mrb[62].mxu0 %vm850_vm1, %v2343_v5 }
 0x70d   : > { %v2347_v7 = vpop.f32.mrb[74].mxu1  ;;  %5061 = vmatprep.mubr.msk.f32.mxu0 %vm5653_vm3, %v5654_v63 }
 0x70e   : > { %v2348_v8 = vadd.f32 %v6280_v54, %v2347_v7  ;;  %v4974_v10 = vpop.f32.mrb[75].mxu1 }
 0x710   : > { %5062 = vmatmul.mubr.msk.f32.gmra.mrb[64].mxu0 %vm850_vm1, %v2348_v8 }
 0x711   : > { %v2352_v15 = vpop.f32.mrb[76].mxu1  ;;  %5064 = vmatprep.mubr.msk.f32.mxu0 %vm5653_vm3, %v5654_v63 }
 0x712   : > { %v2353_v16 = vadd.f32 %v6280_v54, %v2352_v15  ;;  %v4977_v17 = vpop.f32.mrb[77].mxu1 }
 0x714   : > { %5065 = vmatmul.mubr.msk.f32.gmra.mrb[66].mxu0 %vm850_vm1, %v2353_v16 }
 0x715   : > { %v2357_v18 = vpop.f32.mrb[78].mxu1  ;;  %5067 = vmatprep.mubr.msk.f32.mxu0 %vm5653_vm3, %v5654_v63 }
 0x716   : > { %v2358_v19 = vadd.f32 %v6280_v54, %v2357_v18  ;;  %v4980_v20 = vpop.f32.mrb[79].mxu1 }
 0x718   : > { %5068 = vmatmul.mubr.msk.f32.gmra.mrb[68].mxu0 %vm850_vm1, %v2358_v19 }
 0x719   : > { %v2362_v21 = vpop.f32.mrb[80].mxu1  ;;  %5070 = vmatprep.mubr.msk.f32.mxu0 %vm5653_vm3, %v5654_v63 }
 0x71a   : > { %v2363_v22 = vadd.f32 %v6280_v54, %v2362_v21  ;;  %v4983_v23 = vpop.f32.mrb[81].mxu1 }
 0x71c   : > { %5071 = vmatmul.mubr.msk.f32.gmra.mrb[70].mxu0 %vm850_vm1, %v2363_v22 }
 0x71d   : > { %v2367_v24 = vpop.f32.mrb[82].mxu1  ;;  %5073 = vmatprep.mubr.msk.f32.mxu0 %vm5653_vm3, %v5654_v63 }
 0x71e   : > { %v2368_v25 = vadd.f32 %v6280_v54, %v2367_v24  ;;  %v4986_v26 = vpop.f32.mrb[83].mxu1 }
 0x720   : > { %5074 = vmatmul.mubr.msk.f32.gmra.mrb[72].mxu0 %vm850_vm1, %v2368_v25 }
 0x721   : > { %v2372_v27 = vpop.f32.mrb[84].mxu1  ;;  %5076 = vmatprep.mubr.msk.f32.mxu0 %vm5653_vm3, %v5654_v63 }
 0x722   : > { %v2373_v29 = vadd.f32 %v6280_v54, %v2372_v27  ;;  %v4989_v30 = vpop.f32.mrb[85].mxu1 }
 0x724   : > { %5077 = vmatmul.mubr.msk.f32.gmra.mrb[74].mxu0 %vm850_vm1, %v2373_v29 }
 0x725   : > { %v2377_v31 = vpop.f32.mrb[86].mxu1  ;;  %5079 = vmatprep.mubr.msk.f32.mxu0 %vm5653_vm3, %v5654_v63 }
 0x726   : > { %v2378_v32 = vadd.f32 %v6280_v54, %v2377_v31  ;;  %v4992_v33 = vpop.f32.mrb[87].mxu1 }
 0x728   : > { %5080 = vmatmul.mubr.msk.f32.gmra.mrb[76].mxu0 %vm850_vm1, %v2378_v32 }
 0x729   : > { %5086 = vmatprep.mubr.msk.f32.mxu0 %vm5653_vm3, %v5654_v63 }
 0x793   : > { %v2539_v35 = vpop.f32.mrb[24].mxu0 }
 0x794   : > { %v2540_v36 = vadd.f32 %v6397_v34, %v2539_v35  ;;  %v5003_v37 = vpop.f32.mrb[25].mxu0 }
 0x796   : > { %5087 = vmatmul.mubr.msk.f32.vlgmr.msra.gmra.mrb[78].mxu0 %vm850_vm1, %v2540_v36 }
 0x797   : > { %v2544_v40 = vpop.f32.mrb[26].mxu0  ;;  %5089 = vmatprep.mubr.msk.f32.mxu0 %vm5653_vm3, %v5654_v63 }
 0x798   : > { %v2545_v54 = vadd.f32 %v6397_v34, %v2544_v40  ;;  %v5006_v41 = vpop.f32.mrb[27].mxu0 }
 0x79a   : > { %5090 = vmatmul.mubr.msk.f32.gmra.mrb[80].mxu0 %vm850_vm1, %v2545_v54 }
 0x79b   : > { %v2549_v44 = vpop.f32.mrb[28].mxu0  ;;  %5092 = vmatprep.mubr.msk.f32.mxu0 %vm5653_vm3, %v5654_v63 }
 0x79c   : > { %v2550_v47 = vadd.f32 %v6397_v34, %v2549_v44  ;;  %v5009_v9 = vpop.f32.mrb[29].mxu0 }
 0x79e   : > { %5093 = vmatmul.mubr.msk.f32.gmra.mrb[82].mxu0 %vm850_vm1, %v2550_v47 }
 0x79f   : > { %v2554_v11 = vpop.f32.mrb[30].mxu0  ;;  %5095 = vmatprep.mubr.msk.f32.mxu0 %vm5653_vm3, %v5654_v63 }
 0x7a0   : > { %v2555_v48 = vadd.f32 %v6397_v34, %v2554_v11  ;;  %v5012_v49 = vpop.f32.mrb[31].mxu0 }
 0x7a2   : > { %5096 = vmatmul.mubr.msk.f32.gmra.mrb[84].mxu0 %vm850_vm1, %v2555_v48 }
 0x7a3   : > { %v2559_v52 = vpop.f32.mrb[32].mxu0  ;;  %5098 = vmatprep.mubr.msk.f32.mxu0 %vm5653_vm3, %v5654_v63 }
 0x7a4   : > { %v2560_v55 = vadd.f32 %v6397_v34, %v2559_v52  ;;  %v5015_v56 = vpop.f32.mrb[33].mxu0 }
 0x7a6   : > { %5099 = vmatmul.mubr.msk.f32.gmra.mrb[86].mxu0 %vm850_vm1, %v2560_v55 }
 0x7a7   : > { %v2564_v59 = vpop.f32.mrb[34].mxu0  ;;  %5101 = vmatprep.mubr.msk.f32.mxu0 %vm5653_vm3, %v5654_v63 }
 0x7a8   : > { %v2565_v60 = vadd.f32 %v6397_v34, %v2564_v59  ;;  %v5018_v61 = vpop.f32.mrb[35].mxu0 }
 0x7aa   : > { %5102 = vmatmul.mubr.msk.f32.gmra.mrb[88].mxu0 %vm850_vm1, %v2565_v60 }
 0x7ab   : > { %v2569_v0 = vpop.f32.mrb[36].mxu0  ;;  %5104 = vmatprep.mubr.msk.f32.mxu0 %vm5653_vm3, %v5654_v63 }
 0x7ac   : > { %v2570_v3 = vadd.f32 %v6397_v34, %v2569_v0  ;;  %v5021_v13 = vpop.f32.mrb[37].mxu0 }
 0x7ae   : > { %5105 = vmatmul.mubr.msk.f32.gmra.mrb[90].mxu0 %vm850_vm1, %v2570_v3 }
 0x7af   : > { %v2574_v4 = vpop.f32.mrb[38].mxu0  ;;  %5107 = vmatprep.mubr.msk.f32.mxu0 %vm5653_vm3, %v5654_v63 }
 0x7b0   : > { %v2575_v12 = vadd.f32 %v6397_v34, %v2574_v4  ;;  %v5024_v14 = vpop.f32.mrb[39].mxu0 }
 0x7b2   : > { %5108 = vmatmul.mubr.msk.f32.gmra.mrb[92].mxu0 %vm850_vm1, %v2575_v12 }
 0x7b3   : > { %v2579_v5 = vpop.f32.mrb[40].mxu0  ;;  %5110 = vmatprep.mubr.msk.f32.mxu0 %vm5653_vm3, %v5654_v63 }
 0x7b4   : > { %v2580_v6 = vadd.f32 %v6397_v34, %v2579_v5  ;;  %v5027_v7 = vpop.f32.mrb[41].mxu0 }
 0x7b6   : > { %5111 = vmatmul.mubr.msk.f32.gmra.mrb[94].mxu0 %vm850_vm1, %v2580_v6 }
 0x7b7   : > { %v2584_v8 = vpop.f32.mrb[42].mxu0  ;;  %5113 = vmatprep.mubr.msk.f32.mxu0 %vm5653_vm3, %v5654_v63 }
 0x7b8   : > { %v2585_v10 = vadd.f32 %v6397_v34, %v2584_v8  ;;  %v5030_v15 = vpop.f32.mrb[43].mxu0 }
 0x7ba   : > { %5114 = vmatmul.mubr.msk.f32.gmra.mrb[96].mxu0 %vm850_vm1, %v2585_v10 }
 0x7bb   : > { %v2589_v16 = vpop.f32.mrb[44].mxu0  ;;  %5116 = vmatprep.mubr.msk.f32.mxu0 %vm5653_vm3, %v5654_v63 }
 0x7bc   : > { %v2590_v17 = vadd.f32 %v6397_v34, %v2589_v16  ;;  %v5033_v18 = vpop.f32.mrb[45].mxu0 }
 0x7be   : > { %5117 = vmatmul.mubr.msk.f32.gmra.mrb[98].mxu0 %vm850_vm1, %v2590_v17 }
 0x7bf   : > { %v2594_v19 = vpop.f32.mrb[46].mxu0  ;;  %5119 = vmatprep.mubr.msk.f32.mxu0 %vm5653_vm3, %v5654_v63 }
 0x7c0   : > { %v2595_v20 = vadd.f32 %v6397_v34, %v2594_v19  ;;  %v5036_v21 = vpop.f32.mrb[47].mxu0 }
 0x7c2   : > { %5120 = vmatmul.mubr.msk.f32.gmra.mrb[100].mxu0 %vm850_vm1, %v2595_v20 }
 0x7c3   : > { %v2599_v22 = vpop.f32.mrb[48].mxu0  ;;  %5122 = vmatprep.mubr.msk.f32.mxu0 %vm5653_vm3, %v5654_v63 }
 0x7c4   : > { %v2600_v23 = vadd.f32 %v6397_v34, %v2599_v22  ;;  %v5039_v24 = vpop.f32.mrb[49].mxu0 }
 0x7c6   : > { %5123 = vmatmul.mubr.msk.f32.gmra.mrb[102].mxu0 %vm850_vm1, %v2600_v23 }
 0x7c7   : > { %v2604_v25 = vpop.f32.mrb[50].mxu0  ;;  %5125 = vmatprep.mubr.msk.f32.mxu0 %vm5653_vm3, %v5654_v63 }
 0x7c8   : > { %v2605_v26 = vadd.f32 %v6397_v34, %v2604_v25  ;;  %v5042_v27 = vpop.f32.mrb[51].mxu0 }
 0x7ca   : > { %5126 = vmatmul.mubr.msk.f32.gmra.mrb[104].mxu0 %vm850_vm1, %v2605_v26 }
 0x7cb   : > { %v2609_v29 = vpop.f32.mrb[52].mxu0  ;;  %5128 = vmatprep.mubr.msk.f32.mxu0 %vm5653_vm3, %v5654_v63 }
 0x7cc   : > { %v2610_v30 = vadd.f32 %v6397_v34, %v2609_v29  ;;  %v5045_v31 = vpop.f32.mrb[53].mxu0 }
 0x7ce   : > { %5129 = vmatmul.mubr.msk.f32.gmra.mrb[106].mxu0 %vm850_vm1, %v2610_v30 }
 0x7cf   : > { %v2614_v32 = vpop.f32.mrb[54].mxu0  ;;  %5131 = vmatprep.mubr.msk.f32.mxu0 %vm5653_vm3, %v5654_v63 }
 0x7d0   : > { %v2615_v33 = vadd.f32 %v6397_v34, %v2614_v32  ;;  %v5048_v35 = vpop.f32.mrb[55].mxu0 }
 0x7d2   : > { %5132 = vmatmul.mubr.msk.f32.gmra.mrb[108].mxu0 %vm850_vm1, %v2615_v33 }
 0x7d3   : > { %v2619_v36 = vpop.f32.mrb[56].mxu0  ;;  %5134 = vmatprep.mubr.msk.f32.mxu0 %vm5653_vm3, %v5654_v63 }
 0x7d4   : > { %v2620_v37 = vadd.f32 %v6397_v34, %v2619_v36  ;;  %v5051_v40 = vpop.f32.mrb[57].mxu0 }
 0x7d6   : > { %5135 = vmatmul.mubr.msk.f32.gmra.mrb[110].mxu0 %vm850_vm1, %v2620_v37 }
 0x7d7   : > { %v2624_v54 = vpop.f32.mrb[58].mxu0  ;;  %5137 = vmatprep.mubr.msk.f32.mxu0 %vm5653_vm3, %v5654_v63 }
 0x7d8   : > { %v2625_v41 = vadd.f32 %v6397_v34, %v2624_v54  ;;  %v5054_v44 = vpop.f32.mrb[59].mxu0 }
 0x7da   : > { %5138 = vmatmul.mubr.msk.f32.gmra.mrb[112].mxu0 %vm850_vm1, %v2625_v41 }
 0x7db   : > { %v2629_v47 = vpop.f32.mrb[60].mxu0  ;;  %5140 = vmatprep.mubr.msk.f32.mxu0 %vm5653_vm3, %v5654_v63 }
 0x7dc   : > { %v2630_v9 = vadd.f32 %v6397_v34, %v2629_v47  ;;  %v5057_v11 = vpop.f32.mrb[61].mxu0 }
 0x7de   : > { %5141 = vmatmul.mubr.msk.f32.gmra.mrb[114].mxu0 %vm850_vm1, %v2630_v9 }
 0x7df   : > { %v2634_v48 = vpop.f32.mrb[62].mxu0  ;;  %5143 = vmatprep.mubr.msk.f32.mxu0 %vm5653_vm3, %v5654_v63 }
 0x7e0   : > { %v2635_v49 = vadd.f32 %v6397_v34, %v2634_v48  ;;  %v5060_v52 = vpop.f32.mrb[63].mxu0 }
 0x7e2   : > { %5144 = vmatmul.mubr.msk.f32.gmra.mrb[116].mxu0 %vm850_vm1, %v2635_v49 }
 0x7e3   : > { %v2639_v55 = vpop.f32.mrb[64].mxu0  ;;  %5146 = vmatprep.mubr.msk.f32.mxu0 %vm5653_vm3, %v5654_v63 }
 0x7e4   : > { %v2640_v56 = vadd.f32 %v6397_v34, %v2639_v55  ;;  %v5063_v59 = vpop.f32.mrb[65].mxu0 }
 0x7e6   : > { %5147 = vmatmul.mubr.msk.f32.gmra.mrb[118].mxu0 %vm850_vm1, %v2640_v56 }
 0x7e7   : > { %v2644_v60 = vpop.f32.mrb[66].mxu0  ;;  %5149 = vmatprep.mubr.msk.f32.mxu0 %vm5653_vm3, %v5654_v63 }
 0x7e8   : > { %v2645_v61 = vadd.f32 %v6397_v34, %v2644_v60  ;;  %v5066_v0 = vpop.f32.mrb[67].mxu0 }
 0x7ea   : > { %5150 = vmatmul.mubr.msk.f32.gmra.mrb[120].mxu0 %vm850_vm1, %v2645_v61 }
 0x7eb   : > { %v2649_v3 = vpop.f32.mrb[68].mxu0  ;;  %5152 = vmatprep.mubr.msk.f32.mxu0 %vm5653_vm3, %v5654_v63 }
 0x7ec   : > { %v2650_v13 = vadd.f32 %v6397_v34, %v2649_v3  ;;  %v5069_v4 = vpop.f32.mrb[69].mxu0 }
 0x7ee   : > { %5153 = vmatmul.mubr.msk.f32.gmra.mrb[122].mxu0 %vm850_vm1, %v2650_v13 }
 0x7ef   : > { %v2654_v12 = vpop.f32.mrb[70].mxu0  ;;  %5155 = vmatprep.mubr.msk.f32.mxu0 %vm5653_vm3, %v5654_v63 }
 0x7f0   : > { %v2655_v14 = vadd.f32 %v6397_v34, %v2654_v12  ;;  %v5072_v5 = vpop.f32.mrb[71].mxu0 }
 0x7f2   : > { %5156 = vmatmul.mubr.msk.f32.gmra.mrb[124].mxu0 %vm850_vm1, %v2655_v14 }
 0x7f3   : > { %v2659_v6 = vpop.f32.mrb[72].mxu0  ;;  %5158 = vmatprep.mubr.msk.f32.mxu0 %vm5653_vm3, %v5654_v63 }
 0x7f4   : > { %v2660_v7 = vadd.f32 %v6397_v34, %v2659_v6  ;;  %v5075_v8 = vpop.f32.mrb[73].mxu0 }
 0x7f6   : > { %5159 = vmatmul.mubr.msk.f32.gmra.mrb[126].mxu0 %vm850_vm1, %v2660_v7 }
 0x7f7   : > { %v2664_v10 = vpop.f32.mrb[74].mxu0  ;;  %5161 = vmatprep.mubr.msk.f32.mxu0 %vm5653_vm3, %v5654_v63 }
 0x7f8   : > { %v2665_v15 = vadd.f32 %v6397_v34, %v2664_v10  ;;  %v5078_v16 = vpop.f32.mrb[75].mxu0 }
 0x7fa   : > { %5162 = vmatmul.mubr.msk.f32.gmra.mrb[128].mxu0 %vm850_vm1, %v2665_v15 }
 0x7fb   : > { %v2669_v17 = vpop.f32.mrb[76].mxu0  ;;  %5164 = vmatprep.mubr.msk.f32.mxu0 %vm5653_vm3, %v5654_v63 }
 0x7fc   : > { %v2670_v18 = vadd.f32 %v6397_v34, %v2669_v17  ;;  %v5081_v19 = vpop.f32.mrb[77].mxu0 }
 0x7fe   : > { %5165 = vmatmul.mubr.msk.f32.gmra.mrb[130].mxu0 %vm850_vm1, %v2670_v18 }
 0x869   : > { %v2820_v20 = vpop.f32.mrb[78].mxu0 }
 0x86a   : > { %v6505_v21 = vmul.f32 0.17677669, %v2820_v20  ;;  %v5088_v22 = vpop.f32.mrb[79].mxu0 }
 0x86c   : > { %v2981_v23 = vsel %vm757_vm0, %v6505_v21, -inf }
 0x86d   : > { %2982 = vmax.xlane.f32.xlu1 %v2981_v23  ;;  %v2825_v24 = vpop.f32.mrb[80].mxu0 }
 0x86e   : > { %v6509_v25 = vmul.f32 0.17677669, %v2825_v24  ;;  %v5091_v26 = vpop.f32.mrb[81].mxu0 }
 0x870   : > { %v2984_v27 = vsel %vm757_vm0, %v6509_v25, -inf }
 0x871   : > { %2985 = vmax.xlane.f32.xlu1 %v2984_v27  ;;  %v2830_v34 = vpop.f32.mrb[82].mxu0 }
 0x872   : > { %v6513_v29 = vmul.f32 0.17677669, %v2830_v34  ;;  %v5094_v30 = vpop.f32.mrb[83].mxu0 }
 0x874   : > { %v2987_v31 = vsel %vm757_vm0, %v6513_v29, -inf }
 0x875   : > { %2988 = vmax.xlane.f32.xlu1 %v2987_v31  ;;  %v2835_v32 = vpop.f32.mrb[84].mxu0 }
 0x876   : > { %v6517_v33 = vmul.f32 0.17677669, %v2835_v32  ;;  %v5097_v35 = vpop.f32.mrb[85].mxu0 }
 0x878   : > { %v2990_v36 = vsel %vm757_vm0, %v6517_v33, -inf }
 0x879   : > { %2991 = vmax.xlane.f32.xlu1 %v2990_v36  ;;  %v2840_v37 = vpop.f32.mrb[86].mxu0 }
 0x87a   : > { %v6521_v40 = vmul.f32 0.17677669, %v2840_v37  ;;  %v5100_v54 = vpop.f32.mrb[87].mxu0 }
 0x87c   : > { %v2993_v41 = vsel %vm757_vm0, %v6521_v40, -inf }
 0x87d   : > { %2994 = vmax.xlane.f32.xlu1 %v2993_v41  ;;  %v2845_v44 = vpop.f32.mrb[88].mxu0 }
 0x87e   : > { %v6525_v47 = vmul.f32 0.17677669, %v2845_v44  ;;  %v5103_v9 = vpop.f32.mrb[89].mxu0 }
 0x880   : > { %v2996_v11 = vsel %vm757_vm0, %v6525_v47, -inf }
 0x881   : > { %2997 = vmax.xlane.f32.xlu1 %v2996_v11  ;;  %v2850_v48 = vpop.f32.mrb[90].mxu0 }
 0x882   : > { %v6529_v49 = vmul.f32 0.17677669, %v2850_v48  ;;  %v5106_v52 = vpop.f32.mrb[91].mxu0 }
 0x884   : > { %v2999_v55 = vsel %vm757_vm0, %v6529_v49, -inf }
 0x885   : > { %3000 = vmax.xlane.f32.xlu0 %v2999_v55  ;;  %v2855_v56 = vpop.f32.mrb[92].mxu0 }
 0x886   : > { %v6533_v59 = vmul.f32 0.17677669, %v2855_v56  ;;  %v5109_v60 = vpop.f32.mrb[93].mxu0 }
 0x888   : > { %v3002_v61 = vsel %vm757_vm0, %v6533_v59, -inf }
 0x889   : > { %3003 = vmax.xlane.f32.xlu1 %v3002_v61  ;;  %v2860_v0 = vpop.f32.mrb[94].mxu0 }
 0x88a   : > { %v6537_v3 = vmul.f32 0.17677669, %v2860_v0  ;;  %v5112_v13 = vpop.f32.mrb[95].mxu0 }
 0x88c   : > { %v3005_v4 = vsel %vm757_vm0, %v6537_v3, -inf }
 0x88d   : > { %3006 = vmax.xlane.f32.xlu1 %v3005_v4  ;;  %v2865_v12 = vpop.f32.mrb[96].mxu0 }
 0x88e   : > { %v6541_v14 = vmul.f32 0.17677669, %v2865_v12  ;;  %v5115_v5 = vpop.f32.mrb[97].mxu0 }
 0x890   : > { %v3008_v6 = vsel %vm757_vm0, %v6541_v14, -inf }
 0x891   : > { %3009 = vmax.xlane.f32.xlu1 %v3008_v6  ;;  %v2870_v7 = vpop.f32.mrb[98].mxu0 }
 0x892   : > { %v6545_v8 = vmul.f32 0.17677669, %v2870_v7  ;;  %v5118_v10 = vpop.f32.mrb[99].mxu0 }
 0x894   : > { %v3011_v15 = vsel %vm757_vm0, %v6545_v8, -inf }
 0x895   : > { %3012 = vmax.xlane.f32.xlu1 %v3011_v15  ;;  %v2875_v16 = vpop.f32.mrb[100].mxu0 }
 0x896   : > { %v6549_v17 = vmul.f32 0.17677669, %v2875_v16  ;;  %v5121_v18 = vpop.f32.mrb[101].mxu0 }
 0x898   : > { %v3014_v19 = vsel %vm757_vm0, %v6549_v17, -inf }
 0x899   : > { %3015 = vmax.xlane.f32.xlu1 %v3014_v19  ;;  %v2880_v20 = vpop.f32.mrb[102].mxu0 }
 0x89a   : > { %v6553_v22 = vmul.f32 0.17677669, %v2880_v20  ;;  %v5124_v23 = vpop.f32.mrb[103].mxu0 }
 0x89c   : > { %v3017_v24 = vsel %vm757_vm0, %v6553_v22, -inf }
 0x89d   : > { %3018 = vmax.xlane.f32.xlu1 %v3017_v24  ;;  %v2885_v26 = vpop.f32.mrb[104].mxu0 }
 0x89e   : > { %v6557_v27 = vmul.f32 0.17677669, %v2885_v26  ;;  %v5127_v34 = vpop.f32.mrb[105].mxu0 }
 0x8a0   : > { %v3020_v30 = vsel %vm757_vm0, %v6557_v27, -inf }
 0x8a1   : > { %3021 = vmax.xlane.f32.xlu1 %v3020_v30  ;;  %v2890_v31 = vpop.f32.mrb[106].mxu0 }
 0x8a2   : > { %v6561_v32 = vmul.f32 0.17677669, %v2890_v31  ;;  %v5130_v35 = vpop.f32.mrb[107].mxu0 }
 0x8a4   : > { %v3023_v36 = vsel %vm757_vm0, %v6561_v32, -inf }
 0x8a5   : > { %3024 = vmax.xlane.f32.xlu1 %v3023_v36  ;;  %v2895_v37 = vpop.f32.mrb[108].mxu0 }
 0x8a6   : > { %v6565_v54 = vmul.f32 0.17677669, %v2895_v37  ;;  %v5133_v41 = vpop.f32.mrb[109].mxu0 }
 0x8a8   : > { %v3026_v44 = vsel %vm757_vm0, %v6565_v54, -inf }
 0x8a9   : > { %3027 = vmax.xlane.f32.xlu0 %v3026_v44  ;;  %v2900_v9 = vpop.f32.mrb[110].mxu0 }
 0x8aa   : > { %v6569_v11 = vmul.f32 0.17677669, %v2900_v9  ;;  %v5136_v48 = vpop.f32.mrb[111].mxu0 }
 0x8ac   : > { %v3029_v52 = vsel %vm757_vm0, %v6569_v11, -inf }
 0x8ad   : > { %3030 = vmax.xlane.f32.xlu1 %v3029_v52  ;;  %v2905_v55 = vpop.f32.mrb[112].mxu0 }
 0x8ae   : > { %v6573_v56 = vmul.f32 0.17677669, %v2905_v55  ;;  %v5139_v60 = vpop.f32.mrb[113].mxu0 }
 0x8b0   : > { %v3032_v61 = vsel %vm757_vm0, %v6573_v56, -inf }
 0x8b1   : > { %3033 = vmax.xlane.f32.xlu0 %v3032_v61  ;;  %v2910_v0 = vpop.f32.mrb[114].mxu0 }
 0x8b2   : > { %v6577_v13 = vmul.f32 0.17677669, %v2910_v0  ;;  %v5142_v4 = vpop.f32.mrb[115].mxu0 }
 0x8b4   : > { %v3035_v12 = vsel %vm757_vm0, %v6577_v13, -inf }
 0x8b5   : > { %3036 = vmax.xlane.f32.xlu1 %v3035_v12  ;;  %v2915_v5 = vpop.f32.mrb[116].mxu0 }
 0x8b6   : > { %v6581_v6 = vmul.f32 0.17677669, %v2915_v5  ;;  %v5145_v7 = vpop.f32.mrb[117].mxu0 }
 0x8b8   : > { %v3038_v10 = vsel %vm757_vm0, %v6581_v6, -inf }
 0x8b9   : > { %3039 = vmax.xlane.f32.xlu0 %v3038_v10  ;;  %v2920_v15 = vpop.f32.mrb[118].mxu0 }
 0x8ba   : > { %v6585_v16 = vmul.f32 0.17677669, %v2920_v15  ;;  %v5148_v18 = vpop.f32.mrb[119].mxu0 }
 0x8bc   : > { %v3041_v19 = vsel %vm757_vm0, %v6585_v16, -inf }
 0x8bd   : > { %3042 = vmax.xlane.f32.xlu1 %v3041_v19  ;;  %v2925_v20 = vpop.f32.mrb[120].mxu0 }
 0x8be   : > { %v6589_v23 = vmul.f32 0.17677669, %v2925_v20  ;;  %v5151_v24 = vpop.f32.mrb[121].mxu0 }
 0x8c0   : > { %v3044_v26 = vsel %vm757_vm0, %v6589_v23, -inf }
 0x8c1   : > { %3045 = vmax.xlane.f32.xlu0 %v3044_v26  ;;  %v2930_v34 = vpop.f32.mrb[122].mxu0 }
 0x8c2   : > { %v6593_v30 = vmul.f32 0.17677669, %v2930_v34  ;;  %v5154_v31 = vpop.f32.mrb[123].mxu0 }
 0x8c4   : > { %v3047_v35 = vsel %vm757_vm0, %v6593_v30, -inf }
 0x8c5   : > { %3048 = vmax.xlane.f32.xlu1 %v3047_v35  ;;  %v2935_v36 = vpop.f32.mrb[124].mxu0 }
 0x8c6   : > { %v6597_v37 = vmul.f32 0.17677669, %v2935_v36  ;;  %v5157_v41 = vpop.f32.mrb[125].mxu0 }
 0x8c8   : > { %v3050_v44 = vsel %vm757_vm0, %v6597_v37, -inf }
 0x8c9   : > { %3051 = vmax.xlane.f32.xlu1 %v3050_v44  ;;  %v2940_v9 = vpop.f32.mrb[126].mxu0 }
 0x8ca   : > { %v6601_v48 = vmul.f32 0.17677669, %v2940_v9  ;;  %v5160_v52 = vpop.f32.mrb[127].mxu0 }
 0x8cc   : > { %v3053_v55 = vsel %vm757_vm0, %v6601_v48, -inf }
 0x8cd   : > { %3054 = vmax.xlane.f32.xlu1 %v3053_v55  ;;  %v2945_v60 = vpop.f32.mrb[128].mxu0 }
 0x8ce   : > { %v6605_v61 = vmul.f32 0.17677669, %v2945_v60  ;;  %v5163_v0 = vpop.f32.mrb[129].mxu0 }
 0x8d0   : > { %v3056_v4 = vsel %vm757_vm0, %v6605_v61, -inf }
 0x8d1   : > { %3057 = vmax.xlane.f32.xlu1 %v3056_v4  ;;  %v2950_v12 = vpop.f32.mrb[130].mxu0 }
 0x8d2   : > { %v5166_v5 = vpop.f32.mrb[131].mxu0 }
 0x8fa   : > { %v2983_v7 = vpop.xlane.xlu1 %2982 }
 0x8fb   : > { %v3062_v10 = vsub.f32 %v6505_v21, %v2983_v7  ;;  %v6628_v7 = vmul.f32 0.17677669, %v2950_v12 }
 0x8fd   : > { %v3089_v15 = vmul.f32 1.442695, %v3062_v10 }
 0x8fe   : > { %v2986_v18 = vpop.xlane.xlu1 %2985 }
 0x8ff   : > { %5535 = vpow2.f32 %v3089_v15  ;;  %v3063_v19 = vsub.f32 %v6509_v25, %v2986_v18 }
 0x901   : > { %v3091_v20 = vmul.f32 1.442695, %v3063_v19 }
 0x902   : > { %v2989_v24 = vpop.xlane.xlu1 %2988 }
 0x903   : > { %5537 = vpow2.f32 %v3091_v20  ;;  %v3064_v26 = vsub.f32 %v6513_v29, %v2989_v24  ;;  %v3059_v20 = vsel %vm757_vm0, %v6628_v7, -inf }
 0x905   : > { %v3093_v34 = vmul.f32 1.442695, %v3064_v26 }
 0x906   : > { %v2992_v31 = vpop.xlane.xlu1 %2991 }
 0x907   : > { %5539 = vpow2.f32 %v3093_v34  ;;  %v3065_v35 = vsub.f32 %v6517_v33, %v2992_v31 }
 0x909   : > { %v6613_v36 = vpop.eup %5535  ;;  %v3095_v41 = vmul.f32 1.442695, %v3065_v35 }
 0x90a   : > { %v2995_v44 = vpop.xlane.xlu1 %2994  ;;  %v3143_v21 = vsel %vm757_vm0, %v6613_v36, 0.0 }
 0x90b   : > { %5541 = vpow2.f32 %v3095_v41  ;;  %v3066_v25 = vsub.f32 %v6521_v40, %v2995_v44  ;;  %3144 = vadd.xlane.f32.xlu0 %v3143_v21 }
 0x90d   : > { %v6618_v9 = vpop.eup %5537  ;;  %v3097_v52 = vmul.f32 1.442695, %v3066_v25 }
 0x90e   : > { %v2998_v29 = vpop.xlane.xlu1 %2997  ;;  %v3146_v55 = vsel %vm757_vm0, %v6618_v9, 0.0 }
 0x90f   : > { %5543 = vpow2.f32 %v3097_v52  ;;  %v3067_v33 = vsub.f32 %v6525_v47, %v2998_v29  ;;  %3147 = vadd.xlane.f32.xlu0 %v3146_v55 }
 0x911   : > { %v6623_v60 = vpop.eup %5539  ;;  %v3099_v0 = vmul.f32 1.442695, %v3067_v33 }
 0x912   : > { %v3001_v4 = vpop.xlane.xlu0 %3000  ;;  %v3149_v5 = vsel %vm757_vm0, %v6623_v60, 0.0 }
 0x913   : > { %5545 = vpow2.f32 %v3099_v0  ;;  %v3068_v40 = vsub.f32 %v6529_v49, %v3001_v4  ;;  %3150 = vadd.xlane.f32.xlu0 %v3149_v5 }
 0x915   : > { %v6630_v10 = vpop.eup %5541  ;;  %v3101_v15 = vmul.f32 1.442695, %v3068_v40 }
 0x916   : > { %v3004_v18 = vpop.xlane.xlu1 %3003  ;;  %v3152_v47 = vsel %vm757_vm0, %v6630_v10, 0.0 }
 0x917   : > { %5547 = vpow2.f32 %v3101_v15  ;;  %v3069_v19 = vsub.f32 %v6533_v59, %v3004_v18  ;;  %3153 = vadd.xlane.f32.xlu0 %v3152_v47 }
 0x919   : > { %v6637_v24 = vpop.eup %5543  ;;  %v3103_v49 = vmul.f32 1.442695, %v3069_v19 }
 0x91a   : > { %v3007_v26 = vpop.xlane.xlu1 %3006  ;;  %v3155_v12 = vsel %vm757_vm0, %v6637_v24, 0.0 }
 0x91b   : > { %5549 = vpow2.f32 %v3103_v49  ;;  %v3070_v34 = vsub.f32 %v6537_v3, %v3007_v26  ;;  %3156 = vadd.xlane.f32.xlu1 %v3155_v12  ;;  %3060 = vmax.xlane.f32.xlu0 %v3059_v20 }
 0x91d   : > { %v6642_v31 = vpop.eup %5545  ;;  %v3105_v35 = vmul.f32 1.442695, %v3070_v34 }
 0x91e   : > { %v3010_v59 = vpop.xlane.xlu1 %3009  ;;  %v3158_v41 = vsel %vm757_vm0, %v6642_v31, 0.0 }
 0x91f   : > { %5551 = vpow2.f32 %v3105_v35  ;;  %v3071_v44 = vsub.f32 %v6541_v14, %v3010_v59  ;;  %3159 = vadd.xlane.f32.xlu1 %v3158_v41 }
 0x921   : > { %v6647_v21 = vpop.eup %5547  ;;  %v3107_v25 = vmul.f32 1.442695, %v3071_v44 }
 0x922   : > { %v3013_v52 = vpop.xlane.xlu1 %3012  ;;  %v3161_v3 = vsel %vm757_vm0, %v6647_v21, 0.0 }
 0x923   : > { %5553 = vpow2.f32 %v3107_v25  ;;  %v3072_v29 = vsub.f32 %v6545_v8, %v3013_v52  ;;  %3162 = vadd.xlane.f32.xlu0 %v3161_v3 }
 0x925   : > { %v6652_v55 = vpop.eup %5549  ;;  %v3109_v33 = vmul.f32 1.442695, %v3072_v29 }
 0x926   : > { %v3016_v0 = vpop.xlane.xlu1 %3015  ;;  %v3164_v4 = vsel %vm757_vm0, %v6652_v55, 0.0 }
 0x927   : > { %5555 = vpow2.f32 %v3109_v33  ;;  %v3073_v14 = vsub.f32 %v6549_v17, %v3016_v0  ;;  %3165 = vadd.xlane.f32.xlu1 %v3164_v4 }
 0x929   : > { %v6657_v5 = vpop.eup %5551  ;;  %v3111_v40 = vmul.f32 1.442695, %v3073_v14 }
 0x92a   : > { %v3019_v15 = vpop.xlane.xlu1 %3018  ;;  %v3167_v18 = vsel %vm757_vm0, %v6657_v5, 0.0 }
 0x92b   : > { %5557 = vpow2.f32 %v3111_v40  ;;  %v3074_v8 = vsub.f32 %v6553_v22, %v3019_v15  ;;  %3168 = vadd.xlane.f32.xlu0 %v3167_v18 }
 0x92d   : > { %v6662_v47 = vpop.eup %5553  ;;  %v3113_v19 = vmul.f32 1.442695, %v3074_v8 }
 0x92e   : > { %v3022_v20 = vpop.xlane.xlu1 %3021  ;;  %v3170_v49 = vsel %vm757_vm0, %v6662_v47, 0.0 }
 0x92f   : > { %5559 = vpow2.f32 %v3113_v19  ;;  %v3075_v17 = vsub.f32 %v6557_v27, %v3022_v20  ;;  %3171 = vadd.xlane.f32.xlu1 %v3170_v49 }
 0x931   : > { %v6667_v26 = vpop.eup %5555  ;;  %v3115_v12 = vmul.f32 1.442695, %v3075_v17 }
 0x932   : > { %v3025_v34 = vpop.xlane.xlu1 %3024  ;;  %v3173_v35 = vsel %vm757_vm0, %v6667_v26, 0.0 }
 0x933   : > { %5561 = vpow2.f32 %v3115_v12  ;;  %v3076_v22 = vsub.f32 %v6561_v32, %v3025_v34  ;;  %3174 = vadd.xlane.f32.xlu0 %v3173_v35 }
 0x935   : > { %v6672_v59 = vpop.eup %5557  ;;  %v3117_v41 = vmul.f32 1.442695, %v3076_v22 }
 0x936   : > { %v3028_v44 = vpop.xlane.xlu0 %3027  ;;  %v3176_v25 = vsel %vm757_vm0, %v6672_v59, 0.0 }
 0x937   : > { %5563 = vpow2.f32 %v3117_v41  ;;  %v3077_v27 = vsub.f32 %v6565_v54, %v3028_v44  ;;  %3177 = vadd.xlane.f32.xlu1 %v3176_v25 }
 0x939   : > { %v6677_v52 = vpop.eup %5559  ;;  %v3119_v3 = vmul.f32 1.442695, %v3077_v27 }
 0x93a   : > { %v3031_v29 = vpop.xlane.xlu1 %3030  ;;  %v3179_v33 = vsel %vm757_vm0, %v6677_v52, 0.0 }
 0x93b   : > { %5565 = vpow2.f32 %v3119_v3  ;;  %v3078_v32 = vsub.f32 %v6569_v11, %v3031_v29  ;;  %3180 = vadd.xlane.f32.xlu0 %v3179_v33 }
 0x93d   : > { %v6682_v0 = vpop.eup %5561  ;;  %v3121_v4 = vmul.f32 1.442695, %v3078_v32 }
 0x93e   : > { %v3034_v14 = vpop.xlane.xlu0 %3033  ;;  %v3182_v40 = vsel %vm757_vm0, %v6682_v0, 0.0 }
 0x93f   : > { %5567 = vpow2.f32 %v3121_v4  ;;  %v3079_v54 = vsub.f32 %v6573_v56, %v3034_v14  ;;  %3183 = vadd.xlane.f32.xlu1 %v3182_v40 }
 0x941   : > { %v6687_v15 = vpop.eup %5563  ;;  %v3123_v18 = vmul.f32 1.442695, %v3079_v54 }
 0x942   : > { %v3037_v8 = vpop.xlane.xlu1 %3036  ;;  %v3185_v19 = vsel %vm757_vm0, %v6687_v15, 0.0 }
 0x943   : > { %5569 = vpow2.f32 %v3123_v18  ;;  %v3080_v11 = vsub.f32 %v6577_v13, %v3037_v8  ;;  %3186 = vadd.xlane.f32.xlu0 %v3185_v19 }
 0x945   : > { %v6692_v20 = vpop.eup %5565  ;;  %v3125_v49 = vmul.f32 1.442695, %v3080_v11 }
 0x946   : > { %v3040_v17 = vpop.xlane.xlu0 %3039  ;;  %v3188_v12 = vsel %vm757_vm0, %v6692_v20, 0.0 }
 0x947   : > { %5571 = vpow2.f32 %v3125_v49  ;;  %v3081_v56 = vsub.f32 %v6581_v6, %v3040_v17  ;;  %3189 = vadd.xlane.f32.xlu1 %v3188_v12 }
 0x949   : > { %v6697_v34 = vpop.eup %5567  ;;  %v3127_v35 = vmul.f32 1.442695, %v3081_v56 }
 0x94a   : > { %v3043_v22 = vpop.xlane.xlu1 %3042  ;;  %v3191_v41 = vsel %vm757_vm0, %v6697_v34, 0.0 }
 0x94b   : > { %5573 = vpow2.f32 %v3127_v35  ;;  %v3082_v13 = vsub.f32 %v6585_v16, %v3043_v22  ;;  %3192 = vadd.xlane.f32.xlu0 %v3191_v41 }
 0x94d   : > { %v6702_v44 = vpop.eup %5569  ;;  %v3129_v25 = vmul.f32 1.442695, %v3082_v13 }
 0x94e   : > { %v3046_v27 = vpop.xlane.xlu0 %3045  ;;  %v3194_v3 = vsel %vm757_vm0, %v6702_v44, 0.0 }
 0x94f   : > { %5575 = vpow2.f32 %v3129_v25  ;;  %v3083_v6 = vsub.f32 %v6589_v23, %v3046_v27  ;;  %3195 = vadd.xlane.f32.xlu1 %v3194_v3 }
 0x951   : > { %v6707_v29 = vpop.eup %5571  ;;  %v3131_v33 = vmul.f32 1.442695, %v3083_v6 }
 0x952   : > { %v3049_v32 = vpop.xlane.xlu1 %3048  ;;  %v3197_v4 = vsel %vm757_vm0, %v6707_v29, 0.0 }
 0x953   : > { %5577 = vpow2.f32 %v3131_v33  ;;  %v3084_v16 = vsub.f32 %v6593_v30, %v3049_v32  ;;  %3198 = vadd.xlane.f32.xlu0 %v3197_v4  ;;  %v2108_v33 = vsel %vm2107_vm6, %v6238_v53, -inf }
 0x955   : > { %v6712_v14 = vpop.eup %5573  ;;  %v3133_v40 = vmul.f32 1.442695, %v3084_v16 }
 0x956   : > { %v3052_v54 = vpop.xlane.xlu1 %3051  ;;  %v3200_v18 = vsel %vm757_vm0, %v6712_v14, 0.0 }
 0x957   : > { %5579 = vpow2.f32 %v3133_v40  ;;  %v3085_v23 = vsub.f32 %v6597_v37, %v3052_v54  ;;  %3201 = vadd.xlane.f32.xlu1 %v3200_v18 }
 0x959   : > { %v6717_v8 = vpop.eup %5575  ;;  %v3135_v19 = vmul.f32 1.442695, %v3085_v23 }
 0x95a   : > { %v3055_v11 = vpop.xlane.xlu1 %3054  ;;  %v3203_v49 = vsel %vm757_vm0, %v6717_v8, 0.0 }
 0x95b   : > { %5581 = vpow2.f32 %v3135_v19  ;;  %v3086_v30 = vsub.f32 %v6601_v48, %v3055_v11  ;;  %3204 = vadd.xlane.f32.xlu0 %v3203_v49 }
 0x95d   : > { %v6722_v17 = vpop.eup %5577  ;;  %v3137_v12 = vmul.f32 1.442695, %v3086_v30 }
 0x95e   : > { %v3058_v56 = vpop.xlane.xlu1 %3057  ;;  %v3206_v35 = vsel %vm757_vm0, %v6722_v17, 0.0 }
 0x95f   : > { %5583 = vpow2.f32 %v3137_v12  ;;  %v3087_v37 = vsub.f32 %v6605_v61, %v3058_v56  ;;  %3207 = vadd.xlane.f32.xlu1 %v3206_v35 }
 0x961   : > { %v6727_v22 = vpop.eup %5579  ;;  %v3139_v41 = vmul.f32 1.442695, %v3087_v37 }
 0x962   : > { %v3209_v13 = vsel %vm757_vm0, %v6727_v22, 0.0 }
 0x963   : > { %5585 = vpow2.f32 %v3139_v41  ;;  %3210 = vadd.xlane.f32.xlu0 %v3209_v13 }
 0x965   : > { %v6731_v48 = vpop.eup %5581 }
 0x966   : > { %v3212_v25 = vsel %vm757_vm0, %v6731_v48, 0.0 }
 0x967   : > { %3213 = vadd.xlane.f32.xlu1 %v3212_v25 }
 0x969   : > { %v6735_v27 = vpop.eup %5583 }
 0x96a   : > { %v3215_v61 = vsel %vm757_vm0, %v6735_v27, 0.0 }
 0x96b   : > { %3216 = vadd.xlane.f32.xlu0 %v3215_v61 }
 0x96d   : > { %v6739_v3 = vpop.eup %5585 }
 0x96e   : > { %v3218_v6 = vsel %vm757_vm0, %v6739_v3, 0.0 }
 0x96f   : > { %3219 = vadd.xlane.f32.xlu1 %v3218_v6 }
 0x973   : > { %2109 = vmax.xlane.f32.xlu1 %v2108_v33 }
 0x998   : > { %v3145_v32 = vpop.xlane.xlu0 %3144 }
 0x999   : > { %5587 = vrcp.f32 %v3145_v32 }
 0x99c   : > { %v3148_v4 = vpop.xlane.xlu0 %3147 }
 0x99d   : > { %5589 = vrcp.f32 %v3148_v4 }
 0x9a0   : > { %v3151_v16 = vpop.xlane.xlu0 %3150 }
 0x9a1   : > { %5591 = vrcp.f32 %v3151_v16 }
 0x9a3   : > { %v5588_v40 = vpop.eup %5587 }
 0x9a4   : > { %v3251_v54 = vmul.f32 %v5588_v40, %v6613_v36  ;;  %v3154_v18 = vpop.xlane.xlu0 %3153 }
 0x9a5   : > { %5593 = vrcp.f32 %v3154_v18 }
 0x9a6   : > { %5172 = vmatmul.mubr.msk.f32.vlgmr.msra.gmra.mrb[88].mxu1 %vm757_vm0, %v3251_v54 }
 0x9a7   : > { %v5590_v23 = vpop.eup %5589  ;;  %5174 = vmatprep.mubr.msk.f32.mxu1 %vm5653_vm3, %v5654_v63 }
 0x9a8   : > { %v3157_v19 = vpop.xlane.xlu1 %3156  ;;  %v3061_v11 = vpop.xlane.xlu0 %3060  ;;  %v3252_v49 = vmul.f32 %v5590_v23, %v6618_v9 }
 0x9a9   : > { %5595 = vrcp.f32 %v3157_v19  ;;  %v3088_v30 = vsub.f32 %v6628_v7, %v3061_v11 }
 0x9aa   : > { %5175 = vmatmul.mubr.msk.f32.gmra.mrb[90].mxu1 %vm757_vm0, %v3252_v49 }
 0x9ab   : > { %v5592_v12 = vpop.eup %5591  ;;  %v3141_v56 = vmul.f32 1.442695, %v3088_v30  ;;  %5177 = vmatprep.mubr.msk.f32.mxu1 %vm5653_vm3, %v5654_v63 }
 0x9ac   : > { %v3160_v36 = vpop.xlane.xlu1 %3159  ;;  %v3253_v35 = vmul.f32 %v5592_v12, %v6623_v60 }
 0x9ad   : > { %5597 = vpow2.f32 %v3141_v56 }
 0x9ae   : > { %5599 = vrcp.f32 %v3160_v36  ;;  %5178 = vmatmul.mubr.msk.f32.gmra.mrb[92].mxu1 %vm757_vm0, %v3253_v35 }
 0x9af   : > { %v5594_v37 = vpop.eup %5593  ;;  %5180 = vmatprep.mubr.msk.f32.mxu1 %vm5653_vm3, %v5654_v63 }
 0x9b0   : > { %v3163_v9 = vpop.xlane.xlu0 %3162  ;;  %v3254_v7 = vmul.f32 %v5594_v37, %v6630_v10 }
 0x9b1   : > { %5601 = vrcp.f32 %v3163_v9 }
 0x9b2   : > { %5181 = vmatmul.mubr.msk.f32.gmra.mrb[94].mxu1 %vm757_vm0, %v3254_v7 }
 0x9b3   : > { %v5596_v41 = vpop.eup %5595  ;;  %5183 = vmatprep.mubr.msk.f32.mxu1 %vm5653_vm3, %v5654_v63 }
 0x9b4   : > { %v3166_v13 = vpop.xlane.xlu1 %3165  ;;  %v3255_v60 = vmul.f32 %v5596_v41, %v6637_v24 }
 0x9b5   : > { %5603 = vrcp.f32 %v3166_v13 }
 0x9b6   : > { %5184 = vmatmul.mubr.msk.f32.gmra.mrb[96].mxu1 %vm757_vm0, %v3255_v60 }
 0x9b7   : > { %v6764_v25 = vpop.eup %5597  ;;  %5186 = vmatprep.mubr.msk.f32.mxu1 %vm5653_vm3, %v5654_v63 }
 0x9b8   : > { %v5600_v61 = vpop.eup %5599  ;;  %v3169_v10 = vpop.xlane.xlu0 %3168  ;;  %v3221_v6 = vsel %vm757_vm0, %v6764_v25, 0.0 }
 0x9b9   : > { %5605 = vrcp.f32 %v3169_v10  ;;  %3222 = vadd.xlane.f32.xlu0 %v3221_v6  ;;  %v3256_v33 = vmul.f32 %v5600_v61, %v6642_v31 }
 0x9bb   : > { %v5602_v32 = vpop.eup %5601  ;;  %5187 = vmatmul.mubr.msk.f32.gmra.mrb[98].mxu1 %vm757_vm0, %v3256_v33 }
 0x9bc   : > { %v3172_v24 = vpop.xlane.xlu1 %3171  ;;  %5189 = vmatprep.mubr.msk.f32.mxu1 %vm5653_vm3, %v5654_v63  ;;  %v3257_v4 = vmul.f32 %v5602_v32, %v6647_v21 }
 0x9bd   : > { %5607 = vrcp.f32 %v3172_v24 }
 0x9bf   : > { %v5604_v16 = vpop.eup %5603  ;;  %5190 = vmatmul.mubr.msk.f32.gmra.mrb[100].mxu1 %vm757_vm0, %v3257_v4 }
 0x9c0   : > { %v3175_v40 = vpop.xlane.xlu0 %3174  ;;  %5192 = vmatprep.mubr.msk.f32.mxu1 %vm5653_vm3, %v5654_v63  ;;  %v3258_v54 = vmul.f32 %v5604_v16, %v6652_v55 }
 0x9c1   : > { %5609 = vrcp.f32 %v3175_v40 }
 0x9c3   : > { %v5606_v31 = vpop.eup %5605  ;;  %5193 = vmatmul.mubr.msk.f32.gmra.mrb[102].mxu1 %vm757_vm0, %v3258_v54 }
 0x9c4   : > { %v3178_v18 = vpop.xlane.xlu1 %3177  ;;  %5195 = vmatprep.mubr.msk.f32.mxu1 %vm5653_vm3, %v5654_v63  ;;  %v3259_v21 = vmul.f32 %v5606_v31, %v6657_v5 }
 0x9c5   : > { %5611 = vrcp.f32 %v3178_v18 }
 0x9c7   : > { %v5608_v23 = vpop.eup %5607  ;;  %5196 = vmatmul.mubr.msk.f32.gmra.mrb[104].mxu1 %vm757_vm0, %v3259_v21 }
 0x9c8   : > { %v3181_v19 = vpop.xlane.xlu0 %3180  ;;  %5198 = vmatprep.mubr.msk.f32.mxu1 %vm5653_vm3, %v5654_v63  ;;  %v3260_v55 = vmul.f32 %v5608_v23, %v6662_v47  ;;  %v6840_v23 = vand.u32 127, %v1773_v38 }
 0x9c9   : > { %5613 = vrcp.f32 %v3181_v19 }
 0x9cb   : > { %v5610_v11 = vpop.eup %5609  ;;  %5199 = vmatmul.mubr.msk.f32.gmra.mrb[106].mxu1 %vm757_vm0, %v3260_v55 }
 0x9cc   : > { %v3184_v49 = vpop.xlane.xlu1 %3183  ;;  %5201 = vmatprep.mubr.msk.f32.mxu1 %vm5653_vm3, %v5654_v63  ;;  %v3261_v5 = vmul.f32 %v5610_v11, %v6667_v26 }
 0x9cd   : > { %5615 = vrcp.f32 %v3184_v49 }
 0x9cf   : > { %v5612_v30 = vpop.eup %5611  ;;  %5202 = vmatmul.mubr.msk.f32.gmra.mrb[108].mxu1 %vm757_vm0, %v3261_v5 }
 0x9d0   : > { %v3187_v12 = vpop.xlane.xlu0 %3186  ;;  %5204 = vmatprep.mubr.msk.f32.mxu1 %vm5653_vm3, %v5654_v63  ;;  %v3262_v47 = vmul.f32 %v5612_v30, %v6672_v59 }
 0x9d1   : > { %5617 = vrcp.f32 %v3187_v12 }
 0x9d3   : > { %v5614_v56 = vpop.eup %5613  ;;  %5205 = vmatmul.mubr.msk.f32.gmra.mrb[110].mxu1 %vm757_vm0, %v3262_v47 }
 0x9d4   : > { %v3190_v36 = vpop.xlane.xlu1 %3189  ;;  %5207 = vmatprep.mubr.msk.f32.mxu1 %vm5653_vm3, %v5654_v63  ;;  %v3263_v26 = vmul.f32 %v5614_v56, %v6677_v52 }
 0x9d5   : > { %5619 = vrcp.f32 %v3190_v36 }
 0x9d7   : > { %v5616_v35 = vpop.eup %5615  ;;  %5208 = vmatmul.mubr.msk.f32.gmra.mrb[112].mxu1 %vm757_vm0, %v3263_v26 }
 0x9d8   : > { %v3193_v37 = vpop.xlane.xlu0 %3192  ;;  %5210 = vmatprep.mubr.msk.f32.mxu1 %vm5653_vm3, %v5654_v63  ;;  %v3264_v59 = vmul.f32 %v5616_v35, %v6682_v0 }
 0x9d9   : > { %5621 = vrcp.f32 %v3193_v37 }
 0x9db   : > { %v5618_v9 = vpop.eup %5617  ;;  %5211 = vmatmul.mubr.msk.f32.gmra.mrb[114].mxu1 %vm757_vm0, %v3264_v59 }
 0x9dc   : > { %v3196_v7 = vpop.xlane.xlu1 %3195  ;;  %5213 = vmatprep.mubr.msk.f32.mxu1 %vm5653_vm3, %v5654_v63  ;;  %v3265_v52 = vmul.f32 %v5618_v9, %v6687_v15 }
 0x9dd   : > { %5623 = vrcp.f32 %v3196_v7 }
 0x9df   : > { %v5620_v41 = vpop.eup %5619  ;;  %5214 = vmatmul.mubr.msk.f32.gmra.mrb[116].mxu1 %vm757_vm0, %v3265_v52 }
 0x9e0   : > { %v3199_v13 = vpop.xlane.xlu0 %3198  ;;  %5216 = vmatprep.mubr.msk.f32.mxu1 %vm5653_vm3, %v5654_v63  ;;  %v3266_v0 = vmul.f32 %v5620_v41, %v6692_v20 }
 0x9e1   : > { %5625 = vrcp.f32 %v3199_v13 }
 0x9e3   : > { %v5622_v60 = vpop.eup %5621  ;;  %5217 = vmatmul.mubr.msk.f32.gmra.mrb[118].mxu1 %vm757_vm0, %v3266_v0 }
 0x9e4   : > { %v3202_v61 = vpop.xlane.xlu1 %3201  ;;  %5219 = vmatprep.mubr.msk.f32.mxu1 %vm5653_vm3, %v5654_v63  ;;  %v3267_v15 = vmul.f32 %v5622_v60, %v6697_v34 }
 0x9e5   : > { %5627 = vrcp.f32 %v3202_v61 }
 0x9e7   : > { %v5624_v10 = vpop.eup %5623  ;;  %5220 = vmatmul.mubr.msk.f32.gmra.mrb[120].mxu1 %vm757_vm0, %v3267_v15 }
 0x9e8   : > { %v3205_v6 = vpop.xlane.xlu0 %3204  ;;  %5222 = vmatprep.mubr.msk.f32.mxu1 %vm5653_vm3, %v5654_v63  ;;  %v3268_v20 = vmul.f32 %v5624_v10, %v6702_v44 }
 0x9e9   : > { %5629 = vrcp.f32 %v3205_v6 }
 0x9eb   : > { %v5626_v33 = vpop.eup %5625  ;;  %5223 = vmatmul.mubr.msk.f32.gmra.mrb[122].mxu1 %vm757_vm0, %v3268_v20 }
 0x9ec   : > { %v3208_v32 = vpop.xlane.xlu1 %3207  ;;  %5225 = vmatprep.mubr.msk.f32.mxu1 %vm5653_vm3, %v5654_v63  ;;  %v3269_v34 = vmul.f32 %v5626_v33, %v6707_v29 }
 0x9ed   : > { %5631 = vrcp.f32 %v3208_v32 }
 0x9ef   : > { %v5628_v24 = vpop.eup %5627  ;;  %5226 = vmatmul.mubr.msk.f32.gmra.mrb[124].mxu1 %vm757_vm0, %v3269_v34 }
 0x9f0   : > { %v3211_v4 = vpop.xlane.xlu0 %3210  ;;  %5228 = vmatprep.mubr.msk.f32.mxu1 %vm5653_vm3, %v5654_v63  ;;  %v3270_v44 = vmul.f32 %v5628_v24, %v6712_v14 }
 0x9f1   : > { %5633 = vrcp.f32 %v3211_v4 }
 0x9f3   : > { %v5630_v16 = vpop.eup %5629  ;;  %5229 = vmatmul.mubr.msk.f32.gmra.mrb[126].mxu1 %vm757_vm0, %v3270_v44 }
 0x9f4   : > { %v3214_v40 = vpop.xlane.xlu1 %3213  ;;  %5231 = vmatprep.mubr.msk.f32.mxu1 %vm5653_vm3, %v5654_v63  ;;  %v3271_v29 = vmul.f32 %v5630_v16, %v6717_v8 }
 0x9f5   : > { %5635 = vrcp.f32 %v3214_v40 }
 0x9f7   : > { %v5632_v54 = vpop.eup %5631  ;;  %5232 = vmatmul.mubr.msk.f32.gmra.mrb[128].mxu1 %vm757_vm0, %v3271_v29 }
 0x9f8   : > { %v3217_v31 = vpop.xlane.xlu0 %3216  ;;  %5234 = vmatprep.mubr.msk.f32.mxu1 %vm5653_vm3, %v5654_v63  ;;  %v3272_v14 = vmul.f32 %v5632_v54, %v6722_v17 }
 0x9f9   : > { %5637 = vrcp.f32 %v3217_v31 }
 0x9fb   : > { %v5634_v18 = vpop.eup %5633  ;;  %5235 = vmatmul.mubr.msk.f32.gmra.mrb[130].mxu1 %vm757_vm0, %v3272_v14 }
 0x9fc   : > { %v3220_v21 = vpop.xlane.xlu1 %3219  ;;  %5237 = vmatprep.mubr.msk.f32.mxu1 %vm5653_vm3, %v5654_v63  ;;  %v3273_v8 = vmul.f32 %v5634_v18, %v6727_v22 }
 0x9fd   : > { %5639 = vrcp.f32 %v3220_v21 }
 0x9ff   : > { %v5636_v19 = vpop.eup %5635  ;;  %5238 = vmatmul.mubr.msk.f32.gmra.mrb[132].mxu1 %vm757_vm0, %v3273_v8  ;;  %v3560_v8 = vld [vmem:[%s7064_s26 + $0x8] sm:$0xff] }
 0xa00   : > { %v2110_v55 = vpop.xlane.xlu1 %2109  ;;  %5240 = vmatprep.mubr.msk.f32.mxu1 %vm5653_vm3, %v5654_v63  ;;  %v3274_v17 = vmul.f32 %v5636_v19, %v6731_v48  ;;  %4486 = vmatprep.mubr.msk.f32.mxu0 %vm3567_vm9, %v3560_v8  ;;  %v5480_v8 = vld [vmem:[%s7038_s18 + $0x48] ss:$36 sps:$4 sm:$0xff]  }
 0xa01   : > { %vm2111_vm7 = vcmp.ge.f32.partialorder %v6238_v53, %v2110_v55 }
 0xa02   : > { %v2112_v11 = vsel %vm2111_vm7, %v6840_v23, 27 }
 0xa03   : > { %v5638_v49 = vpop.eup %5637  ;;  %v2113_v22 = vsel %vm2107_vm6, %v2112_v11, 2147483647  ;;  %5241 = vmatmul.mubr.msk.f32.gmra.mrb[134].mxu1 %vm757_vm0, %v3274_v17 }
 0xa04   : > { %5243 = vmatprep.mubr.msk.f32.mxu1 %vm5653_vm3, %v5654_v63  ;;  %v3275_v38 = vmul.f32 %v5638_v49, %v6735_v27  ;;  %v2115_v5 = vshra.s32 %v2113_v22, 16  ;;  %v2114_v61 = vand.u32 65535, %v2113_v22 }
 0xa06   : > { %v2117_v30 = vcvt.s32.f32 %v2115_v5  ;;  %v2116_v20 = vcvt.s32.f32 %v2114_v61 }
 0xa07   : > { %v5640_v12 = vpop.eup %5639  ;;  %5244 = vmatmul.mubr.msk.f32.gmra.mrb[136].mxu1 %vm757_vm0, %v3275_v38 }
 0xa08   : > { %2118 = vmin.xlane.f32.xlu0 %v2117_v30  ;;  %5246 = vmatprep.mubr.msk.f32.mxu1 %vm5653_vm3, %v5654_v63  ;;  %v3276_v53 = vmul.f32 %v5640_v12, %v6739_v3 }
 0xa0b   : > { %5247 = vmatmul.mubr.msk.f32.gmra.mrb[138].mxu1 %vm757_vm0, %v3276_v53 }
 0xa0c   : > { %5249 = vmatprep.mubr.msk.f32.mxu1 %vm5653_vm3, %v5654_v63 }
 0xa46   : > { %v3223_v48 = vpop.xlane.xlu0 %3222 }
 0xa47   : > { %5641 = vrcp.f32 %v3223_v48 }
 0xa51   : > { %v5642_v47 = vpop.eup %5641 }
 0xa52   : > { %v3277_v27 = vmul.f32 %v5642_v47, %v6764_v25 }
 0xa54   : > { %5250 = vmatmul.mubr.msk.f32.gmra.mrb[140].mxu1 %vm757_vm0, %v3277_v27 }
 0xa55   : > { %3940 = vmatprep.mubr.bf16.mxu1 %v5656_v28 }
 0xa79   : > { %v3425_v56 = vpop.f32.mrb[88].mxu1 }
 0xa7a   : > { %v5173_v36 = vpop.f32.mrb[89].mxu1 }
 0xa7d   : > { %v3430_v26 = vpop.f32.mrb[90].mxu1 }
 0xa7e   : > { %v5383_v35 = vpack.c.bf16 %v3430_v26, %v3425_v56  ;;  %v5176_v37 = vpop.f32.mrb[91].mxu1 }
 0xa80   : > { %5384 = vmatpush1.bf16.msra.mxu0 %v5383_v35 }
 0xa81   : > { %v3435_v3 = vpop.f32.mrb[92].mxu1  ;;  %5385 = vmatprep.subr.bf16.mxu0 %v5652_v62 }
 0xa82   : > { %v5179_v59 = vpop.f32.mrb[93].mxu1 }
 0xa85   : > { %v3440_v9 = vpop.f32.mrb[94].mxu1 }
 0xa86   : > { %v5386_v7 = vpack.c.bf16 %v3440_v9, %v3435_v3  ;;  %v5182_v52 = vpop.f32.mrb[95].mxu1 }
 0xa88   : > { %5387 = vmatpush1.bf16.msra.mxu0 %v5386_v7 }
 0xa89   : > { %v3445_v41 = vpop.f32.mrb[96].mxu1  ;;  %5388 = vmatprep.subr.bf16.mxu0 %v5652_v62 }
 0xa8a   : > { %v5185_v25 = vpop.f32.mrb[97].mxu1 }
 0xa8e   : > { %v3450_v13 = vpop.f32.mrb[98].mxu1 }
 0xa8f   : > { %v5389_v0 = vpack.c.bf16 %v3450_v13, %v3445_v41  ;;  %v5188_v60 = vpop.f32.mrb[99].mxu1 }
 0xa91   : > { %5390 = vmatpush1.bf16.msra.mxu0 %v5389_v0 }
 0xa92   : > { %v3455_v15 = vpop.f32.mrb[100].mxu1  ;;  %5391 = vmatprep.subr.bf16.mxu0 %v5652_v62 }
 0xa93   : > { %v5191_v10 = vpop.f32.mrb[101].mxu1 }
 0xa95   : > { %v6866_v6 = vpop.xlane.xlu0 %2118 }
 0xa96   : > { %v3460_v33 = vpop.f32.mrb[102].mxu1  ;;  %vm2120_vm8 = vcmp.eq.f32.partialorder %v2117_v30, %v6866_v6 }
 0xa97   : > { %v5392_v32 = vpack.c.bf16 %v3460_v33, %v3455_v15  ;;  %v5194_v34 = vpop.f32.mrb[103].mxu1  ;;  %v2121_v24 = vsel %vm2120_vm8, %v2116_v20, inf }
 0xa98   : > { %2122 = vmin.xlane.f32.xlu1 %v2121_v24  ;;  %v3559_v34 = vld [vmem:[%s7064_s26] sm:$0xff] }
 0xa99   : > { %5393 = vmatpush1.bf16.msra.mxu0 %v5392_v32 }
 0xa9a   : > { %v3465_v4 = vpop.f32.mrb[104].mxu1  ;;  %5394 = vmatprep.subr.bf16.mxu0 %v5652_v62 }
 0xa9b   : > { %v5197_v44 = vpop.f32.mrb[105].mxu1 }
 0xa9e   : > { %v3470_v16 = vpop.f32.mrb[106].mxu1 }
 0xa9f   : > { %v5395_v40 = vpack.c.bf16 %v3470_v16, %v3465_v4  ;;  %v5200_v29 = vpop.f32.mrb[107].mxu1  ;;  %v3562_v4 = vld [vmem:[%s7064_s26 + $0x18] sm:$0xff]  ;;  %v3561_v16 = vld [vmem:[%s7064_s26 + $0x10] sm:$0xff] }
 0xaa0   : > { %v3563_v29 = vld [vmem:[%s7064_s26 + $0x20] sm:$0xff] }
 0xaa1   : > { %5396 = vmatpush1.bf16.msra.mxu0 %v5395_v40  ;;  %v3564_v40 = vld [vmem:[%s7064_s26 + $0x28] sm:$0xff] }
 0xaa2   : > { %v3475_v54 = vpop.f32.mrb[108].mxu1  ;;  %5397 = vmatprep.subr.bf16.mxu0 %v5652_v62 }
 0xaa3   : > { %v5203_v31 = vpop.f32.mrb[109].mxu1 }
 0xaa4   : > { %v3565_v31 = vld [vmem:[%s7064_s26 + $0x30] sm:$0x7] }
 0xaa6   : > { %v3480_v14 = vpop.f32.mrb[110].mxu1 }
 0xaa7   : > { %v5398_v18 = vpack.c.bf16 %v3480_v14, %v3475_v54  ;;  %v5206_v21 = vpop.f32.mrb[111].mxu1  ;;  %v3566_v54 = vld [vmem:[%s7064_s26 + $0x38] sm:$0x7]  ;;  %v5477_v14 = vld [vmem:[%s7038_s18] ss:$36 sps:$4 sm:$0xff]  }
 0xaa8   : > { %v5482_v21 = vld [vmem:[%s7038_s18 + $0x4c] ss:$36 sps:$4 sm:$0xff]  }
 0xaa9   : > { %5399 = vmatpush1.bf16.msra.mxu0 %v5398_v18  ;;  %v5479_v18 = vld [vmem:[%s7038_s18 + $0x4] ss:$36 sps:$4 sm:$0xff]  }
 0xaaa   : > { %v3485_v19 = vpop.f32.mrb[112].mxu1  ;;  %5400 = vmatprep.subr.bf16.mxu0 %v5652_v62  ;;  %3908 = vmatprep.subr.bf16.mxu1 %v5479_v18 }
 0xaab   : > { %v5209_v55 = vpop.f32.mrb[113].mxu1  ;;  %3909 = vmatpush1.bf16.msra.mxu1 %v5477_v14 }
 0xaac   : > { %3910 = vmatprep.subr.bf16.mxu1 %v5482_v21 }
 0xaae   : > { %v3490_v17 = vpop.f32.mrb[114].mxu1 }
 0xaaf   : > { %v5401_v11 = vpack.c.bf16 %v3490_v17, %v3485_v19  ;;  %v5212_v49 = vpop.f32.mrb[115].mxu1  ;;  %3911 = vmatpush1.bf16.msra.mxu1 %v5480_v8 }
 0xab1   : > { %5402 = vmatpush1.bf16.msra.mxu0 %v5401_v11  ;;  %v2125_v11 = vcvt.f32.s32 %v6866_v6 }
 0xab2   : > { %v3495_v22 = vpop.f32.mrb[116].mxu1  ;;  %5403 = vmatprep.subr.bf16.mxu0 %v5652_v62 }
 0xab3   : > { %v5215_v38 = vpop.f32.mrb[117].mxu1 }
 0xab6   : > { %v3500_v5 = vpop.f32.mrb[118].mxu1 }
 0xab7   : > { %v5404_v30 = vpack.c.bf16 %v3500_v5, %v3495_v22  ;;  %v5218_v12 = vpop.f32.mrb[119].mxu1 }
 0xab9   : > { %5405 = vmatpush1.bf16.msra.mxu0 %v5404_v30  ;;  %v2126_v30 = vshll.u32 %v2125_v11, 16 }
 0xaba   : > { %v3505_v53 = vpop.f32.mrb[120].mxu1  ;;  %5406 = vmatprep.subr.bf16.mxu0 %v5652_v62 }
 0xabb   : > { %v5221_v48 = vpop.f32.mrb[121].mxu1 }
 0xabe   : > { %v3510_v47 = vpop.f32.mrb[122].mxu1 }
 0xabf   : > { %v5407_v27 = vpack.c.bf16 %v3510_v47, %v3505_v53  ;;  %v5224_v56 = vpop.f32.mrb[123].mxu1 }
 0xac1   : > { %5408 = vmatpush1.bf16.msra.mxu0 %v5407_v27  ;;  %v5485_v27 = vld [vmem:[%s7038_s18 + $0xc] ss:$36 sps:$4 sm:$0xff]  }
 0xac2   : > { %v3515_v36 = vpop.f32.mrb[124].mxu1  ;;  %5409 = vmatprep.subr.bf16.mxu0 %v5652_v62 }
 0xac3   : > { %v5227_v26 = vpop.f32.mrb[125].mxu1 }
 0xac6   : > { %v3520_v35 = vpop.f32.mrb[126].mxu1 }
 0xac7   : > { %v5410_v37 = vpack.c.bf16 %v3520_v35, %v3515_v36  ;;  %v5230_v3 = vpop.f32.mrb[127].mxu1  ;;  %v5488_v36 = vld [vmem:[%s7038_s18 + $0x54] ss:$36 sps:$4 sm:$0xff]  }
 0xac8   : > { %v5486_v35 = vld [vmem:[%s7038_s18 + $0x50] ss:$36 sps:$4 sm:$0xff]  }
 0xac9   : > { %5411 = vmatpush1.bf16.msra.mxu0 %v5410_v37  ;;  %v5494_v37 = vld [vmem:[%s7038_s18 + $0x1c] ss:$36 sps:$4 sm:$0xff]  }
 0xaca   : > { %v3525_v59 = vpop.f32.mrb[128].mxu1  ;;  %5412 = vmatprep.subr.bf16.mxu0 %v5652_v62 }
 0xacb   : > { %v5233_v9 = vpop.f32.mrb[129].mxu1 }
 0xacc   : > { %v5492_v9 = vld [vmem:[%s7038_s18 + $0x18] ss:$36 sps:$4 sm:$0xff]  }
 0xace   : > { %v3530_v7 = vpop.f32.mrb[130].mxu1 }
 0xacf   : > { %v5413_v52 = vpack.c.bf16 %v3530_v7, %v3525_v59  ;;  %v5236_v41 = vpop.f32.mrb[131].mxu1  ;;  %v5489_v59 = vld [vmem:[%s7038_s18 + $0x10] ss:$36 sps:$4 sm:$0xff]  }
 0xad0   : > { %v5497_v41 = vld [vmem:[%s7038_s18 + $0x5c] ss:$36 sps:$4 sm:$0xff]  }
 0xad1   : > { %5414 = vmatpush1.bf16.msra.mxu0 %v5413_v52 }
 0xad2   : > { %v3535_v25 = vpop.f32.mrb[132].mxu1  ;;  %5415 = vmatprep.subr.bf16.mxu0 %v5652_v62 }
 0xad3   : > { %v5239_v13 = vpop.f32.mrb[133].mxu1 }
 0xad4   : > { %v5495_v13 = vld [vmem:[%s7038_s18 + $0x58] ss:$36 sps:$4 sm:$0xff]  }
 0xad6   : > { %v3540_v0 = vpop.f32.mrb[134].mxu1 }
 0xad7   : > { %v5416_v60 = vpack.c.bf16 %v3540_v0, %v3535_v25  ;;  %v5242_v61 = vpop.f32.mrb[135].mxu1  ;;  %v5500_v25 = vld [vmem:[%s7038_s18 + $0x64] ss:$36 sps:$4 sm:$0xff]  }
 0xad8   : > { %v5498_v0 = vld [vmem:[%s7038_s18 + $0x60] ss:$36 sps:$4 sm:$0xff]   ;;  %v5502_v61 = vld [vmem:[%s7038_s18 + $0x68] ss:$36 sps:$4 sm:$0xff]  }
 0xad9   : > { %5417 = vmatpush1.bf16.msra.mxu0 %v5416_v60  ;;  %v5501_v60 = vld [vmem:[%s7038_s18 + $0x20] ss:$36 sps:$4 sm:$0xff]  }
 0xada   : > { %v3545_v15 = vpop.f32.mrb[136].mxu1  ;;  %5418 = vmatprep.subr.bf16.mxu0 %v5652_v62 }
 0xadb   : > { %v5245_v10 = vpop.f32.mrb[137].mxu1 }
 0xade   : > { %v3550_v20 = vpop.f32.mrb[138].mxu1 }
 0xadf   : > { %v5419_v33 = vpack.c.bf16 %v3550_v20, %v3545_v15  ;;  %v5248_v32 = vpop.f32.mrb[139].mxu1 }
 0xae1   : > { %5420 = vmatpush1.bf16.msra.mxu0 %v5419_v33 }
 0xae2   : > { %3632 = vmatprep.subr.mxu0 %v5654_v63 }
 0xb25   : > { %v2123_v17 = vpop.xlane.xlu1 %2122 }
 0xb26   : > { %v2124_v5 = vcvt.f32.s32 %v2123_v17 }
 0xb27   : > { %v3555_v24 = vpop.f32.mrb[140].mxu1 }
 0xb28   : > { %v5251_v44 = vpop.f32.mrb[141].mxu1  ;;  %3633 = vmatpush1.msra.mxu0 %v3555_v24  ;;  %v2127_v48 = vadd.s32 %v2126_v30, %v2124_v5 }
 0xb29   : > { %3645 = vmatmul.mubr.f32.vlgmr.msra.gmra.mrb[132].mxu0 %v3559_v34  ;;  %5421 = vmatprep.subr.bf16.mxu0 %v5652_v62 }
 0xb2a   : > { %4487 = vmatprep.mubr.msk.f32.mxu0 %vm3567_vm9, %v3562_v4  ;;  %vm2128_vm13 = vcmp.eq.s32.totalorder %v6840_v23, %v2127_v48  ;;  %v5491_v23 = vld [vmem:[%s7038_s18 + $0x14] ss:$36 sps:$4 sm:$0xff]  }
 0xb2b   : > { %v4400_v26 = vsel %vm2128_vm13, 1.0, %v5654_v63  ;;  %3990 = vmatprep.subr.bf16.mxu1 %v5491_v23 }
 0xb2d   : > { %3650 = vmatmul.mubr.f32.gmra.mrb[134].mxu0 %v3561_v16 }
 0xb2e   : > { %4488 = vmatprep.mubr.msk.f32.mxu0 %vm3567_vm9, %v3564_v40 }
 0xb31   : > { %3655 = vmatmul.mubr.f32.gmra.mrb[136].mxu0 %v3563_v29 }
 0xb32   : > { %4489 = vmatprep.mubr.msk.f32.mxu0 %vm3567_vm9, %v3566_v54 }
 0xb35   : > { %3660 = vmatmul.mubr.f32.gmra.mrb[138].mxu0 %v3565_v31 }
 0xb36   : > { %5260 = vmatprep.mubr.msk.f32.mxu0 %vm5653_vm3, %v5654_v63 }
 0xbfc   : > { %v3646_v19 = vpop.f32.mrb[132].mxu0 }
 0xbfd   : > { %v3648_v55 = vpop.f32.mrb[133].mxu0 }
 0xc00   : > { %v3651_v49 = vpop.f32.mrb[134].mxu0 }
 0xc01   : > { %v5422_v22 = vpack.c.bf16 %v3651_v49, %v3646_v19  ;;  %v3653_v38 = vpop.f32.mrb[135].mxu0 }
 0xc03   : > { %5423 = vmatpush3.bf16.msra.mxu0 %v5422_v22 }
 0xc04   : > { %v3656_v12 = vpop.f32.mrb[136].mxu0  ;;  %5424 = vmatprep.subr.bf16.mxu0 %v5652_v62  ;;  %v5483_v62 = vld [vmem:[%s7038_s18 + $0x8] ss:$36 sps:$4 sm:$0xff]  }
 0xc05   : > { %v3658_v53 = vpop.f32.mrb[137].mxu0 }
 0xc08   : > { %v3661_v47 = vpop.f32.mrb[138].mxu0 }
 0xc09   : > { %v5425_v6 = vpack.c.bf16 %v3661_v47, %v3656_v12  ;;  %v3663_v56 = vpop.f32.mrb[139].mxu0 }
 0xc0b   : > { %5427 = vmatpush3.bf16.msk.msra.mxu0 %vm5426_vm12, %v5425_v6 }
 0xc0c   : > { %3949 = vmatprep.subr.bf16.mxu0 %v5485_v27 }
 0xc0e   : > { %5261 = vmatmul.mubr.msk.f32.vlgmr.msra.gmra.mrb[140].mxu0 %vm3665_vm14, %v4400_v26 }
 0xc0f   : > { %3950 = vmatpush1.bf16.msra.mxu0 %v5483_v62  ;;  %3981 = vmatprep.mubr.bf16.mxu0 %v5656_v28 }
 0xc10   : > { %3951 = vmatprep.subr.bf16.mxu0 %v5488_v36 }
 0xc13   : > { %3952 = vmatpush1.bf16.msra.mxu0 %v5486_v35 }
 0xc14   : > { %4031 = vmatprep.subr.bf16.mxu0 %v5494_v37 }
 0xce1   : > { %v3739_v3 = vpop.f32.mrb[140].mxu0 }
 0xce2   : > { %v3743_v7 = vpack.c.bf16 %v3739_v3, %v3739_v3  ;;  %v5262_v52 = vpop.f32.mrb[141].mxu0 }
 0xce4   : > { %4511 = vmatmul.mubr.msk.bf16.vlgmr.msra.gmra.mrb[144].mxu1 %vm850_vm1, %v3743_v7  ;;  %4512 = vmatmul.mubr.msk.bf16.vlgmr.msra.gmra.mrb[144].mxu0 %vm850_vm1, %v3743_v7 }
 0xce5   : > { %3991 = vmatpush1.bf16.msra.mxu1 %v5489_v59  ;;  %4032 = vmatpush1.bf16.msra.mxu0 %v5492_v9 }
 0xce6   : > { %3992 = vmatprep.subr.bf16.mxu1 %v5497_v41  ;;  %4033 = vmatprep.subr.bf16.mxu0 %v5500_v25 }
 0xce7   : > { %4022 = vmatprep.mubr.bf16.mxu1 %v5656_v28  ;;  %4063 = vmatprep.mubr.bf16.mxu0 %v5656_v28  ;;  %v3764_v28 = vld [vmem:[%s7039_s19] sm:$0xff] }
 0xce8   : > { %v3863_v15 = vrot.slane %v3764_v28, %v1775_v42  ;;  %v3871_v10 = vrot.slane %v3764_v28, %v1783_v43  ;;  %v3867_v20 = vrot.slane %v3764_v28, %v1779_v45  ;;  %v3875_v33 = vrot.slane %v3764_v28, %v1787_v46 }
 0xce9   : > { %3993 = vmatpush1.bf16.msra.mxu1 %v5495_v13  ;;  %4034 = vmatpush1.bf16.msra.mxu0 %v5498_v0  ;;  %v3879_v45 = vrot.slane %v3764_v28, %v1791_v57  ;;  %v3887_v46 = vrot.slane %v3764_v28, %v1799_v58  ;;  %v3883_v8 = vrot.slane %v3764_v28, %v1795_v1 }
 0xcea   : > { %5263 = vmatprep.subr.bf16.mxu1 %v5654_v63  ;;  %v3891_v19 = vrot.slane %v3764_v28, %v1803_v2  ;;  %v4510_v2 = vld [vmem:[%s7039_s19 + $0x8] ss:$0 sm:$0xff] }
 0xcec   : > { %4513 = vmatmul.mubr.msk.bf16.vlgmr.msra.gmra.mrb[148].mxu1 %vm850_vm1, %v3743_v7  ;;  %4514 = vmatmul.mubr.msk.bf16.vlgmr.msra.gmra.mrb[148].mxu0 %vm850_vm1, %v3743_v7 }
 0xced   : > { %5264 = vmatpush3.bf16.msra.mxu1 %v5501_v60  ;;  %5267 = vmatprep.mubr.msk.bf16.mxu1 %vm5653_vm3, %v5654_v63 }
 0xcee   : > { %5265 = vmatprep.subr.bf16.mxu1 %v5654_v63 }
 0xcf1   : > { %5266 = vmatpush3.bf16.msra.mxu1 %v5502_v61 }
 0xcf4   : > { %5268 = vmatmul.mubr.msk.bf16.vlgmr.msra.gmra.mrb[152].mxu1 %vm850_vm1, %v3743_v7 }
 0xdb7   : > { %v3942_v63 = vpop.f32.mrb[144].mxu1  ;;  %v3983_v32 = vpop.f32.mrb[144].mxu0 }
 0xdb8   : > { %v3943_v34 = vadd.f32 %v3942_v63, %v3863_v15  ;;  %v3984_v24 = vadd.f32 %v3983_v32, %v3871_v10  ;;  %v3944_v4 = vpop.f32.mrb[145].mxu1  ;;  %v3985_v44 = vpop.f32.mrb[145].mxu0 }
 0xdb9   : > { %v3945_v16 = vadd.f32 %v3944_v4, %v3867_v20  ;;  %v3986_v40 = vadd.f32 %v3985_v44, %v3875_v33  ;;  %v3946_v29 = vpop.f32.mrb[146].mxu1  ;;  %v3987_v54 = vpop.f32.mrb[146].mxu0 }
 0xdba   : > { %v3947_v42 = vpop.f32.mrb[147].mxu1  ;;  %v3988_v31 = vpop.f32.mrb[147].mxu0 }
 0xdbb   : > { %v4121_v14 = vcombine.low %v3943_v34, %v3945_v16  ;;  %v4122_v43 = vcombine.low %v3984_v24, %v3986_v40 }
 0xdbd   : > { %v4131_v18 = vrot.slane %v4121_v14, %v6236_v51  ;;  %v4138_v21 = vrot.slane %v4122_v43, %v6236_v51 }
 0xdbf   : > { %v4153_v55 = vcombine.low %v4131_v18, %v4138_v21  ;;  %v4024_v17 = vpop.f32.mrb[148].mxu1  ;;  %v4065_v11 = vpop.f32.mrb[148].mxu0 }
 0xdc0   : > { %v4025_v49 = vadd.f32 %v4024_v17, %v3879_v45  ;;  %v4066_v22 = vadd.f32 %v4065_v11, %v3887_v46  ;;  %v4026_v38 = vpop.f32.mrb[149].mxu1  ;;  %v4067_v57 = vpop.f32.mrb[149].mxu0 }
 0xdc1   : > { %v4027_v5 = vadd.f32 %v4026_v38, %v3883_v8  ;;  %v4068_v30 = vadd.f32 %v4067_v57, %v3891_v19  ;;  %v4028_v58 = vpop.f32.mrb[150].mxu1  ;;  %v4069_v12 = vpop.f32.mrb[150].mxu0  ;;  %v4161_v26 = vrot.slane %v4153_v55, %v6236_v51 }
 0xdc2   : > { %v4029_v53 = vpop.f32.mrb[151].mxu1  ;;  %v4070_v48 = vpop.f32.mrb[151].mxu0 }
 0xdc3   : > { %v4123_v47 = vcombine.low %v4025_v49, %v4027_v5  ;;  %v4124_v27 = vcombine.low %v4066_v22, %v4068_v30 }
 0xdc5   : > { %v4145_v1 = vrot.slane %v4123_v47, %v6236_v51  ;;  %v4152_v39 = vrot.slane %v4124_v27, %v6236_v51 }
 0xdc7   : > { %v4154_v6 = vcombine.low %v4145_v1, %v4152_v39  ;;  %v4106_v56 = vpop.f32.mrb[152].mxu1 }
 0xdc8   : > { %v4107_v62 = vadd.f32 %v4510_v2, %v4106_v56  ;;  %v5269_v36 = vpop.f32.mrb[153].mxu1 }
 0xdc9   : > { %v4168_v35 = vrot.slane %v4154_v6, %v6236_v51  ;;  %v4109_v23 = vpop.f32.mrb[154].mxu1 }
 0xdca   : > { %v4176_v37 = vrot.slane %v4107_v62, %v6236_v51  ;;  %v5270_v3 = vpop.f32.mrb[155].mxu1 }
 0xdcb   : > { %v4169_v59 = vcombine.low %v4161_v26, %v4168_v35 }
 0xdcc   : > { %v4183_v9 = vrot.slane %v4176_v37, %v6236_v51 }
 0xdcd   : > { %4186 = vst [vmem:[%s739_s24] sm:$0xff] %v4169_v59 }
 0xdce   : > { %4187 = vst.msk [vmem:[%s739_s24 + $0x8] sm:$0x1] %vm6270_vm5, %v4183_v9 }
 0xdcf PF: > { %s33_s3 = sadd.s32 1, %s5649_s3  }
 0xdd0   : > { %p30_p4 = scmp.ge.s32.totalorder %s33_s3, 4  }
 0xdd2   :  { %32 = sbr.rel (!%p30_p4) target bundleno = 8 (0x8), region = 160 }

</bundles_post_ra>
